<compile_context>
chip_gen: v7x
topology: tpu7x:2x2x1
jax: 0.10.0
libtpu: 0.0.40
codegen_flags: <defaults>
</compile_context>

<pallas_src>
import functools

import jax
import jax.numpy as jnp
from jax.experimental import pallas as pl
from jax.experimental.pallas import tpu as pltpu

EPS = 1e-5


def _fill_pad(pad_ref, src, H):
    """Write src (H, W, C) into pad_ref (H+2, W, C), reflect-padded along H.

    All stores are offset only along the (major, untiled) H axis, so they are
    fully aligned. W-edge reflection is handled at tap time (see _conv_pass).
    Assumes H >= 2.
    """
    pad_ref[1:H + 1, :, :] = src
    pad_ref[0:1, :, :] = src[1:2, :, :]            # top reflect: row 1
    pad_ref[H + 1:H + 2, :, :] = src[H - 2:H - 1, :, :]  # bottom reflect: row H-2


def _conv_pass(pad_ref, w_ref, h_ref, H, W, Cp, sr, mask_l, mask_r):
    """3x3 'valid' conv over the H-padded scratch, strip by strip.

    For each strip of `sr` output rows the f32 accumulator stays register
    resident across all 9 tap matmuls and is stored to h_ref once.  dx = 0/2
    taps are built with sublane rolls (XLU slot) + a 1-column reflect fix, so
    no misaligned loads/stores and no slice+reshape copies.  Per-channel
    (sum, sum-of-squares) of the conv output are carried for InstanceNorm.
    """
    srw = sr * W

    def strip_body(s, carry):
        acc_sum, acc_ssq = carry
        r0 = pl.multiple_of(s * sr, sr)
        acc = jnp.zeros((srw, Cp), jnp.float32)
        for dy in range(3):
            slab = pad_ref[pl.ds(r0 + dy, sr), :, :].reshape(srw, Cp)
            prev_col = pltpu.roll(slab, 1, 0)        # row k-1 (column j-1)
            next_col = pltpu.roll(slab, srw - 1, 0)  # row k+1 (column j+1)
            tap0 = jnp.where(mask_l, next_col, prev_col)  # dx=0, reflect at j==0
            tap2 = jnp.where(mask_r, prev_col, next_col)  # dx=2, reflect at j==W-1
            acc = acc + jnp.dot(tap0, w_ref[dy, 0],
                                preferred_element_type=jnp.float32)
            acc = acc + jnp.dot(slab, w_ref[dy, 1],
                                preferred_element_type=jnp.float32)
            acc = acc + jnp.dot(tap2, w_ref[dy, 2],
                                preferred_element_type=jnp.float32)
        row0 = pl.multiple_of(r0 * W, srw)
        h_ref[pl.ds(row0, srw), :] = acc
        return (acc_sum + jnp.sum(acc, axis=0, keepdims=True),
                acc_ssq + jnp.sum(acc * acc, axis=0, keepdims=True))

    zero = jnp.zeros((1, Cp), jnp.float32)
    return jax.lax.fori_loop(0, H // sr, strip_body, (zero, zero))


def residual_block_kernel(x_ref, w1_ref, w2_ref, o_ref, pad_ref, h_ref, *, sr):
    H, W, Cp = x_ref.shape
    inv_n = 1.0 / (H * W)

    # Column masks for the roll-based dx taps (computed once, reused by both convs).
    col = jax.lax.broadcasted_iota(jnp.int32, (sr * W, Cp), 0) % W
    mask_l = col == 0
    mask_r = col == (W - 1)

    # ---- ConvolutionalBlock #1: reflect pad -> conv3x3 -> InstanceNorm -> ReLU.
    # Conv bias omitted: it cancels exactly under InstanceNorm(affine=False).
    _fill_pad(pad_ref, x_ref[...], H)
    s1, ss1 = _conv_pass(pad_ref, w1_ref, h_ref, H, W, Cp, sr, mask_l, mask_r)
    mean1 = s1 * inv_n
    var1 = jnp.maximum(ss1 * inv_n - mean1 * mean1, 0.0)
    scale1 = jax.lax.rsqrt(var1 + EPS)

    # Normalize + ReLU fused with the second pad fill (no extra h copy).
    h1 = jnp.maximum((h_ref[...] - mean1) * scale1, 0.0)
    _fill_pad(pad_ref, h1.reshape(H, W, Cp).astype(pad_ref.dtype), H)

    # ---- ConvolutionalBlock #2: reflect pad -> conv3x3 -> InstanceNorm.
    s2, ss2 = _conv_pass(pad_ref, w2_ref, h_ref, H, W, Cp, sr, mask_l, mask_r)
    mean2 = s2 * inv_n
    var2 = jnp.maximum(ss2 * inv_n - mean2 * mean2, 0.0)
    scale2 = jax.lax.rsqrt(var2 + EPS)

    # ---- Residual add: x re-read from the resident input block, lane-dense store.
    h2 = ((h_ref[...] - mean2) * scale2).reshape(H, W, Cp)
    o_ref[...] = (x_ref[...].astype(jnp.float32) + h2).astype(o_ref.dtype)


def _pick_strip_rows(H, W, Cp, acc_budget_bytes=64 * 1024):
    """Largest divisor of H whose (rows*W, Cp) f32 accumulator fits the budget."""
    max_rows = max(1, acc_budget_bytes // (W * Cp * 4))
    sr = min(H, max_rows)
    while H % sr:
        sr -= 1
    return sr


def _vmem_limit_bytes():
    cap = 64 * 1024 * 1024  # conservative fallback (v7x physical)
    try:
        cap = int(pltpu.get_tpu_info().vmem_capacity_bytes)
    except Exception:
        pass
    # ~96 MiB on 128 MiB parts (v5e/v6e), ~40 MiB on v7x's 64 MiB.
    return max(32 * 1024 * 1024, min(cap * 3 // 4, cap - 24 * 1024 * 1024))


def residual_block(x_nchw, w1, b1, w2, b2):
    """ResidualBlock forward. x_nchw: (N, C, H, W); w*: (C, C, 3, 3); b*: (C,).

    Biases are accepted for API parity but NOT sent to the kernel: a conv bias
    immediately followed by InstanceNorm(affine=False) cancels exactly.
    """
    del b1, b2
    N, C, H, W = x_nchw.shape
    if H < 2 or W < 2:
        raise ValueError("reflect padding of 1 requires H >= 2 and W >= 2")

    # NHWC inside the kernel (channels on lanes); channels zero-padded to a
    # multiple of 128 so matmuls, VPU ops and the output store are lane-dense.
    # Zero-padded channels remain exactly zero through conv/IN/ReLU/residual.
    Cp = max(128, -(-C // 128) * 128)
    x = jnp.transpose(x_nchw, (0, 2, 3, 1))         # NCHW -> NHWC
    w1t = jnp.transpose(w1, (2, 3, 1, 0))           # OIHW -> (3, 3, Cin, Cout)
    w2t = jnp.transpose(w2, (2, 3, 1, 0))
    if Cp != C:
        pc = Cp - C
        x = jnp.pad(x, ((0, 0), (0, 0), (0, 0), (0, pc)))
        w1t = jnp.pad(w1t, ((0, 0), (0, 0), (0, pc), (0, pc)))
        w2t = jnp.pad(w2t, ((0, 0), (0, 0), (0, pc), (0, pc)))

    sr = _pick_strip_rows(H, W, Cp)

    out = pl.pallas_call(
        functools.partial(residual_block_kernel, sr=sr),
        out_shape=jax.ShapeDtypeStruct((N, H, W, Cp), x.dtype),
        grid=(N,),
        in_specs=[
            pl.BlockSpec((None, H, W, Cp), lambda n: (n, 0, 0, 0)),
            pl.BlockSpec((3, 3, Cp, Cp), lambda n: (0, 0, 0, 0)),
            pl.BlockSpec((3, 3, Cp, Cp), lambda n: (0, 0, 0, 0)),
        ],
        out_specs=pl.BlockSpec((None, H, W, Cp), lambda n: (n, 0, 0, 0)),
        scratch_shapes=[
            pltpu.VMEM((H + 2, W, Cp), x.dtype),     # H-only reflect-pad scratch
            pltpu.VMEM((H * W, Cp), jnp.float32),    # f32 conv output / IN buffer
        ],
        compiler_params=pltpu.CompilerParams(
            dimension_semantics=("parallel",),
            vmem_limit_bytes=_vmem_limit_bytes()),
    )(x, w1t, w2t)

    if Cp != C:
        out = out[..., :C]
    return jnp.transpose(out, (0, 3, 1, 2))          # NHWC -> NCHW


def _reference(x, w1, b1, w2, b2):
    """Pure-JAX reference of the same forward (NCHW), biases included."""
    def conv(x, w, b):
        xp = jnp.pad(x, ((0, 0), (0, 0), (1, 1), (1, 1)), mode="reflect")
        y = jax.lax.conv_general_dilated(
            xp, w, window_strides=(1, 1), padding="VALID",
            dimension_numbers=("NCHW", "OIHW", "NCHW"))
        return y + b[None, :, None, None]

    def inorm(x):
        m = jnp.mean(x, axis=(2, 3), keepdims=True)
        v = jnp.var(x, axis=(2, 3), keepdims=True)
        return (x - m) / jnp.sqrt(v + EPS)

    h = jax.nn.relu(inorm(conv(x, w1, b1)))
    h = inorm(conv(h, w2, b2))
    return x + h


if __name__ == "__main__":
    key = jax.random.PRNGKey(0)
    N, C, H, W = 2, 4, 16, 16
    k_x, k_w1, k_b1, k_w2, k_b2 = jax.random.split(key, 5)

    x = jax.random.normal(k_x, (N, C, H, W), jnp.float32)
    # Conv2d weight shape: (Cout, Cin, 3, 3)
    w1 = jax.random.normal(k_w1, (C, C, 3, 3), jnp.float32) * 0.1
    b1 = jax.random.normal(k_b1, (C,), jnp.float32) * 0.1
    w2 = jax.random.normal(k_w2, (C, C, 3, 3), jnp.float32) * 0.1
    b2 = jax.random.normal(k_b2, (C,), jnp.float32) * 0.1

    y = jax.block_until_ready(residual_block(x, w1, b1, w2, b2))
    y_ref = jax.block_until_ready(_reference(x, w1, b1, w2, b2))

    assert y.shape == (N, C, H, W)
    assert jnp.allclose(y, y_ref, atol=1e-4, rtol=1e-4), (
        float(jnp.max(jnp.abs(y - y_ref))))
    print("KERNEL_OK")
</pallas_src>

<mosaic_0001>
module attributes {stable_mosaic.version = 11 : i64} {
  func.func @residual_block_kernel(%arg0: i32, %arg1: memref<1x16x16x128xf32, #tpu.memory_space<vmem>>, %arg2: memref<3x3x128x128xf32, #tpu.memory_space<vmem>>, %arg3: memref<3x3x128x128xf32, #tpu.memory_space<vmem>>, %arg4: memref<1x16x16x128xf32, #tpu.memory_space<vmem>>, %arg5: memref<18x16x128xf32, #tpu.memory_space<vmem>>, %arg6: memref<256x128xf32, #tpu.memory_space<vmem>>) attributes {dimension_semantics = [#tpu.dimension_semantics<parallel>], iteration_bounds = array<i64: 2>, scalar_prefetch = 0 : i64, scratch_operands = 2 : i64, tpu.core_type = #tpu.core_type<tc>, window_params = [{transform_indices = @transform_0, window_bounds = array<i64: 1, 16, 16, 128>}, {pipeline_mode = #tpu.pipeline_mode<synchronous>, transform_indices = @transform_1, window_bounds = array<i64: 3, 3, 128, 128>}, {pipeline_mode = #tpu.pipeline_mode<synchronous>, transform_indices = @transform_2, window_bounds = array<i64: 3, 3, 128, 128>}, {transform_indices = @transform_3, window_bounds = array<i64: 1, 16, 16, 128>}]} {
    %0 = tpu.iota {dimensions = array<i32: 0>} : vector<128x128xi32>
    %c16_i32 = arith.constant 16 : i32
    %c0_i32 = arith.constant 0 : i32
    %1 = arith.cmpi eq, %c16_i32, %c0_i32 : i32
    %c1_i32 = arith.constant 1 : i32
    %2 = arith.select %1, %c1_i32, %c16_i32 : i32
    %3 = vector.broadcast %2 : i32 to vector<128x128xi32>
    %4 = arith.remsi %0, %3 : vector<128x128xi32>
    %c0_i32_0 = arith.constant 0 : i32
    %5 = vector.broadcast %c0_i32_0 : i32 to vector<128x128xi32>
    %6 = arith.cmpi ne, %4, %5 : vector<128x128xi32>
    %c0_i32_1 = arith.constant 0 : i32
    %7 = vector.broadcast %c0_i32_1 : i32 to vector<128x128xi32>
    %8 = arith.cmpi slt, %4, %7 : vector<128x128xi32>
    %c0_i32_2 = arith.constant 0 : i32
    %9 = arith.cmpi slt, %2, %c0_i32_2 : i32
    %10 = vector.broadcast %9 : i1 to vector<128x128xi1>
    %11 = vector.broadcast %10 : vector<128x128xi1> to vector<128x128xi1>
    %12 = arith.xori %8, %11 : vector<128x128xi1>
    %13 = arith.andi %12, %6 : vector<128x128xi1>
    %14 = vector.broadcast %2 : i32 to vector<128x128xi32>
    %15 = arith.addi %4, %14 : vector<128x128xi32>
    %16 = arith.select %13, %15, %4 : vector<128x128xi1>, vector<128x128xi32>
    %c0_i32_3 = arith.constant 0 : i32
    %17 = vector.broadcast %c0_i32_3 : i32 to vector<128x128xi32>
    %18 = arith.cmpi eq, %16, %17 : vector<128x128xi32>
    %c15_i32 = arith.constant 15 : i32
    %19 = vector.broadcast %c15_i32 : i32 to vector<128x128xi32>
    %20 = arith.cmpi eq, %16, %19 : vector<128x128xi32>
    %c0 = arith.constant 0 : index
    %c0_4 = arith.constant 0 : index
    %c0_5 = arith.constant 0 : index
    %c0_6 = arith.constant 0 : index
    %21 = vector.load %arg1[%c0, %c0_4, %c0_5, %c0_6] : memref<1x16x16x128xf32, #tpu.memory_space<vmem>>, vector<1x16x16x128xf32>
    %22 = vector.shape_cast %21 : vector<1x16x16x128xf32> to vector<16x16x128xf32>
    %c1 = arith.constant 1 : index
    %c0_7 = arith.constant 0 : index
    %c0_8 = arith.constant 0 : index
    %23 = vector.load %arg5[%c1, %c0_7, %c0_8] : memref<18x16x128xf32, #tpu.memory_space<vmem>>, vector<16x16x128xf32>
    tpu.vector_store %arg5[%c1, %c0_7, %c0_8], %22 {strides = array<i32>} : memref<18x16x128xf32, #tpu.memory_space<vmem>>, vector<16x16x128xf32>,
    %24 = vector.extract_strided_slice %22 {offsets = [1, 0, 0], sizes = [1, 16, 128], strides = [1, 1, 1]} : vector<16x16x128xf32> to vector<1x16x128xf32>
    %c0_9 = arith.constant 0 : index
    %c0_10 = arith.constant 0 : index
    %c0_11 = arith.constant 0 : index
    %25 = vector.load %arg5[%c0_9, %c0_10, %c0_11] : memref<18x16x128xf32, #tpu.memory_space<vmem>>, vector<1x16x128xf32>
    tpu.vector_store %arg5[%c0_9, %c0_10, %c0_11], %24 {strides = array<i32>} : memref<18x16x128xf32, #tpu.memory_space<vmem>>, vector<1x16x128xf32>,
    %26 = vector.extract_strided_slice %22 {offsets = [14, 0, 0], sizes = [1, 16, 128], strides = [1, 1, 1]} : vector<16x16x128xf32> to vector<1x16x128xf32>
    %c17 = arith.constant 17 : index
    %c0_12 = arith.constant 0 : index
    %c0_13 = arith.constant 0 : index
    %27 = vector.load %arg5[%c17, %c0_12, %c0_13] : memref<18x16x128xf32, #tpu.memory_space<vmem>>, vector<1x16x128xf32>
    tpu.vector_store %arg5[%c17, %c0_12, %c0_13], %26 {strides = array<i32>} : memref<18x16x128xf32, #tpu.memory_space<vmem>>, vector<1x16x128xf32>,
    %cst = arith.constant 0.000000e+00 : f32
    %28 = vector.broadcast %cst : f32 to vector<1x128xf32>
    %c0_i32_14 = arith.constant 0 : i32
    %c2_i32 = arith.constant 2 : i32
    %29 = arith.addi %c0_i32_14, %c2_i32 : i32
    %c1_i32_15 = arith.constant 1 : i32
    %30:2 = scf.for %arg7 = %c0_i32_14 to %29 step %c1_i32_15 iter_args(%arg8 = %28, %arg9 = %28) -> (vector<1x128xf32>, vector<1x128xf32>)  : i32 {
      %c8_i32 = arith.constant 8 : i32
      %81 = arith.muli %arg7, %c8_i32 : i32
      %82 = tpu.assume_multiple %81, 8 : i32
      %cst_52 = arith.constant 0.000000e+00 : f32
      %83 = vector.broadcast %cst_52 : f32 to vector<128x128xf32>
      %c0_i32_53 = arith.constant 0 : i32
      %84 = arith.addi %82, %c0_i32_53 : i32
      %85 = arith.index_cast %84 : i32 to index
      %c0_54 = arith.constant 0 : index
      %c0_55 = arith.constant 0 : index
      %86 = vector.load %arg5[%85, %c0_54, %c0_55] : memref<18x16x128xf32, #tpu.memory_space<vmem>>, vector<8x16x128xf32>
      %87 = vector.shape_cast %86 : vector<8x16x128xf32> to vector<128x128xf32>
      %c1_i32_56 = arith.constant 1 : i32
      %88 = tpu.dynamic_rotate %87 by %c1_i32_56 dim 0 : vector<128x128xf32>, i32 -> vector<128x128xf32>
      %c127_i32 = arith.constant 127 : i32
      %89 = tpu.dynamic_rotate %87 by %c127_i32 dim 0 : vector<128x128xf32>, i32 -> vector<128x128xf32>
      %90 = arith.select %18, %89, %88 : vector<128x128xi1>, vector<128x128xf32>
      %91 = arith.select %20, %88, %89 : vector<128x128xi1>, vector<128x128xf32>
      %c0_57 = arith.constant 0 : index
      %c0_58 = arith.constant 0 : index
      %c0_59 = arith.constant 0 : index
      %c0_60 = arith.constant 0 : index
      %92 = vector.load %arg2[%c0_57, %c0_58, %c0_59, %c0_60] : memref<3x3x128x128xf32, #tpu.memory_space<vmem>>, vector<1x1x128x128xf32>
      %93 = vector.shape_cast %92 : vector<1x1x128x128xf32> to vector<128x128xf32>
      %cst_61 = arith.constant dense<0.000000e+00> : vector<128x128xf32>
      %94 = tpu.matmul %90, %93, %cst_61 {dimension_numbers = #tpu.dot_dimension_numbers<[1], [0], [0], [1], [0, 0, 1, 1], [], []>} : vector<128x128xf32>, vector<128x128xf32>, vector<128x128xf32> -> vector<128x128xf32>
      %95 = arith.addf %83, %94 : vector<128x128xf32>
      %c0_62 = arith.constant 0 : index
      %c1_63 = arith.constant 1 : index
      %c0_64 = arith.constant 0 : index
      %c0_65 = arith.constant 0 : index
      %96 = vector.load %arg2[%c0_62, %c1_63, %c0_64, %c0_65] : memref<3x3x128x128xf32, #tpu.memory_space<vmem>>, vector<1x1x128x128xf32>
      %97 = vector.shape_cast %96 : vector<1x1x128x128xf32> to vector<128x128xf32>
      %cst_66 = arith.constant dense<0.000000e+00> : vector<128x128xf32>
      %98 = tpu.matmul %87, %97, %cst_66 {dimension_numbers = #tpu.dot_dimension_numbers<[1], [0], [0], [1], [0, 0, 1, 1], [], []>} : vector<128x128xf32>, vector<128x128xf32>, vector<128x128xf32> -> vector<128x128xf32>
      %99 = arith.addf %95, %98 : vector<128x128xf32>
      %c0_67 = arith.constant 0 : index
      %c2 = arith.constant 2 : index
      %c0_68 = arith.constant 0 : index
      %c0_69 = arith.constant 0 : index
      %100 = vector.load %arg2[%c0_67, %c2, %c0_68, %c0_69] : memref<3x3x128x128xf32, #tpu.memory_space<vmem>>, vector<1x1x128x128xf32>
      %101 = vector.shape_cast %100 : vector<1x1x128x128xf32> to vector<128x128xf32>
      %cst_70 = arith.constant dense<0.000000e+00> : vector<128x128xf32>
      %102 = tpu.matmul %91, %101, %cst_70 {dimension_numbers = #tpu.dot_dimension_numbers<[1], [0], [0], [1], [0, 0, 1, 1], [], []>} : vector<128x128xf32>, vector<128x128xf32>, vector<128x128xf32> -> vector<128x128xf32>
      %103 = arith.addf %99, %102 : vector<128x128xf32>
      %c1_i32_71 = arith.constant 1 : i32
      %104 = arith.addi %82, %c1_i32_71 : i32
      %105 = arith.index_cast %104 : i32 to index
      %c0_72 = arith.constant 0 : index
      %c0_73 = arith.constant 0 : index
      %106 = vector.load %arg5[%105, %c0_72, %c0_73] : memref<18x16x128xf32, #tpu.memory_space<vmem>>, vector<8x16x128xf32>
      %107 = vector.shape_cast %106 : vector<8x16x128xf32> to vector<128x128xf32>
      %c1_i32_74 = arith.constant 1 : i32
      %108 = tpu.dynamic_rotate %107 by %c1_i32_74 dim 0 : vector<128x128xf32>, i32 -> vector<128x128xf32>
      %c127_i32_75 = arith.constant 127 : i32
      %109 = tpu.dynamic_rotate %107 by %c127_i32_75 dim 0 : vector<128x128xf32>, i32 -> vector<128x128xf32>
      %110 = arith.select %18, %109, %108 : vector<128x128xi1>, vector<128x128xf32>
      %111 = arith.select %20, %108, %109 : vector<128x128xi1>, vector<128x128xf32>
      %c1_76 = arith.constant 1 : index
      %c0_77 = arith.constant 0 : index
      %c0_78 = arith.constant 0 : index
      %c0_79 = arith.constant 0 : index
      %112 = vector.load %arg2[%c1_76, %c0_77, %c0_78, %c0_79] : memref<3x3x128x128xf32, #tpu.memory_space<vmem>>, vector<1x1x128x128xf32>
      %113 = vector.shape_cast %112 : vector<1x1x128x128xf32> to vector<128x128xf32>
      %cst_80 = arith.constant dense<0.000000e+00> : vector<128x128xf32>
      %114 = tpu.matmul %110, %113, %cst_80 {dimension_numbers = #tpu.dot_dimension_numbers<[1], [0], [0], [1], [0, 0, 1, 1], [], []>} : vector<128x128xf32>, vector<128x128xf32>, vector<128x128xf32> -> vector<128x128xf32>
      %115 = arith.addf %103, %114 : vector<128x128xf32>
      %c1_81 = arith.constant 1 : index
      %c1_82 = arith.constant 1 : index
      %c0_83 = arith.constant 0 : index
      %c0_84 = arith.constant 0 : index
      %116 = vector.load %arg2[%c1_81, %c1_82, %c0_83, %c0_84] : memref<3x3x128x128xf32, #tpu.memory_space<vmem>>, vector<1x1x128x128xf32>
      %117 = vector.shape_cast %116 : vector<1x1x128x128xf32> to vector<128x128xf32>
      %cst_85 = arith.constant dense<0.000000e+00> : vector<128x128xf32>
      %118 = tpu.matmul %107, %117, %cst_85 {dimension_numbers = #tpu.dot_dimension_numbers<[1], [0], [0], [1], [0, 0, 1, 1], [], []>} : vector<128x128xf32>, vector<128x128xf32>, vector<128x128xf32> -> vector<128x128xf32>
      %119 = arith.addf %115, %118 : vector<128x128xf32>
      %c1_86 = arith.constant 1 : index
      %c2_87 = arith.constant 2 : index
      %c0_88 = arith.constant 0 : index
      %c0_89 = arith.constant 0 : index
      %120 = vector.load %arg2[%c1_86, %c2_87, %c0_88, %c0_89] : memref<3x3x128x128xf32, #tpu.memory_space<vmem>>, vector<1x1x128x128xf32>
      %121 = vector.shape_cast %120 : vector<1x1x128x128xf32> to vector<128x128xf32>
      %cst_90 = arith.constant dense<0.000000e+00> : vector<128x128xf32>
      %122 = tpu.matmul %111, %121, %cst_90 {dimension_numbers = #tpu.dot_dimension_numbers<[1], [0], [0], [1], [0, 0, 1, 1], [], []>} : vector<128x128xf32>, vector<128x128xf32>, vector<128x128xf32> -> vector<128x128xf32>
      %123 = arith.addf %119, %122 : vector<128x128xf32>
      %c2_i32_91 = arith.constant 2 : i32
      %124 = arith.addi %82, %c2_i32_91 : i32
      %125 = arith.index_cast %124 : i32 to index
      %c0_92 = arith.constant 0 : index
      %c0_93 = arith.constant 0 : index
      %126 = vector.load %arg5[%125, %c0_92, %c0_93] : memref<18x16x128xf32, #tpu.memory_space<vmem>>, vector<8x16x128xf32>
      %127 = vector.shape_cast %126 : vector<8x16x128xf32> to vector<128x128xf32>
      %c1_i32_94 = arith.constant 1 : i32
      %128 = tpu.dynamic_rotate %127 by %c1_i32_94 dim 0 : vector<128x128xf32>, i32 -> vector<128x128xf32>
      %c127_i32_95 = arith.constant 127 : i32
      %129 = tpu.dynamic_rotate %127 by %c127_i32_95 dim 0 : vector<128x128xf32>, i32 -> vector<128x128xf32>
      %130 = arith.select %18, %129, %128 : vector<128x128xi1>, vector<128x128xf32>
      %131 = arith.select %20, %128, %129 : vector<128x128xi1>, vector<128x128xf32>
      %c2_96 = arith.constant 2 : index
      %c0_97 = arith.constant 0 : index
      %c0_98 = arith.constant 0 : index
      %c0_99 = arith.constant 0 : index
      %132 = vector.load %arg2[%c2_96, %c0_97, %c0_98, %c0_99] : memref<3x3x128x128xf32, #tpu.memory_space<vmem>>, vector<1x1x128x128xf32>
      %133 = vector.shape_cast %132 : vector<1x1x128x128xf32> to vector<128x128xf32>
      %cst_100 = arith.constant dense<0.000000e+00> : vector<128x128xf32>
      %134 = tpu.matmul %130, %133, %cst_100 {dimension_numbers = #tpu.dot_dimension_numbers<[1], [0], [0], [1], [0, 0, 1, 1], [], []>} : vector<128x128xf32>, vector<128x128xf32>, vector<128x128xf32> -> vector<128x128xf32>
      %135 = arith.addf %123, %134 : vector<128x128xf32>
      %c2_101 = arith.constant 2 : index
      %c1_102 = arith.constant 1 : index
      %c0_103 = arith.constant 0 : index
      %c0_104 = arith.constant 0 : index
      %136 = vector.load %arg2[%c2_101, %c1_102, %c0_103, %c0_104] : memref<3x3x128x128xf32, #tpu.memory_space<vmem>>, vector<1x1x128x128xf32>
      %137 = vector.shape_cast %136 : vector<1x1x128x128xf32> to vector<128x128xf32>
      %cst_105 = arith.constant dense<0.000000e+00> : vector<128x128xf32>
      %138 = tpu.matmul %127, %137, %cst_105 {dimension_numbers = #tpu.dot_dimension_numbers<[1], [0], [0], [1], [0, 0, 1, 1], [], []>} : vector<128x128xf32>, vector<128x128xf32>, vector<128x128xf32> -> vector<128x128xf32>
      %139 = arith.addf %135, %138 : vector<128x128xf32>
      %c2_106 = arith.constant 2 : index
      %c2_107 = arith.constant 2 : index
      %c0_108 = arith.constant 0 : index
      %c0_109 = arith.constant 0 : index
      %140 = vector.load %arg2[%c2_106, %c2_107, %c0_108, %c0_109] : memref<3x3x128x128xf32, #tpu.memory_space<vmem>>, vector<1x1x128x128xf32>
      %141 = vector.shape_cast %140 : vector<1x1x128x128xf32> to vector<128x128xf32>
      %cst_110 = arith.constant dense<0.000000e+00> : vector<128x128xf32>
      %142 = tpu.matmul %131, %141, %cst_110 {dimension_numbers = #tpu.dot_dimension_numbers<[1], [0], [0], [1], [0, 0, 1, 1], [], []>} : vector<128x128xf32>, vector<128x128xf32>, vector<128x128xf32> -> vector<128x128xf32>
      %143 = arith.addf %139, %142 : vector<128x128xf32>
      %c16_i32_111 = arith.constant 16 : i32
      %144 = arith.muli %82, %c16_i32_111 : i32
      %145 = tpu.assume_multiple %144, 128 : i32
      %146 = arith.index_cast %145 : i32 to index
      %c0_112 = arith.constant 0 : index
      %147 = vector.load %arg6[%146, %c0_112] : memref<256x128xf32, #tpu.memory_space<vmem>>, vector<128x128xf32>
      tpu.vector_store %arg6[%146, %c0_112], %143 {strides = array<i32>} : memref<256x128xf32, #tpu.memory_space<vmem>>, vector<128x128xf32>,
      %cst_113 = arith.constant dense<0.000000e+00> : vector<128xf32>
      %148 = vector.multi_reduction <add>, %143, %cst_113 [0] : vector<128x128xf32> to vector<128xf32>
      %149 = vector.shape_cast %148 : vector<128xf32> to vector<1x128xf32>
      %150 = arith.addf %arg8, %149 : vector<1x128xf32>
      %151 = arith.mulf %143, %143 : vector<128x128xf32>
      %cst_114 = arith.constant dense<0.000000e+00> : vector<128xf32>
      %152 = vector.multi_reduction <add>, %151, %cst_114 [0] : vector<128x128xf32> to vector<128xf32>
      %153 = vector.shape_cast %152 : vector<128xf32> to vector<1x128xf32>
      %154 = arith.addf %arg9, %153 : vector<1x128xf32>
      scf.yield %150, %154 : vector<1x128xf32>, vector<1x128xf32>
    }
    %c2_i32_16 = arith.constant 2 : i32
    %cst_17 = arith.constant 3.906250e-03 : f32
    %31 = vector.broadcast %cst_17 : f32 to vector<1x128xf32>
    %32 = arith.mulf %30#0, %31 : vector<1x128xf32>
    %cst_18 = arith.constant 3.906250e-03 : f32
    %33 = vector.broadcast %cst_18 : f32 to vector<1x128xf32>
    %34 = arith.mulf %30#1, %33 : vector<1x128xf32>
    %35 = arith.mulf %32, %32 : vector<1x128xf32>
    %36 = arith.subf %34, %35 : vector<1x128xf32>
    %cst_19 = arith.constant 0.000000e+00 : f32
    %37 = vector.broadcast %cst_19 : f32 to vector<1x128xf32>
    %38 = arith.maximumf %36, %37 : vector<1x128xf32>
    %cst_20 = arith.constant 9.99999974E-6 : f32
    %39 = vector.broadcast %cst_20 : f32 to vector<1x128xf32>
    %40 = arith.addf %38, %39 : vector<1x128xf32>
    %41 = math.rsqrt %40 : vector<1x128xf32>
    %c0_21 = arith.constant 0 : index
    %c0_22 = arith.constant 0 : index
    %42 = vector.load %arg6[%c0_21, %c0_22] : memref<256x128xf32, #tpu.memory_space<vmem>>, vector<256x128xf32>
    %43 = vector.broadcast %32 : vector<1x128xf32> to vector<256x128xf32>
    %44 = arith.subf %42, %43 : vector<256x128xf32>
    %45 = vector.broadcast %41 : vector<1x128xf32> to vector<256x128xf32>
    %46 = arith.mulf %44, %45 : vector<256x128xf32>
    %cst_23 = arith.constant 0.000000e+00 : f32
    %47 = vector.broadcast %cst_23 : f32 to vector<256x128xf32>
    %48 = arith.maximumf %46, %47 : vector<256x128xf32>
    %49 = vector.shape_cast %48 : vector<256x128xf32> to vector<16x16x128xf32>
    %c1_24 = arith.constant 1 : index
    %c0_25 = arith.constant 0 : index
    %c0_26 = arith.constant 0 : index
    %50 = vector.load %arg5[%c1_24, %c0_25, %c0_26] : memref<18x16x128xf32, #tpu.memory_space<vmem>>, vector<16x16x128xf32>
    tpu.vector_store %arg5[%c1_24, %c0_25, %c0_26], %49 {strides = array<i32>} : memref<18x16x128xf32, #tpu.memory_space<vmem>>, vector<16x16x128xf32>,
    %51 = vector.extract_strided_slice %49 {offsets = [1, 0, 0], sizes = [1, 16, 128], strides = [1, 1, 1]} : vector<16x16x128xf32> to vector<1x16x128xf32>
    %c0_27 = arith.constant 0 : index
    %c0_28 = arith.constant 0 : index
    %c0_29 = arith.constant 0 : index
    %52 = vector.load %arg5[%c0_27, %c0_28, %c0_29] : memref<18x16x128xf32, #tpu.memory_space<vmem>>, vector<1x16x128xf32>
    tpu.vector_store %arg5[%c0_27, %c0_28, %c0_29], %51 {strides = array<i32>} : memref<18x16x128xf32, #tpu.memory_space<vmem>>, vector<1x16x128xf32>,
    %53 = vector.extract_strided_slice %49 {offsets = [14, 0, 0], sizes = [1, 16, 128], strides = [1, 1, 1]} : vector<16x16x128xf32> to vector<1x16x128xf32>
    %c17_30 = arith.constant 17 : index
    %c0_31 = arith.constant 0 : index
    %c0_32 = arith.constant 0 : index
    %54 = vector.load %arg5[%c17_30, %c0_31, %c0_32] : memref<18x16x128xf32, #tpu.memory_space<vmem>>, vector<1x16x128xf32>
    tpu.vector_store %arg5[%c17_30, %c0_31, %c0_32], %53 {strides = array<i32>} : memref<18x16x128xf32, #tpu.memory_space<vmem>>, vector<1x16x128xf32>,
    %cst_33 = arith.constant 0.000000e+00 : f32
    %55 = vector.broadcast %cst_33 : f32 to vector<1x128xf32>
    %c0_i32_34 = arith.constant 0 : i32
    %c2_i32_35 = arith.constant 2 : i32
    %56 = arith.addi %c0_i32_34, %c2_i32_35 : i32
    %c1_i32_36 = arith.constant 1 : i32
    %57:2 = scf.for %arg7 = %c0_i32_34 to %56 step %c1_i32_36 iter_args(%arg8 = %55, %arg9 = %55) -> (vector<1x128xf32>, vector<1x128xf32>)  : i32 {
      %c8_i32 = arith.constant 8 : i32
      %81 = arith.muli %arg7, %c8_i32 : i32
      %82 = tpu.assume_multiple %81, 8 : i32
      %cst_52 = arith.constant 0.000000e+00 : f32
      %83 = vector.broadcast %cst_52 : f32 to vector<128x128xf32>
      %c0_i32_53 = arith.constant 0 : i32
      %84 = arith.addi %82, %c0_i32_53 : i32
      %85 = arith.index_cast %84 : i32 to index
      %c0_54 = arith.constant 0 : index
      %c0_55 = arith.constant 0 : index
      %86 = vector.load %arg5[%85, %c0_54, %c0_55] : memref<18x16x128xf32, #tpu.memory_space<vmem>>, vector<8x16x128xf32>
      %87 = vector.shape_cast %86 : vector<8x16x128xf32> to vector<128x128xf32>
      %c1_i32_56 = arith.constant 1 : i32
      %88 = tpu.dynamic_rotate %87 by %c1_i32_56 dim 0 : vector<128x128xf32>, i32 -> vector<128x128xf32>
      %c127_i32 = arith.constant 127 : i32
      %89 = tpu.dynamic_rotate %87 by %c127_i32 dim 0 : vector<128x128xf32>, i32 -> vector<128x128xf32>
      %90 = arith.select %18, %89, %88 : vector<128x128xi1>, vector<128x128xf32>
      %91 = arith.select %20, %88, %89 : vector<128x128xi1>, vector<128x128xf32>
      %c0_57 = arith.constant 0 : index
      %c0_58 = arith.constant 0 : index
      %c0_59 = arith.constant 0 : index
      %c0_60 = arith.constant 0 : index
      %92 = vector.load %arg3[%c0_57, %c0_58, %c0_59, %c0_60] : memref<3x3x128x128xf32, #tpu.memory_space<vmem>>, vector<1x1x128x128xf32>
      %93 = vector.shape_cast %92 : vector<1x1x128x128xf32> to vector<128x128xf32>
      %cst_61 = arith.constant dense<0.000000e+00> : vector<128x128xf32>
      %94 = tpu.matmul %90, %93, %cst_61 {dimension_numbers = #tpu.dot_dimension_numbers<[1], [0], [0], [1], [0, 0, 1, 1], [], []>} : vector<128x128xf32>, vector<128x128xf32>, vector<128x128xf32> -> vector<128x128xf32>
      %95 = arith.addf %83, %94 : vector<128x128xf32>
      %c0_62 = arith.constant 0 : index
      %c1_63 = arith.constant 1 : index
      %c0_64 = arith.constant 0 : index
      %c0_65 = arith.constant 0 : index
      %96 = vector.load %arg3[%c0_62, %c1_63, %c0_64, %c0_65] : memref<3x3x128x128xf32, #tpu.memory_space<vmem>>, vector<1x1x128x128xf32>
      %97 = vector.shape_cast %96 : vector<1x1x128x128xf32> to vector<128x128xf32>
      %cst_66 = arith.constant dense<0.000000e+00> : vector<128x128xf32>
      %98 = tpu.matmul %87, %97, %cst_66 {dimension_numbers = #tpu.dot_dimension_numbers<[1], [0], [0], [1], [0, 0, 1, 1], [], []>} : vector<128x128xf32>, vector<128x128xf32>, vector<128x128xf32> -> vector<128x128xf32>
      %99 = arith.addf %95, %98 : vector<128x128xf32>
      %c0_67 = arith.constant 0 : index
      %c2 = arith.constant 2 : index
      %c0_68 = arith.constant 0 : index
      %c0_69 = arith.constant 0 : index
      %100 = vector.load %arg3[%c0_67, %c2, %c0_68, %c0_69] : memref<3x3x128x128xf32, #tpu.memory_space<vmem>>, vector<1x1x128x128xf32>
      %101 = vector.shape_cast %100 : vector<1x1x128x128xf32> to vector<128x128xf32>
      %cst_70 = arith.constant dense<0.000000e+00> : vector<128x128xf32>
      %102 = tpu.matmul %91, %101, %cst_70 {dimension_numbers = #tpu.dot_dimension_numbers<[1], [0], [0], [1], [0, 0, 1, 1], [], []>} : vector<128x128xf32>, vector<128x128xf32>, vector<128x128xf32> -> vector<128x128xf32>
      %103 = arith.addf %99, %102 : vector<128x128xf32>
      %c1_i32_71 = arith.constant 1 : i32
      %104 = arith.addi %82, %c1_i32_71 : i32
      %105 = arith.index_cast %104 : i32 to index
      %c0_72 = arith.constant 0 : index
      %c0_73 = arith.constant 0 : index
      %106 = vector.load %arg5[%105, %c0_72, %c0_73] : memref<18x16x128xf32, #tpu.memory_space<vmem>>, vector<8x16x128xf32>
      %107 = vector.shape_cast %106 : vector<8x16x128xf32> to vector<128x128xf32>
      %c1_i32_74 = arith.constant 1 : i32
      %108 = tpu.dynamic_rotate %107 by %c1_i32_74 dim 0 : vector<128x128xf32>, i32 -> vector<128x128xf32>
      %c127_i32_75 = arith.constant 127 : i32
      %109 = tpu.dynamic_rotate %107 by %c127_i32_75 dim 0 : vector<128x128xf32>, i32 -> vector<128x128xf32>
      %110 = arith.select %18, %109, %108 : vector<128x128xi1>, vector<128x128xf32>
      %111 = arith.select %20, %108, %109 : vector<128x128xi1>, vector<128x128xf32>
      %c1_76 = arith.constant 1 : index
      %c0_77 = arith.constant 0 : index
      %c0_78 = arith.constant 0 : index
      %c0_79 = arith.constant 0 : index
      %112 = vector.load %arg3[%c1_76, %c0_77, %c0_78, %c0_79] : memref<3x3x128x128xf32, #tpu.memory_space<vmem>>, vector<1x1x128x128xf32>
      %113 = vector.shape_cast %112 : vector<1x1x128x128xf32> to vector<128x128xf32>
      %cst_80 = arith.constant dense<0.000000e+00> : vector<128x128xf32>
      %114 = tpu.matmul %110, %113, %cst_80 {dimension_numbers = #tpu.dot_dimension_numbers<[1], [0], [0], [1], [0, 0, 1, 1], [], []>} : vector<128x128xf32>, vector<128x128xf32>, vector<128x128xf32> -> vector<128x128xf32>
      %115 = arith.addf %103, %114 : vector<128x128xf32>
      %c1_81 = arith.constant 1 : index
      %c1_82 = arith.constant 1 : index
      %c0_83 = arith.constant 0 : index
      %c0_84 = arith.constant 0 : index
      %116 = vector.load %arg3[%c1_81, %c1_82, %c0_83, %c0_84] : memref<3x3x128x128xf32, #tpu.memory_space<vmem>>, vector<1x1x128x128xf32>
      %117 = vector.shape_cast %116 : vector<1x1x128x128xf32> to vector<128x128xf32>
      %cst_85 = arith.constant dense<0.000000e+00> : vector<128x128xf32>
      %118 = tpu.matmul %107, %117, %cst_85 {dimension_numbers = #tpu.dot_dimension_numbers<[1], [0], [0], [1], [0, 0, 1, 1], [], []>} : vector<128x128xf32>, vector<128x128xf32>, vector<128x128xf32> -> vector<128x128xf32>
      %119 = arith.addf %115, %118 : vector<128x128xf32>
      %c1_86 = arith.constant 1 : index
      %c2_87 = arith.constant 2 : index
      %c0_88 = arith.constant 0 : index
      %c0_89 = arith.constant 0 : index
      %120 = vector.load %arg3[%c1_86, %c2_87, %c0_88, %c0_89] : memref<3x3x128x128xf32, #tpu.memory_space<vmem>>, vector<1x1x128x128xf32>
      %121 = vector.shape_cast %120 : vector<1x1x128x128xf32> to vector<128x128xf32>
      %cst_90 = arith.constant dense<0.000000e+00> : vector<128x128xf32>
      %122 = tpu.matmul %111, %121, %cst_90 {dimension_numbers = #tpu.dot_dimension_numbers<[1], [0], [0], [1], [0, 0, 1, 1], [], []>} : vector<128x128xf32>, vector<128x128xf32>, vector<128x128xf32> -> vector<128x128xf32>
      %123 = arith.addf %119, %122 : vector<128x128xf32>
      %c2_i32_91 = arith.constant 2 : i32
      %124 = arith.addi %82, %c2_i32_91 : i32
      %125 = arith.index_cast %124 : i32 to index
      %c0_92 = arith.constant 0 : index
      %c0_93 = arith.constant 0 : index
      %126 = vector.load %arg5[%125, %c0_92, %c0_93] : memref<18x16x128xf32, #tpu.memory_space<vmem>>, vector<8x16x128xf32>
      %127 = vector.shape_cast %126 : vector<8x16x128xf32> to vector<128x128xf32>
      %c1_i32_94 = arith.constant 1 : i32
      %128 = tpu.dynamic_rotate %127 by %c1_i32_94 dim 0 : vector<128x128xf32>, i32 -> vector<128x128xf32>
      %c127_i32_95 = arith.constant 127 : i32
      %129 = tpu.dynamic_rotate %127 by %c127_i32_95 dim 0 : vector<128x128xf32>, i32 -> vector<128x128xf32>
      %130 = arith.select %18, %129, %128 : vector<128x128xi1>, vector<128x128xf32>
      %131 = arith.select %20, %128, %129 : vector<128x128xi1>, vector<128x128xf32>
      %c2_96 = arith.constant 2 : index
      %c0_97 = arith.constant 0 : index
      %c0_98 = arith.constant 0 : index
      %c0_99 = arith.constant 0 : index
      %132 = vector.load %arg3[%c2_96, %c0_97, %c0_98, %c0_99] : memref<3x3x128x128xf32, #tpu.memory_space<vmem>>, vector<1x1x128x128xf32>
      %133 = vector.shape_cast %132 : vector<1x1x128x128xf32> to vector<128x128xf32>
      %cst_100 = arith.constant dense<0.000000e+00> : vector<128x128xf32>
      %134 = tpu.matmul %130, %133, %cst_100 {dimension_numbers = #tpu.dot_dimension_numbers<[1], [0], [0], [1], [0, 0, 1, 1], [], []>} : vector<128x128xf32>, vector<128x128xf32>, vector<128x128xf32> -> vector<128x128xf32>
      %135 = arith.addf %123, %134 : vector<128x128xf32>
      %c2_101 = arith.constant 2 : index
      %c1_102 = arith.constant 1 : index
      %c0_103 = arith.constant 0 : index
      %c0_104 = arith.constant 0 : index
      %136 = vector.load %arg3[%c2_101, %c1_102, %c0_103, %c0_104] : memref<3x3x128x128xf32, #tpu.memory_space<vmem>>, vector<1x1x128x128xf32>
      %137 = vector.shape_cast %136 : vector<1x1x128x128xf32> to vector<128x128xf32>
      %cst_105 = arith.constant dense<0.000000e+00> : vector<128x128xf32>
      %138 = tpu.matmul %127, %137, %cst_105 {dimension_numbers = #tpu.dot_dimension_numbers<[1], [0], [0], [1], [0, 0, 1, 1], [], []>} : vector<128x128xf32>, vector<128x128xf32>, vector<128x128xf32> -> vector<128x128xf32>
      %139 = arith.addf %135, %138 : vector<128x128xf32>
      %c2_106 = arith.constant 2 : index
      %c2_107 = arith.constant 2 : index
      %c0_108 = arith.constant 0 : index
      %c0_109 = arith.constant 0 : index
      %140 = vector.load %arg3[%c2_106, %c2_107, %c0_108, %c0_109] : memref<3x3x128x128xf32, #tpu.memory_space<vmem>>, vector<1x1x128x128xf32>
      %141 = vector.shape_cast %140 : vector<1x1x128x128xf32> to vector<128x128xf32>
      %cst_110 = arith.constant dense<0.000000e+00> : vector<128x128xf32>
      %142 = tpu.matmul %131, %141, %cst_110 {dimension_numbers = #tpu.dot_dimension_numbers<[1], [0], [0], [1], [0, 0, 1, 1], [], []>} : vector<128x128xf32>, vector<128x128xf32>, vector<128x128xf32> -> vector<128x128xf32>
      %143 = arith.addf %139, %142 : vector<128x128xf32>
      %c16_i32_111 = arith.constant 16 : i32
      %144 = arith.muli %82, %c16_i32_111 : i32
      %145 = tpu.assume_multiple %144, 128 : i32
      %146 = arith.index_cast %145 : i32 to index
      %c0_112 = arith.constant 0 : index
      %147 = vector.load %arg6[%146, %c0_112] : memref<256x128xf32, #tpu.memory_space<vmem>>, vector<128x128xf32>
      tpu.vector_store %arg6[%146, %c0_112], %143 {strides = array<i32>} : memref<256x128xf32, #tpu.memory_space<vmem>>, vector<128x128xf32>,
      %cst_113 = arith.constant dense<0.000000e+00> : vector<128xf32>
      %148 = vector.multi_reduction <add>, %143, %cst_113 [0] : vector<128x128xf32> to vector<128xf32>
      %149 = vector.shape_cast %148 : vector<128xf32> to vector<1x128xf32>
      %150 = arith.addf %arg8, %149 : vector<1x128xf32>
      %151 = arith.mulf %143, %143 : vector<128x128xf32>
      %cst_114 = arith.constant dense<0.000000e+00> : vector<128xf32>
      %152 = vector.multi_reduction <add>, %151, %cst_114 [0] : vector<128x128xf32> to vector<128xf32>
      %153 = vector.shape_cast %152 : vector<128xf32> to vector<1x128xf32>
      %154 = arith.addf %arg9, %153 : vector<1x128xf32>
      scf.yield %150, %154 : vector<1x128xf32>, vector<1x128xf32>
    }
    %c2_i32_37 = arith.constant 2 : i32
    %cst_38 = arith.constant 3.906250e-03 : f32
    %58 = vector.broadcast %cst_38 : f32 to vector<1x128xf32>
    %59 = arith.mulf %57#0, %58 : vector<1x128xf32>
    %cst_39 = arith.constant 3.906250e-03 : f32
    %60 = vector.broadcast %cst_39 : f32 to vector<1x128xf32>
    %61 = arith.mulf %57#1, %60 : vector<1x128xf32>
    %62 = arith.mulf %59, %59 : vector<1x128xf32>
    %63 = arith.subf %61, %62 : vector<1x128xf32>
    %cst_40 = arith.constant 0.000000e+00 : f32
    %64 = vector.broadcast %cst_40 : f32 to vector<1x128xf32>
    %65 = arith.maximumf %63, %64 : vector<1x128xf32>
    %cst_41 = arith.constant 9.99999974E-6 : f32
    %66 = vector.broadcast %cst_41 : f32 to vector<1x128xf32>
    %67 = arith.addf %65, %66 : vector<1x128xf32>
    %68 = math.rsqrt %67 : vector<1x128xf32>
    %c0_42 = arith.constant 0 : index
    %c0_43 = arith.constant 0 : index
    %69 = vector.load %arg6[%c0_42, %c0_43] : memref<256x128xf32, #tpu.memory_space<vmem>>, vector<256x128xf32>
    %70 = vector.broadcast %59 : vector<1x128xf32> to vector<256x128xf32>
    %71 = arith.subf %69, %70 : vector<256x128xf32>
    %72 = vector.broadcast %68 : vector<1x128xf32> to vector<256x128xf32>
    %73 = arith.mulf %71, %72 : vector<256x128xf32>
    %74 = vector.shape_cast %73 : vector<256x128xf32> to vector<16x16x128xf32>
    %c0_44 = arith.constant 0 : index
    %c0_45 = arith.constant 0 : index
    %c0_46 = arith.constant 0 : index
    %c0_47 = arith.constant 0 : index
    %75 = vector.load %arg1[%c0_44, %c0_45, %c0_46, %c0_47] : memref<1x16x16x128xf32, #tpu.memory_space<vmem>>, vector<1x16x16x128xf32>
    %76 = vector.shape_cast %75 : vector<1x16x16x128xf32> to vector<16x16x128xf32>
    %77 = arith.addf %76, %74 : vector<16x16x128xf32>
    %c0_48 = arith.constant 0 : index
    %c0_49 = arith.constant 0 : index
    %c0_50 = arith.constant 0 : index
    %c0_51 = arith.constant 0 : index
    %78 = vector.load %arg4[%c0_48, %c0_49, %c0_50, %c0_51] : memref<1x16x16x128xf32, #tpu.memory_space<vmem>>, vector<1x16x16x128xf32>
    %79 = vector.shape_cast %78 : vector<1x16x16x128xf32> to vector<16x16x128xf32>
    %80 = vector.shape_cast %77 : vector<16x16x128xf32> to vector<1x16x16x128xf32>
    tpu.vector_store %arg4[%c0_48, %c0_49, %c0_50, %c0_51], %80 {strides = array<i32>} : memref<1x16x16x128xf32, #tpu.memory_space<vmem>>, vector<1x16x16x128xf32>,
    return
  }
  func.func @transform_0(%arg0: i32) -> (i32, i32, i32, i32) {
    %c0_i32 = arith.constant 0 : i32
    %c0_i32_0 = arith.constant 0 : i32
    %c0_i32_1 = arith.constant 0 : i32
    %c0_i32_2 = arith.constant 0 : i32
    return %arg0, %c0_i32, %c0_i32_0, %c0_i32_1 : i32, i32, i32, i32
  }
  func.func @transform_1(%arg0: i32) -> (i32, i32, i32, i32) {
    %c0_i32 = arith.constant 0 : i32
    %c0_i32_0 = arith.constant 0 : i32
    %c0_i32_1 = arith.constant 0 : i32
    %c0_i32_2 = arith.constant 0 : i32
    %c0_i32_3 = arith.constant 0 : i32
    return %c0_i32, %c0_i32_0, %c0_i32_1, %c0_i32_2 : i32, i32, i32, i32
  }
  func.func @transform_2(%arg0: i32) -> (i32, i32, i32, i32) {
    %c0_i32 = arith.constant 0 : i32
    %c0_i32_0 = arith.constant 0 : i32
    %c0_i32_1 = arith.constant 0 : i32
    %c0_i32_2 = arith.constant 0 : i32
    %c0_i32_3 = arith.constant 0 : i32
    return %c0_i32, %c0_i32_0, %c0_i32_1, %c0_i32_2 : i32, i32, i32, i32
  }
  func.func @transform_3(%arg0: i32) -> (i32, i32, i32, i32) {
    %c0_i32 = arith.constant 0 : i32
    %c0_i32_0 = arith.constant 0 : i32
    %c0_i32_1 = arith.constant 0 : i32
    %c0_i32_2 = arith.constant 0 : i32
    return %arg0, %c0_i32, %c0_i32_0, %c0_i32_1 : i32, i32, i32, i32
  }
}

</mosaic_0001>

<bundles_post_ra>
// kernel: tpu_custom_call.1
= control target key start
LH: loop header
LB: loop body
LE: loop exit
PB: predicated region body
PF: predicated region fallthrough
CT: control target
= control target key end

     0   :  { %8 = vsyncpa [#allocation5], 0  ;;  %s10308_s0 = inlined_call_operand.hbm [shape: f32[2,16,16,128], index: 0, kind: input, shape index: {}]   ;;  %s10309_s1 = inlined_call_operand.hbm [shape: f32[3,3,128,128], index: 1, kind: input, shape index: {}]   ;;  %s10310_s2 = inlined_call_operand.hbm [shape: f32[3,3,128,128], index: 2, kind: input, shape index: {}]   ;;  %s10311_s3 = inlined_call_operand.hbm [shape: f32[2,16,16,128], index: 3, kind: output, shape index: {}]  }
   0x1   :  { %10 = vsyncpa [#allocation5 + $0x1], 0 }
   0x2   :  { %11 = vsyncpa [#allocation8], 0 }
   0x3   :  { %12 = vsyncpa [#allocation6], 0 }
   0x4   :  { %14 = vsyncpa [#allocation6 + $0x1], 0  ;;  %s7960_s12 = smov 0   ;;  %s7962_s13 = smov 0  }
   0x5   :  { %s7964_s14 = smov 0   ;;  %s7966_s15 = smov 0  }
   0x6 LB: > { %s7981_s16 = sadd.s32 4294967295, %s7906_s15   ;;  %s5053_s17 = sadd.s32 4294967294, %s7906_s15   ;;  %s7906_s15 = sphi %s7966_s15, %s10762_s15   ;;  %s7902_s14 = sphi %s7964_s14, %s10761_s14   ;;  %s7898_s13 = sphi %s7962_s13, %s10760_s13   ;;  %s7894_s12 = sphi %s7960_s12, %s10759_s12  }
   0x7   : > { %p40_p0 = scmp.ne.s32.totalorder %s7898_s13, %s7894_s12  ;;  %p10312_p1 = scmp.eq.s32.totalorder %s7981_s16, 0 }
   0x8   : > { %p112_p3 = scmp.eq.s32.totalorder %s5053_s17, 1  ;;  %p5054_p5 = scmp.ge.s32.totalorder %s7906_s15, 1 }
   0x9   : > { %p7990_p4 = por %p10312_p1, %p40_p0  ;;  %p119_p7 = scmp.lt.s32.totalorder %s7906_s15, 3 }
   0xa   : > { %p7995_p6 = por %p112_p3, %p40_p0  ;;  %s7932_s21 = smov [#allocation7]  }
   0xb   : > { %s10423_s18 = scalar_select %p7990_p4, 1, 0 }
   0xc   : > { %s10424_s19 = scalar_select %p7995_p6, 1, 0 }
   0xd   : > { %p8000_p8 = pnand %p5054_p5, %p119_p7  ;;  %s131_s22 = sshll.u32 %s7932_s21, 4  ;;  %s8004_s22 = int_to_ptr.vmem [resolvable:$true] %s131_s22 }
   0xe   : > { %s7933_s24 = smov [#allocation9]   ;;  %s7726_s28 = scalar_lea.hbm %s10309_s1, 18432 }
   0xf   : > { %p7615_p9 = pneg %p8000_p8  ;;  %s144_s25 = sshll.u32 %s7933_s24, 4  ;;  %s8015_s25 = int_to_ptr.vmem [resolvable:$true] %s144_s25 }
  0x10   : > { %p7727_p12 = scmp.ne.s32.totalorder %s10309_s1, %s7726_s28  ;;  %p7733_p5 = scmp.lt.u32.totalorder %s7726_s28, %s10309_s1 }
  0x11   : > { %p8011_p11 = pnand %p7615_p9, %p10312_p1 }
  0x13   : > { %p7728_p13 = pneg %p8011_p11 }
  0x15   : > { %p7729_p0 = pnand %p7728_p13, %p7727_p12 }
  0x17   : > { %p7730_p3 = pneg %p7729_p0 }
  0x19   : > { %p7735_p7 = pnand %p7733_p5, %p7730_p3 }
  0x1b   : > { %7738 = shalt.err (!%p7735_p7)
}
  0x1c   : > { %s7739_s6 = scalar_lea.vmem %s8004_s22, 18432  ;;  %p7747_p2 = scmp.lt.s32.totalorder %s8004_s22, %s8004_s22 }
  0x1d   : > { %p7740_p9 = scmp.ne.s32.totalorder %s8004_s22, %s7739_s6  ;;  %p7748_p12 = scmp.lt.s32.totalorder %s7739_s6, %s7739_s6 }
  0x1f   : > { %p7742_p10 = pnand %p7740_p9, %p7728_p13  ;;  %p7749_p0 = por %p7748_p12, %p7747_p2 }
  0x21   : > { %p7743_p1 = pneg %p7742_p10 }
  0x23   : > { %p7750_p6 = pnand %p7749_p0, %p7743_p1 }
  0x25   : > { %7753 = shalt.err (!%p7750_p6)
}
  0x26   : > { %s7934_s7 = smov 128   ;;  %s7935_s8 = smov 8  }
  0x27   : > { %7618 = dma.hbm_to_vmem [thread:$0]  (!%p8011_p11), %s10309_s1, 18432, %s8004_s22, [#allocation8], %s7934_s7, %s7934_s7, %s7935_s8  }
  0x28   : > { %s7754_s21 = scalar_lea.hbm %s10310_s2, 18432 }
  0x29   : > { %p7755_p1 = scmp.ne.s32.totalorder %s10310_s2, %s7754_s21  ;;  %p7761_p10 = scmp.lt.u32.totalorder %s7754_s21, %s10310_s2 }
  0x2b   : > { %p7757_p2 = pnand %p7755_p1, %p7728_p13 }
  0x2d   : > { %p7758_p6 = pneg %p7757_p2 }
  0x2f   : > { %p7763_p3 = pnand %p7761_p10, %p7758_p6 }
  0x31   : > { %7766 = shalt.err (!%p7763_p3)
}
  0x32   : > { %s7767_s22 = scalar_lea.vmem %s8015_s25, 18432  ;;  %p7775_p12 = scmp.lt.s32.totalorder %s8015_s25, %s8015_s25 }
  0x33   : > { %p7768_p5 = scmp.ne.s32.totalorder %s8015_s25, %s7767_s22  ;;  %p7776_p0 = scmp.lt.s32.totalorder %s7767_s22, %s7767_s22 }
  0x35   : > { %p7770_p7 = pnand %p7768_p5, %p7728_p13  ;;  %p7777_p1 = por %p7776_p0, %p7775_p12 }
  0x37   : > { %p7771_p9 = pneg %p7770_p7 }
  0x39   : > { %p7778_p2 = pnand %p7777_p1, %p7771_p9 }
  0x3b   : > { %7781 = shalt.err (!%p7778_p2)
}
  0x3c   : > { %7621 = dma.hbm_to_vmem [thread:$0]  (!%p8011_p11), %s10310_s2, 18432, %s8015_s25, [#allocation8], %s7934_s7, %s7934_s7, %s7935_s8  }
  0x3d   : > { %s8076_s23 = sadd.s32 1, %s7906_s15   ;;  %s27_s4 = sadd.s32 1, %s7902_s14 }
  0x3e   : > { %s24_s5 = ssub.s32 %s7906_s15, %s8076_s23  ;;  %p34_p13 = scmp.ne.s32.totalorder %s7902_s14, %s7898_s13 }
  0x3f   : > { %p25_p6 = scmp.eq.s32.totalorder %s24_s5, 0  ;;  %p35_p10 = scmp.eq.s32.totalorder %s7906_s15, 0 }
  0x40   : > { %p10427_p3 = scmp.eq.s32.totalorder %s7981_s16, 1  ;;  %p7632_p7 = scmp.lt.s32.totalorder %s7906_s15, 2 }
  0x41   : > { %s8092_s9 = scalar_select %p25_p6, %s7902_s14, %s27_s4  }
  0x42   : > { %p8086_p5 = por %p10427_p3, %p34_p13  ;;  %p36_p9 = por %p35_p10, %p34_p13 }
  0x43   : > { %s158_s10 = sand.u32 1, %s7902_s14   ;;  %s5147_s25 = sshll.u32 %s7906_s15, 12 }
  0x44   : > { %s10428_s6 = scalar_select %p8086_p5, 1, 0 }
  0x45   : > { %s5058_s11 = sshll.u32 %s158_s10, 8  ;;  %s8099_s24 = scalar_lea.hbm %s10308_s0, %s5147_s25 }
  0x46   : > { %s162_s26 = scalar_lea.vmem [#allocation4], %s5058_s11  ;;  %p8103_p11 = pnand %p7632_p7, %p36_p9 }
  0x47   : > { %s169_s27 = sshll.u32 %s162_s26, 4  ;;  %s8107_s22 = scalar_lea.sflag [#allocation5], %s158_s10  ;;  %s8101_s27 = int_to_ptr.vmem [resolvable:$true] %s169_s27 }
  0x48   : > { %s7782_s29 = scalar_lea.hbm %s8099_s24, 4096  ;;  %p7784_p0 = pneg %p8103_p11 }
  0x49   : > { %p7783_p12 = scmp.ne.s32.totalorder %s8099_s24, %s7782_s29  ;;  %s7787_s5 = scalar_lea.hbm %s10308_s0, 8192 }
  0x4a   : > { %p7788_p13 = scmp.lt.u32.totalorder %s8099_s24, %s10308_s0  ;;  %p7789_p6 = scmp.lt.u32.totalorder %s7787_s5, %s7782_s29 }
  0x4b   : > { %p7785_p1 = pnand %p7784_p0, %p7783_p12  ;;  %p7791_p3 = scmp.lt.u32.totalorder %s7782_s29, %s8099_s24 }
  0x4c   : > { %p7790_p10 = por %p7789_p6, %p7788_p13 }
  0x4d   : > { %p7786_p2 = pneg %p7785_p1 }
  0x4e   : > { %p7792_p7 = por %p7791_p3, %p7790_p10 }
  0x50   : > { %p7793_p9 = pnand %p7792_p7, %p7786_p2 }
  0x52   : > { %7796 = shalt.err (!%p7793_p9)
}
  0x53   : > { %s7797_s10 = scalar_lea.vmem %s8101_s27, 4096  ;;  %s7936_s17 = smov [#allocation4]  }
  0x54   : > { %p7798_p12 = scmp.ne.s32.totalorder %s8101_s27, %s7797_s10  ;;  %s7802_s21 = sshll.u32 %s7936_s17, 4  ;;  %s7803_s21 = int_to_ptr.vmem [resolvable:$false] %s7802_s21 }
  0x55   : > { %s7804_s26 = scalar_lea.vmem %s7803_s21, 8192  ;;  %p7805_p4 = scmp.lt.s32.totalorder %s8101_s27, %s7803_s21 }
  0x56   : > { %p7800_p1 = pnand %p7798_p12, %p7784_p0  ;;  %p7806_p13 = scmp.lt.s32.totalorder %s7804_s26, %s7797_s10 }
  0x58   : > { %p7801_p5 = pneg %p7800_p1  ;;  %p7807_p6 = por %p7806_p13, %p7805_p4 }
  0x5a   : > { %p7808_p10 = pnand %p7807_p6, %p7801_p5 }
  0x5c   : > { %7811 = shalt.err (!%p7808_p10)
}
  0x5d   : > { %7625 = dma.hbm_to_vmem [thread:$0]  (!%p8103_p11), %s8099_s24, 4096, %s8101_s27, %s8107_s22, %s7934_s7, %s7934_s7, %s7935_s8  }
  0x5e   : > { %181 = sbr.rel (%p8000_p8) target bundleno = 1093 (0x445), region = 32 }
  0x65   : > { %s8141_s29 = sand.u32 1, %s7898_s13   ;;  %p10430_p4 = scmp.ne.s32.totalorder %s10423_s18, 0 }
  0x66   : > { %s5062_s30 = sshll.u32 %s8141_s29, 8  ;;  %s184_s4 = scalar_lea.sflag [#allocation5], %s8141_s29 }
  0x67   : > { %s8147_s28 = scalar_lea.vmem [#allocation4], %s5062_s30 }
  0x68   : > { %7881 = dma.done.wait (%p10430_p4), %s184_s4, 4096  }
  0x69   : > { %7883 = vsyncadd (%p10430_p4), %s184_s4, 4294963200  ;;  %p10431_p5 = scmp.eq.s32.totalorder %s7981_s16, 0 }
  0x6b   : > { %7885 = dma.done.wait (%p10431_p5), [#allocation8], 36864   ;;  %p10432_p8 = pmov %p10431_p5 }
  0x6c   : > { %v218_v0 = vlaneseq  ;;  %v459_v18 = vld [vmem:[%s8147_s28] sm:$0xff]  ;;  %v460_v19 = vld [vmem:[%s8147_s28 + $0x8] sm:$0xff]  ;;  %v461_v24 = vld [vmem:[%s8147_s28 + $0x10] sm:$0xff]  ;;  %v10433_v41 = vmov 0  ;;  %v10436_v44 = vmov 0  ;;  %v10441_v46 = vmov 0 }
  0x6d   : > { %7887 = vsyncadd (%p10432_p8), [#allocation8], 4294930432  ;;  %492 = vst [vmem:[#allocation2 + $0x10] sm:$0xff] %v459_v18  ;;  %v462_v25 = vld [vmem:[%s8147_s28 + $0x18] sm:$0xff]  ;;  %v463_v30 = vld [vmem:[%s8147_s28 + $0x20] sm:$0xff]  ;;  %v10444_v47 = vmov 0 }
  0x6e   : > { %v8157_v1 = vshrl.u32 %v218_v0, 7  ;;  %493 = vst [vmem:[#allocation2 + $0x18] sm:$0xff] %v460_v19  ;;  %494 = vst [vmem:[#allocation2 + $0x20] sm:$0xff] %v461_v24  ;;  %v464_v31 = vld [vmem:[%s8147_s28 + $0x28] sm:$0xff]  ;;  %v465_v36 = vld [vmem:[%s8147_s28 + $0x30] sm:$0xff]  ;;  %v10449_v51 = vmov 0 }
  0x6f   : > { %524 = vst [vmem:[#allocation2] sm:$0xff] %v461_v24  ;;  %495 = vst [vmem:[#allocation2 + $0x28] sm:$0xff] %v462_v25  ;;  %v466_v37 = vld [vmem:[%s8147_s28 + $0x38] sm:$0xff]  ;;  %v467_v42 = vld [vmem:[%s8147_s28 + $0x40] sm:$0xff]  ;;  %v10451_v52 = vmov 0  ;;  %v10454_v53 = vmov 0 }
  0x70   : > { %v8160_v2 = vadd.s32 8, %v8157_v1  ;;  %v221_v3 = vadd.s32 16, %v8157_v1  ;;  %v8164_v4 = vadd.s32 24, %v8157_v1  ;;  %v223_v5 = vadd.s32 32, %v8157_v1  ;;  %525 = vst [vmem:[#allocation2 + $0x8] sm:$0xff] %v462_v25  ;;  %496 = vst [vmem:[#allocation2 + $0x30] sm:$0xff] %v463_v30 }
  0x71   : > { %v8168_v6 = vadd.s32 40, %v8157_v1  ;;  %v225_v7 = vadd.s32 48, %v8157_v1  ;;  %v8172_v8 = vadd.s32 56, %v8157_v1  ;;  %v227_v9 = vadd.s32 64, %v8157_v1  ;;  %497 = vst [vmem:[#allocation2 + $0x38] sm:$0xff] %v464_v31  ;;  %498 = vst [vmem:[#allocation2 + $0x40] sm:$0xff] %v465_v36 }
  0x72   : > { %v8176_v10 = vadd.s32 72, %v8157_v1  ;;  %v229_v11 = vadd.s32 80, %v8157_v1  ;;  %v8180_v12 = vadd.s32 88, %v8157_v1  ;;  %v231_v13 = vadd.s32 96, %v8157_v1  ;;  %499 = vst [vmem:[#allocation2 + $0x48] sm:$0xff] %v466_v37  ;;  %v468_v43 = vld [vmem:[%s8147_s28 + $0x48] sm:$0xff] }
  0x73   : > { %v8184_v14 = vadd.s32 104, %v8157_v1  ;;  %v233_v15 = vadd.s32 112, %v8157_v1  ;;  %v8188_v16 = vadd.s32 120, %v8157_v1  ;;  %v239_v17 = vand.u32 15, %v8157_v1  ;;  %500 = vst [vmem:[#allocation2 + $0x50] sm:$0xff] %v467_v42  ;;  %501 = vst [vmem:[#allocation2 + $0x58] sm:$0xff] %v468_v43 }
  0x74   : > { %v246_v20 = vand.u32 15, %v8160_v2  ;;  %v253_v21 = vand.u32 15, %v221_v3  ;;  %v260_v22 = vand.u32 15, %v8164_v4  ;;  %v267_v23 = vand.u32 15, %v223_v5  ;;  %v469_v48 = vld [vmem:[%s8147_s28 + $0x50] sm:$0xff]  ;;  %v470_v49 = vld [vmem:[%s8147_s28 + $0x58] sm:$0xff] }
  0x75   : > { %v274_v26 = vand.u32 15, %v8168_v6  ;;  %v281_v27 = vand.u32 15, %v225_v7  ;;  %v288_v28 = vand.u32 15, %v8172_v8  ;;  %v295_v29 = vand.u32 15, %v227_v9  ;;  %502 = vst [vmem:[#allocation2 + $0x60] sm:$0xff] %v469_v48  ;;  %503 = vst [vmem:[#allocation2 + $0x68] sm:$0xff] %v470_v49 }
  0x76   : > { %v302_v32 = vand.u32 15, %v8176_v10  ;;  %v309_v33 = vand.u32 15, %v229_v11  ;;  %v316_v34 = vand.u32 15, %v8180_v12  ;;  %v323_v35 = vand.u32 15, %v231_v13  ;;  %v471_v54 = vld [vmem:[%s8147_s28 + $0x60] sm:$0xff]  ;;  %v472_v55 = vld [vmem:[%s8147_s28 + $0x68] sm:$0xff] }
  0x77   : > { %v330_v38 = vand.u32 15, %v8184_v14  ;;  %v337_v39 = vand.u32 15, %v233_v15  ;;  %v344_v40 = vand.u32 15, %v8188_v16  ;;  %vm8207_vm0 = vcmp.eq.s32.totalorder %v239_v17, 0  ;;  %504 = vst [vmem:[#allocation2 + $0x70] sm:$0xff] %v471_v54  ;;  %505 = vst [vmem:[#allocation2 + $0x78] sm:$0xff] %v472_v55 }
  0x78   : > { %v10434_v41 = vsel %vm8207_vm0, 4294967295, %v10433_v41  ;;  %vm8213_vm1 = vcmp.eq.s32.totalorder %v253_v21, 0  ;;  %vm8217_vm2 = vcmp.eq.s32.totalorder %v267_v23, 0  ;;  %vm8221_vm3 = vcmp.eq.s32.totalorder %v281_v27, 0  ;;  %v473_v60 = vld [vmem:[%s8147_s28 + $0x70] sm:$0xff]  ;;  %v474_v61 = vld [vmem:[%s8147_s28 + $0x78] sm:$0xff] }
  0x79   : > { %10435 = vst [vmem:[#allocation14_spill] sm:$0xff] %v10434_v41  ;;  %v10437_v44 = vsel %vm8213_vm1, 4294967295, %v10436_v44  ;;  %v10442_v46 = vsel %vm8221_vm3, 4294967295, %v10441_v46  ;;  %vm8225_vm4 = vcmp.eq.s32.totalorder %v295_v29, 0  ;;  %vm8231_vm5 = vcmp.eq.s32.totalorder %v309_v33, 0  ;;  %506 = vst [vmem:[#allocation2 + $0x80] sm:$0xff] %v473_v60 }
  0x7a   : > { %10438 = vst [vmem:[#allocation15_spill] sm:$0xff] %v10437_v44  ;;  %10443 = vst [vmem:[#allocation16_spill] sm:$0xff] %v10442_v46  ;;  %v10445_v47 = vsel %vm8225_vm4, 4294967295, %v10444_v47  ;;  %vm8235_vm6 = vcmp.eq.s32.totalorder %v323_v35, 0  ;;  %vm8239_vm7 = vcmp.eq.s32.totalorder %v337_v39, 0  ;;  %vm8243_vm8 = vcmp.eq.s32.totalorder %v246_v20, 15 }
  0x7b   : > { %10446 = vst [vmem:[#allocation17_spill] sm:$0xff] %v10445_v47  ;;  %v10450_v51 = vsel %vm8235_vm6, 4294967295, %v10449_v51  ;;  %v10452_v52 = vsel %vm8239_vm7, 4294967295, %v10451_v52  ;;  %v10455_v53 = vsel %vm8243_vm8, 4294967295, %v10454_v53  ;;  %vm8249_vm9 = vcmp.eq.s32.totalorder %v260_v22, 15  ;;  %507 = vst [vmem:[#allocation2 + $0x88] sm:$0xff] %v474_v61 }
  0x7c   : > { %10453 = vst [vmem:[#allocation18_spill] sm:$0xff] %v10452_v52  ;;  %10456 = vst [vmem:[#allocation19_spill] sm:$0xff] %v10455_v53  ;;  %vm8253_vm10 = vcmp.eq.s32.totalorder %v274_v26, 15  ;;  %v10459_v57 = vmov 0  ;;  %vm8257_vm11 = vcmp.eq.s32.totalorder %v288_v28, 15  ;;  %v10462_v58 = vmov 0 }
  0x7d   : > { %v10460_v57 = vsel %vm8253_vm10, 4294967295, %v10459_v57  ;;  %v10463_v58 = vsel %vm8257_vm11, 4294967295, %v10462_v58  ;;  %vm8261_vm12 = vcmp.eq.s32.totalorder %v302_v32, 15  ;;  %vm8267_vm13 = vcmp.eq.s32.totalorder %v316_v34, 15  ;;  %v475_v2 = vld [vmem:[%s8147_s28 + $0x80] sm:$0xff]  ;;  %v476_v3 = vld [vmem:[%s8147_s28 + $0x88] sm:$0xff] }
  0x7e   : > { %10461 = vst [vmem:[#allocation20_spill] sm:$0xff] %v10460_v57  ;;  %10464 = vst [vmem:[#allocation21_spill] sm:$0xff] %v10463_v58  ;;  %vm8271_vm14 = vcmp.eq.s32.totalorder %v330_v38, 15  ;;  %v10469_v63 = vmov 0  ;;  %vm8275_vm15 = vcmp.eq.s32.totalorder %v344_v40, 15  ;;  %v477_v4 = vld [vmem:[%s8147_s28 + $0x90] sm:$0xff] }
  0x7f   : > { %v10470_v63 = vsel %vm8271_vm14, 4294967295, %v10469_v63  ;;  %508 = vst [vmem:[#allocation2 + $0x90] sm:$0xff] %v475_v2  ;;  %509 = vst [vmem:[#allocation2 + $0x98] sm:$0xff] %v476_v3  ;;  %v478_v5 = vld [vmem:[%s8147_s28 + $0x98] sm:$0xff]  ;;  %v479_v6 = vld [vmem:[%s8147_s28 + $0xa0] sm:$0xff]  ;;  %s8297_s18 = scalar_lea.vmem [#allocation10], %s5062_s30 }
  0x80   : > { %10471 = vst [vmem:[#allocation22_spill] sm:$0xff] %v10470_v63  ;;  %510 = vst [vmem:[#allocation2 + $0xa0] sm:$0xff] %v477_v4  ;;  %v480_v7 = vld [vmem:[%s8147_s28 + $0xa8] sm:$0xff]  ;;  %v481_v8 = vld [vmem:[%s8147_s28 + $0xb0] sm:$0xff]  ;;  %v8299_v18 = vmov 0.0   ;;  %v8301_v19 = vmov 0.0  }
  0x81   : > { %511 = vst [vmem:[#allocation2 + $0xa8] sm:$0xff] %v478_v5  ;;  %512 = vst [vmem:[#allocation2 + $0xb0] sm:$0xff] %v479_v6  ;;  %v482_v9 = vld [vmem:[%s8147_s28 + $0xb8] sm:$0xff]  ;;  %v483_v10 = vld [vmem:[%s8147_s28 + $0xc0] sm:$0xff]  ;;  %s8303_s20 = smov 0  }
  0x82   : > { %513 = vst [vmem:[#allocation2 + $0xb8] sm:$0xff] %v480_v7  ;;  %514 = vst [vmem:[#allocation2 + $0xc0] sm:$0xff] %v481_v8  ;;  %v484_v11 = vld [vmem:[%s8147_s28 + $0xc8] sm:$0xff]  ;;  %v485_v12 = vld [vmem:[%s8147_s28 + $0xd0] sm:$0xff] }
  0x83   : > { %515 = vst [vmem:[#allocation2 + $0xc8] sm:$0xff] %v482_v9  ;;  %516 = vst [vmem:[#allocation2 + $0xd0] sm:$0xff] %v483_v10  ;;  %v486_v13 = vld [vmem:[%s8147_s28 + $0xd8] sm:$0xff]  ;;  %v487_v14 = vld [vmem:[%s8147_s28 + $0xe0] sm:$0xff] }
  0x84   : > { %517 = vst [vmem:[#allocation2 + $0xd8] sm:$0xff] %v484_v11  ;;  %518 = vst [vmem:[#allocation2 + $0xe0] sm:$0xff] %v485_v12  ;;  %v488_v15 = vld [vmem:[%s8147_s28 + $0xe8] sm:$0xff]  ;;  %v489_v16 = vld [vmem:[%s8147_s28 + $0xf0] sm:$0xff] }
  0x85   : > { %519 = vst [vmem:[#allocation2 + $0xe8] sm:$0xff] %v486_v13  ;;  %520 = vst [vmem:[#allocation2 + $0xf0] sm:$0xff] %v487_v14  ;;  %v490_v17 = vld [vmem:[%s8147_s28 + $0xf8] sm:$0xff] }
  0x86   : > { %527 = vst [vmem:[#allocation2 + $0x110] sm:$0xff] %v487_v14  ;;  %521 = vst [vmem:[#allocation2 + $0xf8] sm:$0xff] %v488_v15 }
  0x87   : > { %528 = vst [vmem:[#allocation2 + $0x118] sm:$0xff] %v488_v15  ;;  %522 = vst [vmem:[#allocation2 + $0x100] sm:$0xff] %v489_v16 }
  0x88   : > { %523 = vst [vmem:[#allocation2 + $0x108] sm:$0xff] %v490_v17 }
  0x89 LB: >> { %v10474_v63 = vld [vmem:[#allocation22_spill] sm:$0xff]  ;;  %v10475_v57 = vld [vmem:[#allocation20_spill] sm:$0xff]  ;;  %v10476_v58 = vld [vmem:[#allocation21_spill] sm:$0xff]  ;;  %10477 = vst [vmem:[#allocation23_spill] sm:$0xff] %v7910_v18  ;;  %s5148_s7 = sshll.u32 %s7918_s20, 7  ;;  %vm10360_vm7 = vcmp.lt.s32.totalorder %v8157_v1, 1  ;;  %vm10531_vm6 = vnez %v10450_v51  ;;  %s7918_s20 = sphi %s8303_s20, %s534_s20   ;;  %v7914_v19 = vphi %v8301_v19, %v10591_v19   ;;  %v7910_v18 = vphi %v8299_v18, %v10590_v18  }
  0x8a   : >> { %10478 = vst [vmem:[#allocation24_spill] sm:$0xff] %v7914_v19  ;;  %v671_v20 = vld [vmem:[#allocation7 + $0x80] sm:$0xff]  ;;  %v672_v21 = vld [vmem:[#allocation7 + $0x88] sm:$0xff]  ;;  %v673_v25 = vld [vmem:[#allocation7 + $0x90] sm:$0xff]  ;;  %s8317_s8 = scalar_lea.vmem [#allocation2], %s5148_s7  ;;  %vm10363_vm14 = vcmp.lt.s32.totalorder %v8157_v1, 7  ;;  %vm10521_vm10 = vnez %v10475_v57  ;;  %vm10525_vm11 = vnez %v10476_v58 }
  0x8b   : >> { %v1449_v22 = vld [vmem:[#allocation7 + $0x200] sm:$0xff]  ;;  %v6739_v23 = vpack.c.bf16 %v672_v21, %v671_v20  ;;  %v1450_v24 = vld [vmem:[#allocation7 + $0x208] sm:$0xff]  ;;  %v674_v26 = vld [vmem:[#allocation7 + $0x98] sm:$0xff]  ;;  %s8996_s24 = scalar_lea.vmem [#allocation3], %s5148_s7  ;;  %s534_s20 = sadd.s32 1, %s7918_s20  }
  0x8c   : >> { %v6867_v27 = vpack.c.bf16 %v1450_v24, %v1449_v22  ;;  %v6743_v28 = vpack.c.bf16 %v674_v26, %v673_v25  ;;  %v1451_v29 = vld [vmem:[#allocation7 + $0x210] sm:$0xff]  ;;  %v1452_v30 = vld [vmem:[#allocation7 + $0x218] sm:$0xff]  ;;  %v675_v31 = vld [vmem:[#allocation7 + $0xa0] sm:$0xff]  ;;  %p531_p11 = scmp.ge.s32.totalorder %s534_s20, 2  }
  0x8d   : >> { %6740 = vmatprep.subr.bf16.mxu1 %v6739_v23  ;;  %v6871_v32 = vpack.c.bf16 %v1452_v30, %v1451_v29  ;;  %v676_v33 = vld [vmem:[#allocation7 + $0xa8] sm:$0xff]  ;;  %v1453_v34 = vld [vmem:[#allocation7 + $0x220] sm:$0xff]  ;;  %v677_v38 = vld [vmem:[#allocation7 + $0xb0] sm:$0xff]  ;;  %s9253_s27 = smov (%p531_p11), 0  }
  0x8e   : >> { %v1454_v35 = vld [vmem:[#allocation7 + $0x228] sm:$0xff]  ;;  %6868 = vmatprep.subr.bf16.mxu0 %v6867_v27  ;;  %6742 = vmatpush3.bf16.msra.mxu1 %v6739_v23  ;;  %v6747_v36 = vpack.c.bf16 %v676_v33, %v675_v31  ;;  %v678_v39 = vld [vmem:[#allocation7 + $0xb8] sm:$0xff]  ;;  %v1455_v40 = vld [vmem:[#allocation7 + $0x230] sm:$0xff] }
  0x8f   : >> { %6870 = vmatpush3.bf16.msra.mxu0 %v6867_v27  ;;  %6744 = vmatprep.subr.bf16.mxu1 %v6743_v28  ;;  %v6875_v37 = vpack.c.bf16 %v1454_v35, %v1453_v34  ;;  %v1456_v42 = vld [vmem:[#allocation7 + $0x238] sm:$0xff]  ;;  %v6751_v43 = vpack.c.bf16 %v678_v39, %v677_v38  ;;  %v679_v49 = vld [vmem:[#allocation7 + $0xc0] sm:$0xff]  ;;  %v680_v54 = vld [vmem:[#allocation7 + $0xc8] sm:$0xff] }
  0x90   : >> { %6872 = vmatprep.subr.bf16.mxu0 %v6871_v32  ;;  %v6879_v48 = vpack.c.bf16 %v1456_v42, %v1455_v40  ;;  %v8320_v55 = vld [vmem:[%s8317_s8] sm:$0xff]  ;;  %v1458_v61 = vld [vmem:[#allocation7 + $0x248] sm:$0xff]  ;;  %v8324_v2 = vld [vmem:[%s8317_s8 + $0x10] sm:$0xff]  ;;  %v6755_v3 = vpack.c.bf16 %v680_v54, %v679_v49 }
  0x91   : >> { %10479 = vst [vmem:[#allocation25_spill] sm:$0xff] %v8320_v55  ;;  %v1457_v60 = vld [vmem:[#allocation7 + $0x240] sm:$0xff]  ;;  %5763 = vmatprep.mubr.f32.mxu1 %v8320_v55  ;;  %5987 = vmatprep.mubr.f32.mxu0 %v8324_v2  ;;  %v681_v5 = vld [vmem:[#allocation7 + $0xd0] sm:$0xff]  ;;  %v682_v6 = vld [vmem:[#allocation7 + $0xd8] sm:$0xff] }
  0x92   : >> { %6746 = vmatpush3.bf16.msra.mxu1 %v6743_v28  ;;  %v6883_v4 = vpack.c.bf16 %v1458_v61, %v1457_v60  ;;  %v1459_v7 = vld [vmem:[#allocation7 + $0x250] sm:$0xff]  ;;  %v1460_v8 = vld [vmem:[#allocation7 + $0x258] sm:$0xff]  ;;  %v6759_v9 = vpack.c.bf16 %v682_v6, %v681_v5  ;;  %v683_v11 = vld [vmem:[#allocation7 + $0xe0] sm:$0xff] }
  0x93   : >> { %6874 = vmatpush3.bf16.msra.mxu0 %v6871_v32  ;;  %6748 = vmatprep.subr.bf16.mxu1 %v6747_v36  ;;  %v6887_v10 = vpack.c.bf16 %v1460_v8, %v1459_v7  ;;  %v684_v12 = vld [vmem:[#allocation7 + $0xe8] sm:$0xff]  ;;  %v1461_v13 = vld [vmem:[#allocation7 + $0x260] sm:$0xff]  ;;  %v685_v17 = vld [vmem:[#allocation7 + $0xf0] sm:$0xff] }
  0x94   : >> { %6876 = vmatprep.subr.bf16.mxu0 %v6875_v37  ;;  %v1462_v14 = vld [vmem:[#allocation7 + $0x268] sm:$0xff]  ;;  %v6763_v15 = vpack.c.bf16 %v684_v12, %v683_v11  ;;  %v686_v20 = vld [vmem:[#allocation7 + $0xf8] sm:$0xff]  ;;  %v1463_v21 = vld [vmem:[#allocation7 + $0x270] sm:$0xff] }
  0x95   : >> { %v6891_v16 = vpack.c.bf16 %v1462_v14, %v1461_v13  ;;  %v1464_v22 = vld [vmem:[#allocation7 + $0x278] sm:$0xff]  ;;  %v6767_v23 = vpack.c.bf16 %v686_v20, %v685_v17  ;;  %v654_v25 = vld [vmem:[#allocation7] sm:$0xff]  ;;  %v655_v26 = vld [vmem:[#allocation7 + $0x8] sm:$0xff] }
  0x96   : >> { %6750 = vmatpush3.bf16.msra.mxu1 %v6747_v36  ;;  %v6895_v24 = vpack.c.bf16 %v1464_v22, %v1463_v21  ;;  %v1627_v27 = vld [vmem:[#allocation7 + $0x280] sm:$0xff]  ;;  %v1628_v28 = vld [vmem:[#allocation7 + $0x288] sm:$0xff]  ;;  %v6771_v29 = vpack.c.bf16 %v655_v26, %v654_v25  ;;  %v656_v31 = vld [vmem:[#allocation7 + $0x10] sm:$0xff] }
  0x97   : >> { %6878 = vmatpush3.bf16.msra.mxu0 %v6875_v37  ;;  %6752 = vmatprep.subr.bf16.mxu1 %v6751_v43  ;;  %v6899_v30 = vpack.c.bf16 %v1628_v28, %v1627_v27  ;;  %v657_v32 = vld [vmem:[#allocation7 + $0x18] sm:$0xff]  ;;  %v8328_v33 = vld [vmem:[%s8317_s8 + $0x8] sm:$0xff]  ;;  %v1629_v34 = vld [vmem:[#allocation7 + $0x290] sm:$0xff]  ;;  %v10319_v27 = vrot.slane %v8320_v55, 1 }
  0x98   : >> { %6880 = vmatprep.subr.bf16.mxu0 %v6879_v48  ;;  %10480 = vst [vmem:[#allocation26_spill] sm:$0xff] %v8328_v33  ;;  %v1630_v35 = vld [vmem:[#allocation7 + $0x298] sm:$0xff]  ;;  %v6775_v37 = vpack.c.bf16 %v657_v32, %v656_v31  ;;  %v8335_v38 = vld [vmem:[%s8317_s8 + $0x20] sm:$0xff]  ;;  %v659_v42 = vld [vmem:[#allocation7 + $0x28] sm:$0xff]  ;;  %v10320_v28 = vrot.slane %v8328_v33, 1 }
  0x99   : >> { %v8331_v36 = vld [vmem:[%s8317_s8 + $0x18] sm:$0xff]  ;;  %10481 = vst [vmem:[#allocation27_spill] sm:$0xff] %v8335_v38  ;;  %v6903_v39 = vpack.c.bf16 %v1630_v35, %v1629_v34  ;;  %v658_v40 = vld [vmem:[#allocation7 + $0x20] sm:$0xff]  ;;  %v8340_v49 = vld [vmem:[%s8317_s8 + $0x28] sm:$0xff]  ;;  %v8380_v34 = vrot.slane %v8324_v2, 1 }
  0x9a   : >> { %6754 = vmatpush3.bf16.msra.mxu1 %v6751_v43  ;;  %v1631_v43 = vld [vmem:[#allocation7 + $0x2a0] sm:$0xff]  ;;  %10482 = vst [vmem:[#allocation28_spill] sm:$0xff] %v8340_v49  ;;  %v6779_v54 = vpack.c.bf16 %v659_v42, %v658_v40  ;;  %v8345_v60 = vld [vmem:[%s8317_s8 + $0x30] sm:$0xff]  ;;  %v1634_v6 = vld [vmem:[#allocation7 + $0x2b8] sm:$0xff]  ;;  %v1207_v35 = vrot.slane %v8331_v36, 1  ;;  %v8387_v40 = vrot.slane %v8324_v2, 7 }
  0x9b   : >> { %6882 = vmatpush3.bf16.msra.mxu0 %v6879_v48  ;;  %6756 = vmatprep.subr.bf16.mxu1 %v6755_v3  ;;  %v1632_v48 = vld [vmem:[#allocation7 + $0x2a8] sm:$0xff]  ;;  %10483 = vst [vmem:[#allocation29_spill] sm:$0xff] %v8345_v60  ;;  %v1633_v5 = vld [vmem:[#allocation7 + $0x2b0] sm:$0xff]  ;;  %v8350_v7 = vld [vmem:[%s8317_s8 + $0x38] sm:$0xff]  ;;  %v557_v42 = vrot.slane %v8328_v33, 7 }
  0x9c   : >> { %6884 = vmatprep.subr.bf16.mxu0 %v6883_v4  ;;  %v6907_v61 = vpack.c.bf16 %v1632_v48, %v1631_v43  ;;  %10484 = vst [vmem:[#allocation30_spill] sm:$0xff] %v8350_v7  ;;  %v662_v11 = vld [vmem:[#allocation7 + $0x40] sm:$0xff]  ;;  %v663_v12 = vld [vmem:[#allocation7 + $0x48] sm:$0xff]  ;;  %v8365_v17 = vld [vmem:[%s8317_s8 + $0x50] sm:$0xff]  ;;  %v1175_v43 = vrot.slane %v8331_v36, 7  ;;  %v10500_v19 = vrot.slane %v8350_v7, 7 }
  0x9d   : >> { %v1635_v13 = vld [vmem:[#allocation7 + $0x2c0] sm:$0xff]  ;;  %v1636_v14 = vld [vmem:[#allocation7 + $0x2c8] sm:$0xff]  ;;  %10487 = vst [vmem:[#allocation33_spill] sm:$0xff] %v8365_v17  ;;  %v664_v21 = vld [vmem:[#allocation7 + $0x50] sm:$0xff] }
  0x9e   : >> { %6758 = vmatpush3.bf16.msra.mxu1 %v6755_v3  ;;  %v660_v3 = vld [vmem:[#allocation7 + $0x30] sm:$0xff]  ;;  %v6915_v20 = vpack.c.bf16 %v1636_v14, %v1635_v13  ;;  %v665_v22 = vld [vmem:[#allocation7 + $0x58] sm:$0xff]  ;;  %v666_v31 = vld [vmem:[#allocation7 + $0x60] sm:$0xff]  ;;  %10490 = vst [vmem:[#allocation36_spill] sm:$0xff] %v8387_v40  ;;  %v8426_v14 = vsel %vm10363_vm14, %v10319_v27, %v10320_v28 }
  0x9f   : >> { %6886 = vmatpush3.bf16.msra.mxu0 %v6883_v4  ;;  %6760 = vmatprep.subr.bf16.mxu1 %v6759_v9  ;;  %v661_v4 = vld [vmem:[#allocation7 + $0x38] sm:$0xff]  ;;  %v6791_v26 = vpack.c.bf16 %v665_v22, %v664_v21  ;;  %v667_v32 = vld [vmem:[#allocation7 + $0x68] sm:$0xff]  ;;  %10494 = vst [vmem:[#allocation40_spill] sm:$0xff] %v8426_v14  ;;  %v8433_v22 = vsel %vm10363_vm14, %v8380_v34, %v1207_v35 }
  0xa0   : >> { %6888 = vmatprep.subr.bf16.mxu0 %v6887_v10  ;;  %v6783_v8 = vpack.c.bf16 %v661_v4, %v660_v3  ;;  %v8370_v25 = vld [vmem:[%s8317_s8 + $0x58] sm:$0xff]  ;;  %v8393_v48 = vld [vmem:[%s8317_s8 + $0x68] sm:$0xff]  ;;  %v556_v3 = vrot.slane %v8320_v55, 7  ;;  %v8403_v4 = vrot.slane %v8335_v38, 7  ;;  %v1922_v55 = vld [vmem:[#allocation7 + $0x310] sm:$0xff] }
  0xa1   : >> { %10488 = vst [vmem:[#allocation34_spill] sm:$0xff] %v8370_v25  ;;  %10491 = vst [vmem:[#allocation37_spill] sm:$0xff] %v8393_v48  ;;  %v669_v13 = vld [vmem:[#allocation7 + $0x78] sm:$0xff]  ;;  %v8496_v18 = vld [vmem:[%s8317_s8 + $0x88] sm:$0xff] }
  0xa2   : >> { %6762 = vmatpush3.bf16.msra.mxu1 %v6759_v9  ;;  %v8355_v9 = vld [vmem:[%s8317_s8 + $0x40] sm:$0xff]  ;;  %v1642_v21 = vld [vmem:[#allocation7 + $0x2f8] sm:$0xff]  ;;  %10498 = vst [vmem:[#allocation44_spill] sm:$0xff] %v8496_v18 }
  0xa3   : >> { %6890 = vmatpush3.bf16.msra.mxu0 %v6887_v10  ;;  %6764 = vmatprep.subr.bf16.mxu1 %v6763_v15  ;;  %10485 = vst [vmem:[#allocation31_spill] sm:$0xff] %v8355_v9  ;;  %v6911_v10 = vpack.c.bf16 %v1634_v6, %v1633_v5  ;;  %v8410_v5 = vld [vmem:[%s8317_s8 + $0x78] sm:$0xff]  ;;  %v10325_v6 = vrot.slane %v8340_v49, 7  ;;  %v1212_v44 = vrot.slane %v8355_v9, 1 }
  0xa4   : >> { %6892 = vmatprep.subr.bf16.mxu0 %v6891_v16  ;;  %10493 = vst [vmem:[#allocation39_spill] sm:$0xff] %v8410_v5  ;;  %v10558_v58 = vld [vmem:[#allocation25_spill] sm:$0xff] }
  0xa6   : >> { %6766 = vmatpush3.bf16.msra.mxu1 %v6763_v15  ;;  %v8360_v15 = vld [vmem:[%s8317_s8 + $0x48] sm:$0xff] }
  0xa7   : >> { %6894 = vmatpush3.bf16.msra.mxu0 %v6891_v16  ;;  %6768 = vmatprep.subr.bf16.mxu1 %v6767_v23  ;;  %10486 = vst [vmem:[#allocation32_spill] sm:$0xff] %v8360_v15  ;;  %v6787_v16 = vpack.c.bf16 %v663_v12, %v662_v11  ;;  %v668_v12 = vld [vmem:[#allocation7 + $0x70] sm:$0xff] }
  0xa8   : >> { %6896 = vmatprep.subr.bf16.mxu0 %v6895_v24  ;;  %v6799_v27 = vpack.c.bf16 %v669_v13, %v668_v12  ;;  %v978_v13 = vld [vmem:[#allocation7 + $0x100] sm:$0xff] }
  0xaa   : >> { %6770 = vmatpush3.bf16.msra.mxu1 %v6767_v23  ;;  %v1637_v23 = vld [vmem:[#allocation7 + $0x2d0] sm:$0xff] }
  0xab   : >> { %6898 = vmatpush3.bf16.msra.mxu0 %v6895_v24  ;;  %6772 = vmatprep.subr.bf16.mxu1 %v6771_v29  ;;  %v1638_v24 = vld [vmem:[#allocation7 + $0x2d8] sm:$0xff] }
  0xac   : >> { %6900 = vmatprep.subr.bf16.mxu0 %v6899_v30 }
  0xad   : >> { %5764 = vmatmul.mubr.f32.vlgmr.msra.gmra.mrb[0].mxu1 %v8328_v33  ;;  %v983_v33 = vld [vmem:[#allocation7 + $0x128] sm:$0xff] }
  0xae   : >> { %5988 = vmatmul.mubr.f32.vlgmr.msra.gmra.mrb[0].mxu0 %v8331_v36  ;;  %6774 = vmatpush3.bf16.msra.mxu1 %v6771_v29  ;;  %v8377_v29 = vld [vmem:[%s8317_s8 + $0x60] sm:$0xff] }
  0xaf   : >> { %6902 = vmatpush3.bf16.msra.mxu0 %v6899_v30  ;;  %5766 = vmatprep.mubr.f32.mxu1 %v8324_v2  ;;  %10489 = vst [vmem:[#allocation35_spill] sm:$0xff] %v8377_v29  ;;  %v6919_v30 = vpack.c.bf16 %v1638_v24, %v1637_v23  ;;  %v8406_v2 = vrot.slane %v8335_v38, 1 }
  0xb0   : >> { %5990 = vmatprep.mubr.f32.mxu0 %v8335_v38  ;;  %6776 = vmatprep.subr.bf16.mxu1 %v6775_v37 }
  0xb1   : >> { %5767 = vmatmul.mubr.f32.gmra.mrb[2].mxu1 %v8331_v36  ;;  %6904 = vmatprep.subr.bf16.mxu0 %v6903_v39  ;;  %v6795_v36 = vpack.c.bf16 %v667_v32, %v666_v31  ;;  %v10324_v31 = vrot.slane %v8345_v60, 7  ;;  %v8467_v32 = vld [vmem:[%s8317_s8 + $0x80] sm:$0xff] }
  0xb2   : >> { %5991 = vmatmul.mubr.f32.gmra.mrb[2].mxu0 %v8340_v49  ;;  %6778 = vmatpush3.bf16.msra.mxu1 %v6775_v37  ;;  %v1639_v37 = vld [vmem:[#allocation7 + $0x2e0] sm:$0xff]  ;;  %v10513_v53 = vrot.slane %v8467_v32, 7 }
  0xb3   : >> { %6906 = vmatpush3.bf16.msra.mxu0 %v6903_v39  ;;  %5769 = vmatprep.mubr.f32.mxu1 %v8335_v38  ;;  %v1640_v39 = vld [vmem:[#allocation7 + $0x2e8] sm:$0xff] }
  0xb4   : >> { %5993 = vmatprep.mubr.f32.mxu0 %v8345_v60  ;;  %6780 = vmatprep.subr.bf16.mxu1 %v6779_v54  ;;  %v6923_v11 = vpack.c.bf16 %v1640_v39, %v1639_v37  ;;  %v8447_v37 = vsel %vm10360_vm7, %v8387_v40, %v1175_v43  ;;  %v979_v39 = vld [vmem:[#allocation7 + $0x108] sm:$0xff] }
  0xb5   : >> { %5770 = vmatmul.mubr.f32.gmra.mrb[4].mxu1 %v8340_v49  ;;  %6908 = vmatprep.subr.bf16.mxu0 %v6907_v61 }
  0xb6   : >> { %5994 = vmatmul.mubr.f32.gmra.mrb[4].mxu0 %v8350_v7  ;;  %6782 = vmatpush3.bf16.msra.mxu1 %v6779_v54  ;;  %v8396_v54 = vld [vmem:[%s8317_s8 + $0x98] sm:$0xff] }
  0xb7   : >> { %6910 = vmatpush3.bf16.msra.mxu0 %v6907_v61  ;;  %5772 = vmatprep.mubr.f32.mxu1 %v8345_v60  ;;  %v8399_v61 = vld [vmem:[%s8317_s8 + $0x90] sm:$0xff]  ;;  %v10322_v23 = vrot.slane %v8396_v54, 7 }
  0xb8   : >> { %5996 = vmatprep.mubr.f32.mxu0 %v8355_v9  ;;  %6784 = vmatprep.subr.bf16.mxu1 %v6783_v8  ;;  %10492 = vst [vmem:[#allocation38_spill] sm:$0xff] %v8399_v61  ;;  %v10321_v24 = vrot.slane %v8399_v61, 7 }
  0xb9   : >> { %5773 = vmatmul.mubr.f32.gmra.mrb[6].mxu1 %v8350_v7  ;;  %6912 = vmatprep.subr.bf16.mxu0 %v6911_v10 }
  0xba   : >> { %5997 = vmatmul.mubr.f32.gmra.mrb[6].mxu0 %v8360_v15  ;;  %6786 = vmatpush3.bf16.msra.mxu1 %v6783_v8  ;;  %v8415_v8 = vld [vmem:[%s8317_s8 + $0x70] sm:$0xff]  ;;  %v8462_v28 = vsel %vm10360_vm7, %v10321_v24, %v10322_v23  ;;  %v8475_v24 = vsel %vm10360_vm7, %v1175_v43, %v8403_v4  ;;  %v8489_v43 = vsel %vm10360_vm7, %v10325_v6, %v10324_v31  ;;  %v10502_v6 = vrot.slane %v8365_v17, 7 }
  0xbb   : >> { %6914 = vmatpush3.bf16.msra.mxu0 %v6911_v10  ;;  %5775 = vmatprep.mubr.f32.mxu1 %v8355_v9  ;;  %v8418_v10 = vrot.slane %v8410_v5, 7  ;;  %10496 = vst [vmem:[#allocation42_spill] sm:$0xff] %v8462_v28  ;;  %10497 = vst [vmem:[#allocation43_spill] sm:$0xff] %v8475_v24  ;;  %v10503_v23 = vrot.slane %v8360_v15, 7  ;;  %v10505_v31 = vrot.slane %v8377_v29, 7  ;;  %v987_v28 = vld [vmem:[#allocation7 + $0x148] sm:$0xff] }
  0xbc   : >> { %5999 = vmatprep.mubr.f32.mxu0 %v8365_v17  ;;  %6788 = vmatprep.subr.bf16.mxu1 %v6787_v16 }
  0xbd   : >> { %5776 = vmatmul.mubr.f32.gmra.mrb[8].mxu1 %v8360_v15  ;;  %6916 = vmatprep.subr.bf16.mxu0 %v6915_v20  ;;  %v8567_v41 = vsel %vm10360_vm7, %v8418_v10, %v10513_v53 }
  0xbe   : >> { %6000 = vmatmul.mubr.f32.gmra.mrb[8].mxu0 %v8370_v25  ;;  %6790 = vmatpush3.bf16.msra.mxu1 %v6787_v16  ;;  %v8517_v16 = vsel %vm10360_vm7, %v10503_v23, %v10502_v6  ;;  %v1211_v23 = vrot.slane %v8350_v7, 1  ;;  %10514 = vst [vmem:[#allocation45_spill] sm:$0xff] %v8567_v41  ;;  %v982_v41 = vld [vmem:[#allocation7 + $0x120] sm:$0xff] }
  0xbf   : >> { %6918 = vmatpush3.bf16.msra.mxu0 %v6915_v20  ;;  %5778 = vmatprep.mubr.f32.mxu1 %v8365_v17  ;;  %v1641_v20 = vld [vmem:[#allocation7 + $0x2f0] sm:$0xff] }
  0xc0   : >> { %6002 = vmatprep.mubr.f32.mxu0 %v8377_v29  ;;  %6792 = vmatprep.subr.bf16.mxu1 %v6791_v26  ;;  %v6927_v12 = vpack.c.bf16 %v1642_v21, %v1641_v20  ;;  %v1920_v20 = vld [vmem:[#allocation7 + $0x300] sm:$0xff]  ;;  %v1921_v21 = vld [vmem:[#allocation7 + $0x308] sm:$0xff] }
  0xc1   : >> { %5779 = vmatmul.mubr.f32.gmra.mrb[10].mxu1 %v8370_v25  ;;  %6920 = vmatprep.subr.bf16.mxu0 %v6919_v30 }
  0xc2   : >> { %6003 = vmatmul.mubr.f32.gmra.mrb[10].mxu0 %v8393_v48  ;;  %6794 = vmatpush3.bf16.msra.mxu1 %v6791_v26  ;;  %v8442_v26 = vsel %vm10360_vm7, %v556_v3, %v557_v42 }
  0xc3   : >> { %6922 = vmatpush3.bf16.msra.mxu0 %v6919_v30  ;;  %5781 = vmatprep.mubr.f32.mxu1 %v8377_v29  ;;  %v8454_v30 = vsel %vm10363_vm14, %v1207_v35, %v8406_v2  ;;  %v588_v35 = vsel %vm10360_vm7, %v8418_v10, %v556_v3  ;;  %v586_v3 = vsel %vm10360_vm7, %v557_v42, %v8387_v40  ;;  %v10499_v42 = vrot.slane %v8355_v9, 7 }
  0xc4   : >> { %6005 = vmatprep.mubr.f32.mxu0 %v8415_v8  ;;  %6796 = vmatprep.subr.bf16.mxu1 %v6795_v36  ;;  %10495 = vst [vmem:[#allocation41_spill] sm:$0xff] %v8454_v30  ;;  %v10506_v40 = vrot.slane %v8370_v25, 7 }
  0xc5   : >> { %5782 = vmatmul.mubr.f32.gmra.mrb[12].mxu1 %v8393_v48  ;;  %6924 = vmatprep.subr.bf16.mxu0 %v6923_v11  ;;  %v8504_v38 = vsel %vm10360_vm7, %v10500_v19, %v10499_v42  ;;  %v1255_v42 = vsel %vm8243_vm8, %v8447_v37, %v8454_v30  ;;  %v624_v19 = vsel %vm8213_vm1, %v8433_v22, %v586_v3  ;;  %v1923_v30 = vld [vmem:[#allocation7 + $0x318] sm:$0xff]  ;;  %v10511_v3 = vrot.slane %v8345_v60, 1 }
  0xc6   : >> { %6006 = vmatmul.mubr.f32.gmra.mrb[12].mxu0 %v8410_v5  ;;  %6798 = vmatpush3.bf16.msra.mxu1 %v6795_v36  ;;  %v6803_v36 = vpack.c.bf16 %v979_v39, %v978_v13  ;;  %v980_v39 = vld [vmem:[#allocation7 + $0x110] sm:$0xff]  ;;  %v981_v13 = vld [vmem:[#allocation7 + $0x118] sm:$0xff]  ;;  %v8531_v6 = vsel %vm10360_vm7, %v10506_v40, %v10505_v31  ;;  %v10509_v40 = vrot.slane %v8415_v8, 7  ;;  %v10510_v31 = vrot.slane %v8393_v48, 7 }
  0xc7   : >> { %6926 = vmatpush3.bf16.msra.mxu0 %v6923_v11  ;;  %5784 = vmatprep.mubr.f32.mxu1 %v8415_v8  ;;  %v622_v11 = vsel %vm8207_vm0, %v8426_v14, %v588_v35  ;;  %v6931_v35 = vpack.c.bf16 %v1921_v21, %v1920_v20  ;;  %v10508_v20 = vrot.slane %v8340_v49, 7  ;;  %v10512_v14 = vrot.slane %v8340_v49, 1 }
  0xc8   : >> { %6008 = vmatprep.mubr.f32.mxu0 %v8467_v32  ;;  %6800 = vmatprep.subr.bf16.mxu1 %v6799_v27 }
  0xc9   : >> { %5785 = vmatmul.mubr.f32.gmra.mrb[14].mxu1 %v8410_v5  ;;  %6928 = vmatprep.subr.bf16.mxu0 %v6927_v12  ;;  %v8543_v21 = vsel %vm10360_vm7, %v8403_v4, %v10508_v20  ;;  %v8560_v20 = vsel %vm10363_vm14, %v10512_v14, %v10511_v3  ;;  %v8581_v53 = vsel %vm10363_vm14, %v8406_v2, %v10512_v14  ;;  %v10518_v14 = vrot.slane %v8350_v7, 7  ;;  %v985_v7 = vld [vmem:[#allocation7 + $0x138] sm:$0xff] }
  0xca   : >> { %6009 = vmatmul.mubr.f32.gmra.mrb[14].mxu0 %v8496_v18  ;;  %6802 = vmatpush3.bf16.msra.mxu1 %v6799_v27  ;;  %v8551_v27 = vsel %vm10360_vm7, %v10510_v31, %v10509_v40  ;;  %v8570_v40 = vrot.slane %v8496_v18, 1  ;;  %v6935_v3 = vpack.c.bf16 %v1923_v30, %v1922_v55  ;;  %v1925_v31 = vld [vmem:[#allocation7 + $0x328] sm:$0xff]  ;;  %v10516_v55 = vrot.slane %v8396_v54, 1 }
  0xcb   : >> { %6930 = vmatpush3.bf16.msra.mxu0 %v6927_v12  ;;  %5819 = vmatprep.mubr.f32.mxu1 %v622_v11  ;;  %v6807_v12 = vpack.c.bf16 %v981_v13, %v980_v39  ;;  %v10342_v11 = vrot.slane %v8399_v61, 1  ;;  %v1257_v39 = vsel %vm8249_vm9, %v8543_v21, %v8560_v20  ;;  %v1924_v13 = vld [vmem:[#allocation7 + $0x320] sm:$0xff]  ;;  %v989_v61 = vld [vmem:[#allocation7 + $0x158] sm:$0xff] }
  0xcc   : >> { %6043 = vmatprep.mubr.f32.mxu0 %v8433_v22  ;;  %6804 = vmatprep.subr.bf16.mxu1 %v6803_v36  ;;  %v8599_v30 = vsel %vm10363_vm14, %v10516_v55, %v8406_v2  ;;  %v8622_v55 = vsel %vm10363_vm14, %v1211_v23, %v1212_v44  ;;  %v6939_v2 = vpack.c.bf16 %v1925_v31, %v1924_v13  ;;  %v10522_v31 = vrot.slane %v8360_v15, 7 }
  0xcd   : >> { %5820 = vmatmul.mubr.f32.vlgmr.msra.gmra.mrb[0].mxu1 %v8442_v26  ;;  %6932 = vmatprep.subr.bf16.mxu0 %v6931_v35  ;;  %v8592_v49 = vsel %vm10363_vm14, %v8570_v40, %v10342_v11  ;;  %10517 = vst [vmem:[#allocation47_spill] sm:$0xff] %v8599_v30  ;;  %v10519_v11 = vrot.slane %v8345_v60, 7  ;;  %v984_v30 = vld [vmem:[#allocation7 + $0x130] sm:$0xff] }
  0xce   : >> { %6044 = vmatmul.mubr.f32.vlgmr.msra.gmra.mrb[0].mxu0 %v1255_v42  ;;  %6806 = vmatpush3.bf16.msra.mxu1 %v6803_v36  ;;  %10515 = vst [vmem:[#allocation46_spill] sm:$0xff] %v8592_v49  ;;  %v1213_v36 = vrot.slane %v8360_v15, 1  ;;  %v626_v42 = vsel %vm8217_vm2, %v8581_v53, %v8475_v24  ;;  %v1926_v24 = vld [vmem:[#allocation7 + $0x330] sm:$0xff]  ;;  %v6815_v13 = vpack.c.bf16 %v985_v7, %v984_v30  ;;  %v1217_v7 = vrot.slane %v8393_v48, 1 }
  0xcf   : >> { %6934 = vmatpush3.bf16.msra.mxu0 %v6931_v35  ;;  %5822 = vmatprep.mubr.f32.mxu1 %v624_v19  ;;  %v8612_v49 = vsel %vm10360_vm7, %v10519_v11, %v10518_v14  ;;  %v1214_v19 = vrot.slane %v8365_v17, 1  ;;  %v6811_v35 = vpack.c.bf16 %v983_v33, %v982_v41  ;;  %v10520_v11 = vrot.slane %v8345_v60, 1  ;;  %v1927_v41 = vld [vmem:[#allocation7 + $0x338] sm:$0xff] }
  0xd0   : >> { %6046 = vmatprep.mubr.f32.mxu0 %v8581_v53  ;;  %6808 = vmatprep.subr.bf16.mxu1 %v6807_v12  ;;  %v1215_v33 = vrot.slane %v8370_v25, 1  ;;  %v1259_v60 = vsel %vm10521_vm10, %v8612_v49, %v8622_v55  ;;  %v8657_v15 = vsel %vm10363_vm14, %v1212_v44, %v1213_v36 }
  0xd1   : >> { %5823 = vmatmul.mubr.f32.gmra.mrb[2].mxu1 %v8447_v37  ;;  %6936 = vmatprep.subr.bf16.mxu0 %v6935_v3  ;;  %v8629_v14 = vsel %vm10363_vm14, %v10520_v11, %v1211_v23  ;;  %v986_v11 = vld [vmem:[#allocation7 + $0x140] sm:$0xff]  ;;  %v630_v44 = vsel %vm8225_vm4, %v8657_v15, %v8504_v38 }
  0xd2   : >> { %6047 = vmatmul.mubr.f32.gmra.mrb[2].mxu0 %v1257_v39  ;;  %6810 = vmatpush3.bf16.msra.mxu1 %v6807_v12  ;;  %v628_v23 = vsel %vm8221_vm3, %v8629_v14, %v8489_v43  ;;  %v10523_v12 = vrot.slane %v8355_v9, 7  ;;  %v1929_v9 = vld [vmem:[#allocation7 + $0x348] sm:$0xff] }
  0xd3   : >> { %6938 = vmatpush3.bf16.msra.mxu0 %v6935_v3  ;;  %5825 = vmatprep.mubr.f32.mxu1 %v626_v42  ;;  %v1216_v3 = vrot.slane %v8377_v29, 1  ;;  %v8652_v42 = vsel %vm10363_vm14, %v1213_v36, %v1214_v19  ;;  %v6819_v36 = vpack.c.bf16 %v987_v28, %v986_v11  ;;  %v8685_v28 = vsel %vm10363_vm14, %v1214_v19, %v1215_v33 }
  0xd4   : >> { %v8646_v39 = vsel %vm10360_vm7, %v10523_v12, %v10522_v31  ;;  %6049 = vmatprep.mubr.f32.mxu0 %v8629_v14  ;;  %6812 = vmatprep.subr.bf16.mxu1 %v6811_v35  ;;  %10524 = vst [vmem:[#allocation48_spill] sm:$0xff] %v8652_v42  ;;  %v6943_v31 = vpack.c.bf16 %v1927_v41, %v1926_v24  ;;  %v1928_v12 = vld [vmem:[#allocation7 + $0x340] sm:$0xff]  ;;  %v10526_v24 = vrot.slane %v8370_v25, 7  ;;  %v1930_v25 = vld [vmem:[#allocation7 + $0x350] sm:$0xff] }
  0xd5   : >> { %5826 = vmatmul.mubr.f32.gmra.mrb[4].mxu1 %v8543_v21  ;;  %6940 = vmatprep.subr.bf16.mxu0 %v6939_v2  ;;  %v1261_v30 = vsel %vm10525_vm11, %v8646_v39, %v8652_v42  ;;  %v8680_v41 = vsel %vm10363_vm14, %v1215_v33, %v1216_v3  ;;  %v6947_v11 = vpack.c.bf16 %v1929_v9, %v1928_v12  ;;  %v1220_v33 = vrot.slane %v8467_v32, 1 }
  0xd6   : >> { %6050 = vmatmul.mubr.f32.gmra.mrb[4].mxu0 %v1259_v60  ;;  %6814 = vmatpush3.bf16.msra.mxu1 %v6811_v35  ;;  %v1218_v60 = vrot.slane %v8415_v8, 1  ;;  %10528 = vst [vmem:[#allocation49_spill] sm:$0xff] %v8680_v41  ;;  %v632_v19 = vsel %vm8231_vm5, %v8685_v28, %v8517_v16 }
  0xd7   : >> { %6942 = vmatpush3.bf16.msra.mxu0 %v6939_v2  ;;  %5828 = vmatprep.mubr.f32.mxu1 %v628_v23  ;;  %v10527_v2 = vrot.slane %v8365_v17, 7  ;;  %v988_v23 = vld [vmem:[#allocation7 + $0x150] sm:$0xff]  ;;  %v1931_v17 = vld [vmem:[#allocation7 + $0x358] sm:$0xff] }
  0xd8   : >> { %6052 = vmatprep.mubr.f32.mxu0 %v8657_v15  ;;  %6816 = vmatprep.subr.bf16.mxu1 %v6815_v13  ;;  %v6823_v9 = vpack.c.bf16 %v989_v61, %v988_v23  ;;  %v8715_v61 = vsel %vm10363_vm14, %v1216_v3, %v1217_v7  ;;  %v6951_v23 = vpack.c.bf16 %v1931_v17, %v1930_v25  ;;  %v8726_v3 = vrot.slane %v8496_v18, 7  ;;  %v2099_v18 = vld [vmem:[#allocation7 + $0x388] sm:$0xff] }
  0xd9   : >> { %v8676_v35 = vsel %vm10360_vm7, %v10527_v2, %v10526_v24  ;;  %5829 = vmatmul.mubr.f32.gmra.mrb[6].mxu1 %v8612_v49  ;;  %6944 = vmatprep.subr.bf16.mxu0 %v6943_v31  ;;  %v8688_v24 = vrot.slane %v8410_v5, 1  ;;  %v991_v5 = vld [vmem:[#allocation7 + $0x168] sm:$0xff]  ;;  %v10532_v17 = vrot.slane %v8415_v8, 7 }
  0xda   : >> { %6053 = vmatmul.mubr.f32.gmra.mrb[6].mxu0 %v1261_v30  ;;  %6818 = vmatpush3.bf16.msra.mxu1 %v6815_v13  ;;  %v1263_v2 = vsel %vm8261_vm12, %v8676_v35, %v8680_v41  ;;  %v10529_v13 = vrot.slane %v8393_v48, 7  ;;  %v8710_v30 = vsel %vm10363_vm14, %v1217_v7, %v1218_v60  ;;  %v1932_v48 = vld [vmem:[#allocation7 + $0x360] sm:$0xff] }
  0xdb   : >> { %6946 = vmatpush3.bf16.msra.mxu0 %v6943_v31  ;;  %5831 = vmatprep.mubr.f32.mxu1 %v630_v44  ;;  %v10530_v31 = vrot.slane %v8377_v29, 7  ;;  %v990_v44 = vld [vmem:[#allocation7 + $0x160] sm:$0xff]  ;;  %v1933_v29 = vld [vmem:[#allocation7 + $0x368] sm:$0xff]  ;;  %v8734_v25 = vsel %vm10360_vm7, %v10532_v17, %v8418_v10  ;;  %v8739_v7 = vsel %vm10363_vm14, %v8688_v24, %v1220_v33  ;;  %v1934_v10 = vld [vmem:[#allocation7 + $0x370] sm:$0xff] }
  0xdc   : >> { %6055 = vmatprep.mubr.f32.mxu0 %v8685_v28  ;;  %6820 = vmatprep.subr.bf16.mxu1 %v6819_v36  ;;  %v6827_v41 = vpack.c.bf16 %v991_v5, %v990_v44  ;;  %10533 = vst [vmem:[#allocation50_spill] sm:$0xff] %v8739_v7  ;;  %v8745_v5 = vsel %vm10363_vm14, %v1218_v60, %v8688_v24  ;;  %vm10537_vm14 = vcmp.lt.s32.totalorder %v8157_v1, 1  ;;  %v1271_v17 = vld [vmem:[#allocation7 + $0x180] sm:$0xff] }
  0xdd   : >> { %v8706_v12 = vsel %vm10360_vm7, %v10530_v31, %v10529_v13  ;;  %5832 = vmatmul.mubr.f32.gmra.mrb[8].mxu1 %v8646_v39  ;;  %6948 = vmatprep.subr.bf16.mxu0 %v6947_v11  ;;  %v634_v31 = vsel %vm10531_vm6, %v8715_v61, %v8531_v6  ;;  %vm10534_vm7 = vnez %v10474_v63  ;;  %vm10535_vm6 = vnez %v10452_v52 }
  0xde   : >> { %6056 = vmatmul.mubr.f32.gmra.mrb[8].mxu0 %v1263_v2  ;;  %6822 = vmatpush3.bf16.msra.mxu1 %v6819_v36  ;;  %v1265_v13 = vsel %vm8267_vm13, %v8706_v12, %v8710_v30  ;;  %v6955_v36 = vpack.c.bf16 %v1933_v29, %v1932_v48  ;;  %v993_v2 = vld [vmem:[#allocation7 + $0x178] sm:$0xff]  ;;  %v1267_v44 = vsel %vm10534_vm7, %v8734_v25, %v8739_v7  ;;  %v10536_v48 = vrot.slane %v8467_v32, 7  ;;  %v2098_v7 = vld [vmem:[#allocation7 + $0x380] sm:$0xff] }
  0xdf   : >> { %6950 = vmatpush3.bf16.msra.mxu0 %v6947_v11  ;;  %5834 = vmatprep.mubr.f32.mxu1 %v632_v19  ;;  %v992_v11 = vld [vmem:[#allocation7 + $0x170] sm:$0xff]  ;;  %v1935_v19 = vld [vmem:[#allocation7 + $0x378] sm:$0xff]  ;;  %v636_v60 = vsel %vm10535_vm6, %v8745_v5, %v8551_v27  ;;  %vm10538_vm7 = vcmp.lt.s32.totalorder %v8157_v1, 7 }
  0xe0   : >> { %6058 = vmatprep.mubr.f32.mxu0 %v8715_v61  ;;  %6824 = vmatprep.subr.bf16.mxu1 %v6823_v9  ;;  %v6831_v29 = vpack.c.bf16 %v993_v2, %v992_v11  ;;  %vm10539_vm6 = vmmov %vm10538_vm7  ;;  %v1272_v11 = vld [vmem:[#allocation7 + $0x188] sm:$0xff]  ;;  %v10540_v2 = vrot.slane %v8396_v54, 7 }
  0xe1   : >> { %5835 = vmatmul.mubr.f32.gmra.mrb[10].mxu1 %v8676_v35  ;;  %6952 = vmatprep.subr.bf16.mxu0 %v6951_v23 }
  0xe2   : >> { %6059 = vmatmul.mubr.f32.gmra.mrb[10].mxu0 %v1265_v13  ;;  %6826 = vmatpush3.bf16.msra.mxu1 %v6823_v9  ;;  %v8761_v9 = vsel %vm10537_vm14, %v10536_v48, %v8726_v3  ;;  %v8771_v13 = vsel %vm10539_vm6, %v1220_v33, %v8570_v40  ;;  %v1854_v48 = vsel %vm10537_vm14, %v10540_v2, %v8403_v4  ;;  %v10541_v33 = vld [vmem:[#allocation26_spill] sm:$0xff] }
  0xe3   : >> { %6954 = vmatpush3.bf16.msra.mxu0 %v6951_v23  ;;  %5837 = vmatprep.mubr.f32.mxu1 %v634_v31  ;;  %v1237_v23 = vsel %vm10538_vm7, %v8570_v40, %v8380_v34  ;;  %v6959_v31 = vpack.c.bf16 %v1935_v19, %v1934_v10  ;;  %v10542_v10 = vrot.slane %v10541_v33, 1  ;;  %v6835_v19 = vpack.c.bf16 %v1272_v11, %v1271_v17  ;;  %v2100_v33 = vld [vmem:[#allocation7 + $0x390] sm:$0xff] }
  0xe4   : >> { %6061 = vmatprep.mubr.f32.mxu0 %v8745_v5  ;;  %6828 = vmatprep.subr.bf16.mxu1 %v6827_v41  ;;  %v1269_v40 = vsel %vm8275_vm15, %v8761_v9, %v1237_v23  ;;  %v1274_v23 = vld [vmem:[#allocation7 + $0x198] sm:$0xff]  ;;  %v10545_v17 = vld [vmem:[#allocation40_spill] sm:$0xff]  ;;  %vm10550_vm7 = vnez %v10450_v51  ;;  %vm10551_vm14 = vnez %v10474_v63  ;;  %v2277_v63 = vld [vmem:[#allocation7 + $0x408] sm:$0xff] }
  0xe5   : >> { %5838 = vmatmul.mubr.f32.gmra.mrb[12].mxu1 %v8706_v12  ;;  %6956 = vmatprep.subr.bf16.mxu0 %v6955_v36 }
  0xe6   : >> { %6062 = vmatmul.mubr.f32.gmra.mrb[12].mxu0 %v1267_v44  ;;  %6830 = vmatpush3.bf16.msra.mxu1 %v6827_v41  ;;  %v619_v41 = vsel %vm10539_vm6, %v10542_v10, %v8380_v34  ;;  %v6963_v44 = vpack.c.bf16 %v2099_v18, %v2098_v7  ;;  %v2101_v10 = vld [vmem:[#allocation7 + $0x398] sm:$0xff]  ;;  %v1889_v7 = vsel %vm8213_vm1, %v8629_v14, %v8489_v43  ;;  %vm10554_vm6 = vcmp.lt.s32.totalorder %v8157_v1, 1 }
  0xe7   : >> { %6958 = vmatpush3.bf16.msra.mxu0 %v6955_v36  ;;  %5840 = vmatprep.mubr.f32.mxu1 %v636_v60  ;;  %v1887_v36 = vsel %vm8207_vm0, %v8581_v53, %v1854_v48  ;;  %v1273_v60 = vld [vmem:[#allocation7 + $0x190] sm:$0xff]  ;;  %v639_v34 = vsel %vm8243_vm8, %v8442_v26, %v619_v41  ;;  %v1275_v48 = vld [vmem:[#allocation7 + $0x1a0] sm:$0xff]  ;;  %v10547_v26 = vld [vmem:[#allocation41_spill] sm:$0xff]  ;;  %v1242_v18 = vsel %vm8217_vm2, %v8629_v14, %v8489_v43 }
  0xe8   : >> { %6064 = vmatprep.mubr.f32.mxu0 %v8771_v13  ;;  %6832 = vmatprep.subr.bf16.mxu1 %v6831_v29  ;;  %v6839_v11 = vpack.c.bf16 %v1274_v23, %v1273_v60  ;;  %v2102_v41 = vld [vmem:[#allocation7 + $0x3a0] sm:$0xff] }
  0xe9   : >> { %5841 = vmatmul.mubr.f32.gmra.mrb[14].mxu1 %v8734_v25  ;;  %6960 = vmatprep.subr.bf16.mxu0 %v6959_v31 }
  0xea   : >> { %6065 = vmatmul.mubr.f32.gmra.mrb[14].mxu0 %v1269_v40  ;;  %6834 = vmatpush3.bf16.msra.mxu1 %v6831_v29  ;;  %v6967_v29 = vpack.c.bf16 %v2101_v10, %v2100_v33  ;;  %v1276_v40 = vld [vmem:[#allocation7 + $0x1a8] sm:$0xff]  ;;  %v1278_v33 = vld [vmem:[#allocation7 + $0x1b8] sm:$0xff]  ;;  %v2104_v10 = vld [vmem:[#allocation7 + $0x3b0] sm:$0xff] }
  0xeb   : >> { %6962 = vmatpush3.bf16.msra.mxu0 %v6959_v31  ;;  %5875 = vmatprep.mubr.f32.mxu1 %v10545_v17  ;;  %v641_v31 = vsel %vm8249_vm9, %v8447_v37, %v10547_v26  ;;  %v6843_v60 = vpack.c.bf16 %v1276_v40, %v1275_v48  ;;  %v2105_v17 = vld [vmem:[#allocation7 + $0x3b8] sm:$0xff]  ;;  %v1279_v40 = vld [vmem:[#allocation7 + $0x1c0] sm:$0xff]  ;;  %v1280_v26 = vld [vmem:[#allocation7 + $0x1c8] sm:$0xff] }
  0xec   : >> { %6099 = vmatprep.mubr.f32.mxu0 %v1887_v36  ;;  %6836 = vmatprep.subr.bf16.mxu1 %v6835_v19  ;;  %v2103_v36 = vld [vmem:[#allocation7 + $0x3a8] sm:$0xff]  ;;  %v6975_v48 = vpack.c.bf16 %v2105_v17, %v2104_v10  ;;  %v2109_v10 = vld [vmem:[#allocation7 + $0x3d8] sm:$0xff] }
  0xed   : >> { %5876 = vmatmul.mubr.f32.vlgmr.msra.gmra.mrb[0].mxu1 %v639_v34  ;;  %6964 = vmatprep.subr.bf16.mxu0 %v6963_v44  ;;  %v6971_v23 = vpack.c.bf16 %v2103_v36, %v2102_v41  ;;  %v1277_v34 = vld [vmem:[#allocation7 + $0x1b0] sm:$0xff]  ;;  %v2107_v41 = vld [vmem:[#allocation7 + $0x3c8] sm:$0xff]  ;;  %v6851_v36 = vpack.c.bf16 %v1280_v26, %v1279_v40  ;;  %v1283_v40 = vld [vmem:[#allocation7 + $0x1e0] sm:$0xff] }
  0xee   : >> { %6100 = vmatmul.mubr.f32.vlgmr.msra.gmra.mrb[0].mxu0 %v8543_v21  ;;  %6838 = vmatpush3.bf16.msra.mxu1 %v6835_v19  ;;  %v1891_v19 = vsel %vm8217_vm2, %v8657_v15, %v8504_v38  ;;  %v1284_v26 = vld [vmem:[#allocation7 + $0x1e8] sm:$0xff] }
  0xef   : >> { %6966 = vmatpush3.bf16.msra.mxu0 %v6963_v44  ;;  %5878 = vmatprep.mubr.f32.mxu1 %v8433_v22  ;;  %v643_v44 = vsel %vm10521_vm10, %v8543_v21, %v8560_v20 }
  0xf0   : >> { %6102 = vmatprep.mubr.f32.mxu0 %v1889_v7  ;;  %6840 = vmatprep.subr.bf16.mxu1 %v6839_v11  ;;  %v6847_v7 = vpack.c.bf16 %v1278_v33, %v1277_v34  ;;  %v1281_v34 = vld [vmem:[#allocation7 + $0x1d0] sm:$0xff]  ;;  %v1282_v33 = vld [vmem:[#allocation7 + $0x1d8] sm:$0xff] }
  0xf1   : >> { %5879 = vmatmul.mubr.f32.gmra.mrb[2].mxu1 %v641_v31  ;;  %6968 = vmatprep.subr.bf16.mxu0 %v6967_v29  ;;  %v2106_v31 = vld [vmem:[#allocation7 + $0x3c0] sm:$0xff]  ;;  %v6855_v17 = vpack.c.bf16 %v1282_v33, %v1281_v34  ;;  %v10549_v34 = vld [vmem:[#allocation45_spill] sm:$0xff] }
  0xf2   : >> { %6103 = vmatmul.mubr.f32.gmra.mrb[2].mxu0 %v8612_v49  ;;  %6842 = vmatpush3.bf16.msra.mxu1 %v6839_v11  ;;  %v1893_v11 = vsel %vm8221_vm3, %v8685_v28, %v8517_v16 }
  0xf3   : >> { %6970 = vmatpush3.bf16.msra.mxu0 %v6967_v29  ;;  %5881 = vmatprep.mubr.f32.mxu1 %v8581_v53  ;;  %v645_v29 = vsel %vm10525_vm11, %v8612_v49, %v8622_v55  ;;  %vm10557_vm11 = vcmp.lt.s32.totalorder %v8157_v1, 7 }
  0xf4   : >> { %6105 = vmatprep.mubr.f32.mxu0 %v1891_v19  ;;  %6844 = vmatprep.subr.bf16.mxu1 %v6843_v60  ;;  %v6979_v19 = vpack.c.bf16 %v2107_v41, %v2106_v31  ;;  %v2110_v31 = vld [vmem:[#allocation7 + $0x3e0] sm:$0xff]  ;;  %v2111_v41 = vld [vmem:[#allocation7 + $0x3e8] sm:$0xff]  ;;  %vm10560_vm10 = vmmov %vm10557_vm11 }
  0xf5   : >> { %5882 = vmatmul.mubr.f32.gmra.mrb[4].mxu1 %v643_v44  ;;  %6972 = vmatprep.subr.bf16.mxu0 %v6971_v23  ;;  %v2108_v44 = vld [vmem:[#allocation7 + $0x3d0] sm:$0xff]  ;;  %v6987_v33 = vpack.c.bf16 %v2111_v41, %v2110_v31  ;;  %v2113_v41 = vld [vmem:[#allocation7 + $0x3f8] sm:$0xff] }
  0xf6   : >> { %6106 = vmatmul.mubr.f32.gmra.mrb[4].mxu0 %v8646_v39  ;;  %6846 = vmatpush3.bf16.msra.mxu1 %v6843_v60  ;;  %v1895_v60 = vsel %vm8225_vm4, %v8715_v61, %v8531_v6 }
  0xf7   : >> { %6974 = vmatpush3.bf16.msra.mxu0 %v6971_v23  ;;  %5884 = vmatprep.mubr.f32.mxu1 %v8629_v14  ;;  %v647_v23 = vsel %vm8261_vm12, %v8646_v39, %v8652_v42  ;;  %v10562_v42 = vld [vmem:[#allocation36_spill] sm:$0xff] }
  0xf8   : >> { %6108 = vmatprep.mubr.f32.mxu0 %v1893_v11  ;;  %6848 = vmatprep.subr.bf16.mxu1 %v6847_v7  ;;  %v6983_v11 = vpack.c.bf16 %v2109_v10, %v2108_v44  ;;  %v1286_v44 = vld [vmem:[#allocation7 + $0x1f8] sm:$0xff]  ;;  %v10552_v10 = vld [vmem:[#allocation38_spill] sm:$0xff] }
  0xf9   : >> { %5885 = vmatmul.mubr.f32.gmra.mrb[6].mxu1 %v645_v29  ;;  %6976 = vmatprep.subr.bf16.mxu0 %v6975_v48  ;;  %v10548_v29 = vld [vmem:[#allocation49_spill] sm:$0xff] }
  0xfa   : >> { %6109 = vmatmul.mubr.f32.gmra.mrb[6].mxu0 %v8676_v35  ;;  %6850 = vmatpush3.bf16.msra.mxu1 %v6847_v7  ;;  %v1897_v7 = vsel %vm8231_vm5, %v8745_v5, %v8551_v27 }
  0xfb   : >> { %6978 = vmatpush3.bf16.msra.mxu0 %v6975_v48  ;;  %5887 = vmatprep.mubr.f32.mxu1 %v8657_v15  ;;  %v649_v48 = vsel %vm8267_vm13, %v8676_v35, %v10548_v29  ;;  %v10559_v29 = vrot.slane %v10558_v58, 1  ;;  %v2276_v58 = vld [vmem:[#allocation7 + $0x400] sm:$0xff] }
  0xfc   : >> { %6111 = vmatprep.mubr.f32.mxu0 %v1895_v60  ;;  %6852 = vmatprep.subr.bf16.mxu1 %v6851_v36  ;;  %v6859_v60 = vpack.c.bf16 %v1284_v26, %v1283_v40  ;;  %v10555_v26 = vrot.slane %v8396_v54, 1 }
  0xfd   : >> { %5888 = vmatmul.mubr.f32.gmra.mrb[8].mxu1 %v647_v23  ;;  %6980 = vmatprep.subr.bf16.mxu0 %v6979_v19  ;;  %v1285_v23 = vld [vmem:[#allocation7 + $0x1f0] sm:$0xff]  ;;  %v621_v57 = vsel %vm10560_vm10, %v8688_v24, %v10559_v29 }
  0xfe   : >> { %6112 = vmatmul.mubr.f32.gmra.mrb[8].mxu0 %v8706_v12  ;;  %6854 = vmatpush3.bf16.msra.mxu1 %v6851_v36  ;;  %v1899_v36 = vsel %vm10550_vm7, %v8771_v13, %v10549_v34  ;;  %v653_v24 = vsel %vm8275_vm15, %v8734_v25, %v621_v57  ;;  %v10564_v57 = vld [vmem:[#allocation27_spill] sm:$0xff] }
  0xff   : >> { %6982 = vmatpush3.bf16.msra.mxu0 %v6979_v19  ;;  %5890 = vmatprep.mubr.f32.mxu1 %v8685_v28  ;;  %v651_v19 = vsel %vm10551_vm14, %v8706_v12, %v8710_v30 }
 0x100   : >> { %6114 = vmatprep.mubr.f32.mxu0 %v1897_v7  ;;  %6856 = vmatprep.subr.bf16.mxu1 %v6855_v17  ;;  %v10553_v7 = vrot.slane %v10552_v10, 7 }
 0x101   : >> { %5891 = vmatmul.mubr.f32.gmra.mrb[10].mxu1 %v649_v48  ;;  %6984 = vmatprep.subr.bf16.mxu0 %v6983_v11  ;;  %v10556_v48 = vrot.slane %v10552_v10, 1 }
 0x102   : >> { %6115 = vmatmul.mubr.f32.gmra.mrb[10].mxu0 %v8734_v25  ;;  %6858 = vmatpush3.bf16.msra.mxu1 %v6855_v17  ;;  %v1840_v40 = vsel %vm10554_vm6, %v8726_v3, %v10553_v7  ;;  %v2112_v17 = vld [vmem:[#allocation7 + $0x3f0] sm:$0xff]  ;;  %v6863_v7 = vpack.c.bf16 %v1286_v44, %v1285_v23  ;;  %v10563_v23 = vld [vmem:[#allocation42_spill] sm:$0xff] }
 0x103   : >> { %v8865_v31 = vsel %vm10557_vm11, %v10556_v48, %v10555_v26  ;;  %6986 = vmatpush3.bf16.msra.mxu0 %v6983_v11  ;;  %5893 = vmatprep.mubr.f32.mxu1 %v8715_v61  ;;  %vm10561_vm11 = vnez %v10452_v52  ;;  %v6991_v48 = vpack.c.bf16 %v2113_v41, %v2112_v17  ;;  %v1205_v11 = vsel %vm10554_vm6, %v8726_v3, %v10562_v42  ;;  %v2278_v42 = vld [vmem:[#allocation7 + $0x410] sm:$0xff]  ;;  %v2279_v3 = vld [vmem:[#allocation7 + $0x418] sm:$0xff]  ;;  %v10568_v41 = vld [vmem:[#allocation30_spill] sm:$0xff] }
 0x104   : >> { %6117 = vmatprep.mubr.f32.mxu0 %v1899_v36  ;;  %6860 = vmatprep.subr.bf16.mxu1 %v6859_v60  ;;  %v1901_v26 = vsel %vm10561_vm11, %v8865_v31, %v1840_v40  ;;  %v1238_v29 = vsel %vm8207_vm0, %v8433_v22, %v1205_v11  ;;  %v6995_v36 = vpack.c.bf16 %v2277_v63, %v2276_v58  ;;  %v2280_v63 = vld [vmem:[#allocation7 + $0x420] sm:$0xff]  ;;  %v2281_v22 = vld [vmem:[#allocation7 + $0x428] sm:$0xff]  ;;  %v10566_v44 = vld [vmem:[#allocation28_spill] sm:$0xff] }
 0x105   : >> { %5894 = vmatmul.mubr.f32.gmra.mrb[12].mxu1 %v651_v19  ;;  %6988 = vmatprep.subr.bf16.mxu0 %v6987_v33  ;;  %v6999_v4 = vpack.c.bf16 %v2279_v3, %v2278_v42  ;;  %v10567_v19 = vld [vmem:[#allocation29_spill] sm:$0xff]  ;;  %v7003_v40 = vpack.c.bf16 %v2281_v22, %v2280_v63  ;;  %v2285_v11 = vld [vmem:[#allocation7 + $0x448] sm:$0xff]  ;;  %v10570_v58 = vld [vmem:[#allocation32_spill] sm:$0xff]  ;;  %v1250_v22 = vsel %vm10550_vm7, %v8745_v5, %v8551_v27 }
 0x106   : >> { %6118 = vmatmul.mubr.f32.gmra.mrb[12].mxu0 %v8761_v9  ;;  %6862 = vmatpush3.bf16.msra.mxu1 %v6859_v60  ;;  %v10565_v60 = vld [vmem:[#allocation43_spill] sm:$0xff]  ;;  %v2283_v17 = vld [vmem:[#allocation7 + $0x438] sm:$0xff]  ;;  %v10572_v3 = vld [vmem:[#allocation34_spill] sm:$0xff] }
 0x107   : >> { %6990 = vmatpush3.bf16.msra.mxu0 %v6987_v33  ;;  %5896 = vmatprep.mubr.f32.mxu1 %v8745_v5  ;;  %v1240_v33 = vsel %vm8213_vm1, %v8581_v53, %v10565_v60  ;;  %v2287_v42 = vld [vmem:[#allocation7 + $0x458] sm:$0xff]  ;;  %v1248_v60 = vsel %vm8231_vm5, %v8715_v61, %v8531_v6 }
 0x108   : >> { %6120 = vmatprep.mubr.f32.mxu0 %v1901_v26  ;;  %6864 = vmatprep.subr.bf16.mxu1 %v6863_v7  ;;  %v1244_v26 = vsel %vm8221_vm3, %v8657_v15, %v8504_v38  ;;  %v10574_v63 = vld [vmem:[#allocation37_spill] sm:$0xff] }
 0x109   : >> { %5897 = vmatmul.mubr.f32.gmra.mrb[14].mxu1 %v653_v24  ;;  %6992 = vmatprep.subr.bf16.mxu0 %v6991_v48  ;;  %v10571_v24 = vld [vmem:[#allocation33_spill] sm:$0xff] }
 0x10a   : >> { %6121 = vmatmul.mubr.f32.gmra.mrb[14].mxu0 %v10563_v23  ;;  %6866 = vmatpush3.bf16.msra.mxu1 %v6863_v7  ;;  %v10569_v7 = vld [vmem:[#allocation31_spill] sm:$0xff] }
 0x10b   : >> { %6994 = vmatpush3.bf16.msra.mxu0 %v6991_v48  ;;  %5931 = vmatprep.mubr.f32.mxu1 %v1238_v29  ;;  %v2284_v48 = vld [vmem:[#allocation7 + $0x440] sm:$0xff]  ;;  %v1246_v29 = vsel %vm8225_vm4, %v8685_v28, %v8517_v16 }
 0x10c   : >> { %6155 = vmatprep.mubr.f32.mxu0 %v10564_v57  ;;  %6996 = vmatprep.subr.bf16.mxu0 %v6995_v36  ;;  %v7011_v38 = vpack.c.bf16 %v2285_v11, %v2284_v48  ;;  %v10573_v57 = vld [vmem:[#allocation35_spill] sm:$0xff] }
 0x10d   : >> { %5932 = vmatmul.mubr.f32.vlgmr.msra.gmra.mrb[0].mxu1 %v8447_v37  ;;  %7315 = vmatprep.subr.bf16.mxu1 %v6995_v36  ;;  %v2282_v37 = vld [vmem:[#allocation7 + $0x430] sm:$0xff] }
 0x10e   : >> { %6156 = vmatmul.mubr.f32.vlgmr.msra.gmra.mrb[0].mxu0 %v10566_v44  ;;  %7323 = vmatpush3.bf16.msra.mxu1 %v6995_v36  ;;  %v7007_v43 = vpack.c.bf16 %v2283_v17, %v2282_v37  ;;  %v2290_v44 = vld [vmem:[#allocation7 + $0x470] sm:$0xff] }
 0x10f   : >> { %6998 = vmatpush3.bf16.msra.mxu0 %v6995_v36  ;;  %5934 = vmatprep.mubr.f32.mxu1 %v1240_v33  ;;  %v2286_v36 = vld [vmem:[#allocation7 + $0x450] sm:$0xff]  ;;  %v2288_v33 = vld [vmem:[#allocation7 + $0x460] sm:$0xff] }
 0x110   : >> { %6158 = vmatprep.mubr.f32.mxu0 %v10567_v19  ;;  %7000 = vmatprep.subr.bf16.mxu0 %v6999_v4  ;;  %v7015_v16 = vpack.c.bf16 %v2287_v42, %v2286_v36  ;;  %v2291_v19 = vld [vmem:[#allocation7 + $0x478] sm:$0xff] }
 0x111   : >> { %5935 = vmatmul.mubr.f32.gmra.mrb[2].mxu1 %v8543_v21  ;;  %7316 = vmatprep.subr.bf16.mxu1 %v6999_v4  ;;  %v7023_v27 = vpack.c.bf16 %v2291_v19, %v2290_v44 }
 0x112   : >> { %6159 = vmatmul.mubr.f32.gmra.mrb[2].mxu0 %v10568_v41  ;;  %7324 = vmatpush3.bf16.msra.mxu1 %v6999_v4 }
 0x113   : >> { %7002 = vmatpush3.bf16.msra.mxu0 %v6999_v4  ;;  %5937 = vmatprep.mubr.f32.mxu1 %v1242_v18  ;;  %v2289_v4 = vld [vmem:[#allocation7 + $0x468] sm:$0xff] }
 0x114   : >> { %6161 = vmatprep.mubr.f32.mxu0 %v10569_v7  ;;  %7004 = vmatprep.subr.bf16.mxu0 %v7003_v40  ;;  %v7019_v6 = vpack.c.bf16 %v2289_v4, %v2288_v33  ;;  %v10575_v18 = vld [vmem:[#allocation39_spill] sm:$0xff] }
 0x115   : >> { %5938 = vmatmul.mubr.f32.gmra.mrb[4].mxu1 %v8612_v49  ;;  %7317 = vmatprep.subr.bf16.mxu1 %v7003_v40 }
 0x116   : >> { %6162 = vmatmul.mubr.f32.gmra.mrb[4].mxu0 %v10570_v58  ;;  %7325 = vmatpush3.bf16.msra.mxu1 %v7003_v40 }
 0x117   : >> { %7006 = vmatpush3.bf16.msra.mxu0 %v7003_v40  ;;  %5940 = vmatprep.mubr.f32.mxu1 %v1244_v26  ;;  %v10576_v40 = vld [vmem:[#allocation44_spill] sm:$0xff] }
 0x118   : >> { %6164 = vmatprep.mubr.f32.mxu0 %v10571_v24  ;;  %7008 = vmatprep.subr.bf16.mxu0 %v7007_v43 }
 0x119   : >> { %5941 = vmatmul.mubr.f32.gmra.mrb[6].mxu1 %v8646_v39  ;;  %7318 = vmatprep.subr.bf16.mxu1 %v7007_v43 }
 0x11a   : >> { %6165 = vmatmul.mubr.f32.gmra.mrb[6].mxu0 %v10572_v3  ;;  %7326 = vmatpush3.bf16.msra.mxu1 %v7007_v43 }
 0x11b   : >> { %7010 = vmatpush3.bf16.msra.mxu0 %v7007_v43  ;;  %5943 = vmatprep.mubr.f32.mxu1 %v1246_v29 }
 0x11c   : >> { %6167 = vmatprep.mubr.f32.mxu0 %v10573_v57  ;;  %7012 = vmatprep.subr.bf16.mxu0 %v7011_v38 }
 0x11d   : >> { %5944 = vmatmul.mubr.f32.gmra.mrb[8].mxu1 %v8676_v35  ;;  %7319 = vmatprep.subr.bf16.mxu1 %v7011_v38 }
 0x11e   : >> { %6168 = vmatmul.mubr.f32.gmra.mrb[8].mxu0 %v10574_v63  ;;  %7327 = vmatpush3.bf16.msra.mxu1 %v7011_v38 }
 0x11f   : >> { %7014 = vmatpush3.bf16.msra.mxu0 %v7011_v38  ;;  %5946 = vmatprep.mubr.f32.mxu1 %v1248_v60 }
 0x120   : >> { %6170 = vmatprep.mubr.f32.mxu0 %v8415_v8  ;;  %7016 = vmatprep.subr.bf16.mxu0 %v7015_v16  ;;  %v1252_v8 = vsel %vm10561_vm11, %v8771_v13, %v10549_v34  ;;  %v1904_v34 = vsel %vm8243_vm8, %v8543_v21, %v8560_v20  ;;  %v10578_v21 = vld [vmem:[#allocation46_spill] sm:$0xff] }
 0x121   : >> { %5947 = vmatmul.mubr.f32.gmra.mrb[10].mxu1 %v8706_v12  ;;  %7320 = vmatprep.subr.bf16.mxu1 %v7015_v16 }
 0x122   : >> { %6171 = vmatmul.mubr.f32.gmra.mrb[10].mxu0 %v10575_v18  ;;  %7328 = vmatpush3.bf16.msra.mxu1 %v7015_v16 }
 0x123   : >> { %7018 = vmatpush3.bf16.msra.mxu0 %v7015_v16  ;;  %5949 = vmatprep.mubr.f32.mxu1 %v1250_v22 }
 0x124   : >> { %6173 = vmatprep.mubr.f32.mxu0 %v8467_v32  ;;  %7020 = vmatprep.subr.bf16.mxu0 %v7019_v6  ;;  %v1912_v32 = vsel %vm8261_vm12, %v8706_v12, %v8710_v30  ;;  %v1916_v12 = vsel %vm10551_vm14, %v8761_v9, %v10578_v21  ;;  %v10580_v30 = vld [vmem:[#allocation48_spill] sm:$0xff] }
 0x125   : >> { %5950 = vmatmul.mubr.f32.gmra.mrb[12].mxu1 %v8734_v25  ;;  %7321 = vmatprep.subr.bf16.mxu1 %v7019_v6 }
 0x126   : >> { %6174 = vmatmul.mubr.f32.gmra.mrb[12].mxu0 %v10576_v40  ;;  %7329 = vmatpush3.bf16.msra.mxu1 %v7019_v6 }
 0x127   : >> { %7022 = vmatpush3.bf16.msra.mxu0 %v7019_v6  ;;  %5952 = vmatprep.mubr.f32.mxu1 %v1252_v8 }
 0x128   : >> { %6176 = vmatprep.mubr.f32.mxu0 %v10552_v10  ;;  %7024 = vmatprep.subr.bf16.mxu0 %v7023_v27  ;;  %v10577_v10 = vld [vmem:[#allocation50_spill] sm:$0xff] }
 0x129   : >> { %5953 = vmatmul.mubr.f32.gmra.mrb[14].mxu1 %v8761_v9  ;;  %7322 = vmatprep.subr.bf16.mxu1 %v7023_v27 }
 0x12a   : >> { %6177 = vmatmul.mubr.f32.gmra.mrb[14].mxu0 %v8396_v54  ;;  %7330 = vmatpush3.bf16.msra.mxu1 %v7023_v27  ;;  %v1914_v54 = vsel %vm8267_vm13, %v8734_v25, %v10577_v10 }
 0x12b   : >> { %7026 = vmatpush3.bf16.msra.mxu0 %v7023_v27  ;;  %6211 = vmatprep.mubr.f32.mxu0 %v8581_v53  ;;  %v1906_v53 = vsel %vm8249_vm9, %v8612_v49, %v8622_v55  ;;  %v10583_v49 = vld [vmem:[#allocation49_spill] sm:$0xff] }
 0x12c   : >> { %6223 = vmatprep.mubr.f32.mxu1 %v8715_v61  ;;  %v10581_v61 = vld [vmem:[#allocation20_spill] sm:$0xff]  ;;  %v10584_v55 = vld [vmem:[#allocation21_spill] sm:$0xff] }
 0x12d   : >> { %6224 = vmatmul.mubr.f32.vlgmr.msra.gmra.mrb[16].mxu1 %v1912_v32  ;;  %vm10582_vm10 = vnez %v10581_v61  ;;  %vm10585_vm7 = vnez %v10584_v55 }
 0x12e   : >> { %6212 = vmatmul.mubr.f32.vlgmr.msra.gmra.mrb[0].mxu0 %v1904_v34  ;;  %6226 = vmatprep.mubr.f32.mxu1 %v8745_v5  ;;  %v1910_v25 = vsel %vm10585_vm7, %v8676_v35, %v10583_v49 }
 0x12f   : >> { %6214 = vmatprep.mubr.f32.mxu0 %v8629_v14  ;;  %v1908_v14 = vsel %vm10582_vm10, %v8646_v39, %v10580_v30 }
 0x131   : >> { %6227 = vmatmul.mubr.f32.gmra.mrb[18].mxu1 %v1914_v54 }
 0x132   : >> { %6215 = vmatmul.mubr.f32.gmra.mrb[2].mxu0 %v1906_v53  ;;  %6229 = vmatprep.mubr.f32.mxu1 %v8771_v13 }
 0x133   : >> { %6217 = vmatprep.mubr.f32.mxu0 %v8657_v15  ;;  %v10586_v15 = vld [vmem:[#allocation47_spill] sm:$0xff] }
 0x134   : >> { %v10587_v5 = vsel %vm8275_vm15, %v10563_v23, %v10586_v15 }
 0x135   : >> { %6230 = vmatmul.mubr.f32.gmra.mrb[20].mxu1 %v1916_v12 }
 0x136   : >> { %6218 = vmatmul.mubr.f32.gmra.mrb[4].mxu0 %v1908_v14  ;;  %6232 = vmatprep.mubr.f32.mxu1 %v8865_v31 }
 0x137   : >> { %6220 = vmatprep.mubr.f32.mxu0 %v8685_v28 }
 0x139   : >> { %6233 = vmatmul.mubr.f32.gmra.mrb[22].mxu1 %v10587_v5 }
 0x13a   : >> { %6221 = vmatmul.mubr.f32.gmra.mrb[6].mxu0 %v1910_v25 }
 0x1e0   : >> { %v5933_v9 = vpop.f32.mrb[0].mxu1 }
 0x1e1   : >> { %v1353_v39 = vpop.f32.mrb[1].mxu1 }
 0x1e4   : >> { %v5936_v13 = vpop.f32.mrb[2].mxu1 }
 0x1e5   : >> { %v1363_v2 = vpop.f32.mrb[3].mxu1 }
 0x1e8   : >> { %v8982_v37 = vpop.f32.mrb[4].mxu1 }
 0x1e9   : >> { %v8984_v31 = vpop.f32.mrb[5].mxu1 }
 0x1ec   : >> { %v8986_v28 = vpop.f32.mrb[6].mxu1 }
 0x1ed   : >> { %v8988_v17 = vpop.f32.mrb[7].mxu1 }
 0x1f0   : >> { %v5945_v35 = vpop.f32.mrb[8].mxu1 }
 0x1f1   : >> { %v6169_v41 = vpop.f32.mrb[8].mxu0  ;;  %v1393_v7 = vpop.f32.mrb[9].mxu1 }
 0x1f2   : >> { %v7339_v26 = vadd.f32 %v6169_v41, %v5945_v35  ;;  %v2220_v43 = vpop.f32.mrb[9].mxu0 }
 0x1f3   : >> { %v7341_v23 = vadd.f32 %v2220_v43, %v1393_v7 }
 0x1f4   : >> { %v5948_v48 = vpop.f32.mrb[10].mxu1 }
 0x1f5   : >> { %v6172_v11 = vpop.f32.mrb[10].mxu0  ;;  %v1403_v58 = vpop.f32.mrb[11].mxu1 }
 0x1f6   : >> { %v7343_v24 = vadd.f32 %v6172_v11, %v5948_v48  ;;  %v2230_v29 = vpop.f32.mrb[11].mxu0 }
 0x1f7   : >> { %v7345_v38 = vadd.f32 %v2230_v29, %v1403_v58 }
 0x1f8   : >> { %v5951_v36 = vpop.f32.mrb[12].mxu1 }
 0x1f9   : >> { %v6175_v42 = vpop.f32.mrb[12].mxu0  ;;  %v1413_v3 = vpop.f32.mrb[13].mxu1 }
 0x1fa   : >> { %v7347_v57 = vadd.f32 %v6175_v42, %v5951_v36  ;;  %v2240_v60 = vpop.f32.mrb[13].mxu0 }
 0x1fb   : >> { %v7349_v16 = vadd.f32 %v2240_v60, %v1413_v3 }
 0x1fc   : >> { %v5954_v33 = vpop.f32.mrb[14].mxu1 }
 0x1fd   : >> { %v6178_v4 = vpop.f32.mrb[14].mxu0  ;;  %v1423_v63 = vpop.f32.mrb[15].mxu1 }
 0x1fe   : >> { %v7351_v22 = vadd.f32 %v6178_v4, %v5954_v33  ;;  %v2250_v6 = vpop.f32.mrb[15].mxu0 }
 0x1ff   : >> { %v7353_v44 = vadd.f32 %v2250_v6, %v1423_v63 }
 0x200   : >> { %v6225_v19 = vpop.f32.mrb[16].mxu1 }
 0x201   : >> { %v6213_v18 = vpop.f32.mrb[0].mxu0  ;;  %v8990_v8 = vadd.f32 %v7339_v26, %v6225_v19  ;;  %v2398_v27 = vpop.f32.mrb[17].mxu1 }
 0x202   : >> { %v7331_v40 = vadd.f32 %v6213_v18, %v5933_v9  ;;  %v2358_v32 = vpop.f32.mrb[1].mxu0  ;;  %v8992_v34 = vadd.f32 %v7341_v23, %v2398_v27 }
 0x203   : >> { %2463 = vst [vmem:[%s8996_s24 + $0x48] sm:$0xff] %v8990_v8  ;;  %v7332_v10 = vadd.f32 %v2358_v32, %v1353_v39  ;;  %v2501_v32 = vmul.f32 %v8990_v8, %v8990_v8 }
 0x204   : >> { %2455 = vst [vmem:[%s8996_s24 + $0x8] sm:$0xff] %v7331_v40  ;;  %v2493_v54 = vmul.f32 %v7331_v40, %v7331_v40  ;;  %2462 = vst [vmem:[%s8996_s24 + $0x40] sm:$0xff] %v8992_v34  ;;  %v6228_v53 = vpop.f32.mrb[18].mxu1 }
 0x205   : >> { %2454 = vst [vmem:[%s8996_s24] sm:$0xff] %v7332_v10  ;;  %v2470_v21 = vadd.f32 %v7332_v10, %v7331_v40  ;;  %v2492_v20 = vmul.f32 %v7332_v10, %v7332_v10  ;;  %v6216_v12 = vpop.f32.mrb[2].mxu0  ;;  %v7344_v30 = vadd.f32 %v7343_v24, %v6228_v53  ;;  %v2408_v61 = vpop.f32.mrb[19].mxu1 }
 0x206   : >> { %v7333_v14 = vadd.f32 %v6216_v12, %v5936_v13  ;;  %v2368_v49 = vpop.f32.mrb[3].mxu0  ;;  %v7346_v55 = vadd.f32 %v7345_v38, %v2408_v61 }
 0x207   : >> { %v2508_v25 = vadd.f32 %v2493_v54, %v2492_v20  ;;  %2465 = vst [vmem:[%s8996_s24 + $0x58] sm:$0xff] %v7344_v30  ;;  %v7334_v15 = vadd.f32 %v2368_v49, %v1363_v2  ;;  %v2503_v20 = vmul.f32 %v7344_v30, %v7344_v30 }
 0x208   : >> { %2457 = vst [vmem:[%s8996_s24 + $0x18] sm:$0xff] %v7333_v14  ;;  %2464 = vst [vmem:[%s8996_s24 + $0x50] sm:$0xff] %v7346_v55  ;;  %v6231_v5 = vpop.f32.mrb[20].mxu1  ;;  %v2495_v23 = vmul.f32 %v7333_v14, %v7333_v14  ;;  %v2502_v54 = vmul.f32 %v7346_v55, %v7346_v55 }
 0x209   : >> { %2456 = vst [vmem:[%s8996_s24 + $0x10] sm:$0xff] %v7334_v15  ;;  %v2471_v9 = vadd.f32 %v7334_v15, %v2470_v21  ;;  %v2494_v39 = vmul.f32 %v7334_v15, %v7334_v15  ;;  %v6219_v35 = vpop.f32.mrb[4].mxu0  ;;  %v7348_v41 = vadd.f32 %v7347_v57, %v6231_v5  ;;  %v2418_v7 = vpop.f32.mrb[21].mxu1 }
 0x20a   : >> { %v7335_v13 = vadd.f32 %v6219_v35, %v8982_v37  ;;  %v2378_v26 = vpop.f32.mrb[5].mxu0  ;;  %v7350_v43 = vadd.f32 %v7349_v16, %v2418_v7 }
 0x20b   : >> { %v2509_v48 = vadd.f32 %v2508_v25, %v2494_v39  ;;  %2467 = vst [vmem:[%s8996_s24 + $0x68] sm:$0xff] %v7348_v41  ;;  %v7336_v2 = vadd.f32 %v2378_v26, %v8984_v31  ;;  %v2472_v11 = vadd.f32 %v7333_v14, %v2471_v9  ;;  %v2505_v15 = vmul.f32 %v7348_v41, %v7348_v41 }
 0x20c   : >> { %2459 = vst [vmem:[%s8996_s24 + $0x28] sm:$0xff] %v7335_v13  ;;  %2466 = vst [vmem:[%s8996_s24 + $0x60] sm:$0xff] %v7350_v43  ;;  %v6234_v58 = vpop.f32.mrb[22].mxu1  ;;  %v2497_v31 = vmul.f32 %v7335_v13, %v7335_v13  ;;  %v2504_v14 = vmul.f32 %v7350_v43, %v7350_v43 }
 0x20d   : >> { %2458 = vst [vmem:[%s8996_s24 + $0x20] sm:$0xff] %v7336_v2  ;;  %v2473_v24 = vadd.f32 %v7336_v2, %v2472_v11  ;;  %v2496_v29 = vmul.f32 %v7336_v2, %v7336_v2  ;;  %v2510_v38 = vadd.f32 %v2509_v48, %v2495_v23  ;;  %v6222_v37 = vpop.f32.mrb[6].mxu0  ;;  %v7352_v36 = vadd.f32 %v7351_v22, %v6234_v58  ;;  %v2428_v42 = vpop.f32.mrb[23].mxu1 }
 0x20e   : >> { %v7337_v3 = vadd.f32 %v6222_v37, %v8986_v28  ;;  %v2388_v57 = vpop.f32.mrb[7].mxu0  ;;  %v7354_v60 = vadd.f32 %v7353_v44, %v2428_v42  ;;  %v2500_v28 = vmul.f32 %v8992_v34, %v8992_v34 }
 0x20f   : >> { %v2511_v16 = vadd.f32 %v2510_v38, %v2496_v29  ;;  %2469 = vst [vmem:[%s8996_s24 + $0x78] sm:$0xff] %v7352_v36  ;;  %v7338_v33 = vadd.f32 %v2388_v57, %v8988_v17  ;;  %v2474_v4 = vadd.f32 %v7335_v13, %v2473_v24  ;;  %v2507_v7 = vmul.f32 %v7352_v36, %v7352_v36 }
 0x210   : >> { %2461 = vst [vmem:[%s8996_s24 + $0x38] sm:$0xff] %v7337_v3  ;;  %2468 = vst [vmem:[%s8996_s24 + $0x70] sm:$0xff] %v7354_v60  ;;  %v2499_v18 = vmul.f32 %v7337_v3, %v7337_v3  ;;  %v2506_v39 = vmul.f32 %v7354_v60, %v7354_v60 }
 0x211   : >> { %2460 = vst [vmem:[%s8996_s24 + $0x30] sm:$0xff] %v7338_v33  ;;  %v2475_v63 = vadd.f32 %v7338_v33, %v2474_v4  ;;  %v2498_v6 = vmul.f32 %v7338_v33, %v7338_v33  ;;  %v2512_v19 = vadd.f32 %v2511_v16, %v2497_v31 }
 0x213   : >> { %v2476_v27 = vadd.f32 %v7337_v3, %v2475_v63  ;;  %v2513_v22 = vadd.f32 %v2512_v19, %v2498_v6  ;;  %v10589_v3 = vld [vmem:[#allocation23_spill] sm:$0xff] }
 0x215   : >> { %v2477_v44 = vadd.f32 %v8992_v34, %v2476_v27  ;;  %v2514_v40 = vadd.f32 %v2513_v22, %v2499_v18 }
 0x217   : >> { %v2478_v17 = vadd.f32 %v8990_v8, %v2477_v44  ;;  %v2515_v10 = vadd.f32 %v2514_v40, %v2500_v28 }
 0x218   : > { %v9039_v63 = vld [vmem:[#allocation3] sm:$0xff] (%p531_p11)  ;;  %v9041_v6 = vld [vmem:[#allocation3 + $0x8] sm:$0xff] (%p531_p11)  ;;  %v9045_v27 = vld [vmem:[#allocation3 + $0x18] sm:$0xff] (%p531_p11) }
 0x219   : >> { %v2516_v53 = vadd.f32 %v2515_v10, %v2501_v32  ;;  %v2479_v21 = vadd.f32 %v7346_v55, %v2478_v17  ;;  %v9047_v22 = vld [vmem:[#allocation3 + $0x20] sm:$0xff] (%p531_p11)  ;;  %v9049_v28 = vld [vmem:[#allocation3 + $0x28] sm:$0xff] (%p531_p11)  ;;  %v9053_v44 = vld [vmem:[#allocation3 + $0x38] sm:$0xff] (%p531_p11) }
 0x21a   : > { %v9055_v40 = vld [vmem:[#allocation3 + $0x40] sm:$0xff] (%p531_p11)  ;;  %v9057_v32 = vld [vmem:[#allocation3 + $0x48] sm:$0xff] (%p531_p11)  ;;  %v9059_v17 = vld [vmem:[#allocation3 + $0x50] sm:$0xff] (%p531_p11) }
 0x21b   : >> { %v2480_v12 = vadd.f32 %v7344_v30, %v2479_v21  ;;  %v2517_v61 = vadd.f32 %v2516_v53, %v2502_v54  ;;  %v9061_v10 = vld [vmem:[#allocation3 + $0x58] sm:$0xff] (%p531_p11)  ;;  %v9063_v54 = vld [vmem:[#allocation3 + $0x60] sm:$0xff] (%p531_p11)  ;;  %v9065_v53 = vld [vmem:[#allocation3 + $0x68] sm:$0xff] (%p531_p11) }
 0x21c   : > { %v9067_v21 = vld [vmem:[#allocation3 + $0x70] sm:$0xff] (%p531_p11) }
 0x21d   : >> { %v2481_v49 = vadd.f32 %v7350_v43, %v2480_v12  ;;  %v2518_v25 = vadd.f32 %v2517_v61, %v2503_v20  ;;  %v9069_v20 = vld [vmem:[#allocation3 + $0x78] sm:$0xff] (%p531_p11)  ;;  %v9071_v12 = vld [vmem:[#allocation3 + $0x80] sm:$0xff] (%p531_p11) }
 0x21f   : >> { %v2482_v5 = vadd.f32 %v7348_v41, %v2481_v49  ;;  %v2519_v9 = vadd.f32 %v2518_v25, %v2504_v14  ;;  %v10588_v41 = vld [vmem:[#allocation24_spill] sm:$0xff] }
 0x221   : >> { %v2483_v34 = vadd.f32 %v7354_v60, %v2482_v5  ;;  %v2520_v35 = vadd.f32 %v2519_v9, %v2505_v15  ;;  %v9081_v15 = vld [vmem:[#allocation3 + $0x88] sm:$0xff] (%p531_p11)  ;;  %v9083_v5 = vld [vmem:[#allocation3 + $0x90] sm:$0xff] (%p531_p11)  ;;  %v9085_v9 = vld [vmem:[#allocation3 + $0x98] sm:$0xff] (%p531_p11) }
 0x223   : >> { %v2484_v13 = vadd.f32 %v7352_v36, %v2483_v34  ;;  %v2521_v26 = vadd.f32 %v2520_v35, %v2506_v39 }
 0x225   : >> { %v2485_v8 = vrot.slane %v2484_v13, 4  ;;  %v2522_v23 = vadd.f32 %v2521_v26, %v2507_v7  ;;  %v9097_v26 = vld [vmem:[#allocation3 + $0xa8] sm:$0xff] (%p531_p11) }
 0x227   : >> { %v2486_v48 = vadd.f32 %v2485_v8, %v2484_v13  ;;  %v2523_v2 = vrot.slane %v2522_v23, 4  ;;  %v9095_v13 = vld [vmem:[#allocation3 + $0xa0] sm:$0xff] (%p531_p11)  ;;  %v9099_v8 = vld [vmem:[#allocation3 + $0xb0] sm:$0xff] (%p531_p11) }
 0x229   : >> { %v2487_v55 = vrot.slane %v2486_v48, 2  ;;  %v2524_v11 = vadd.f32 %v2523_v2, %v2522_v23 }
 0x22b   : >> { %v2488_v30 = vadd.f32 %v2487_v55, %v2486_v48  ;;  %v2525_v58 = vrot.slane %v2524_v11, 2 }
 0x22d   : >> { %v2489_v24 = vrot.slane %v2488_v30, 1  ;;  %v2526_v43 = vadd.f32 %v2525_v58, %v2524_v11  ;;  %v9109_v11 = vld [vmem:[#allocation3 + $0xb8] sm:$0xff] (%p531_p11)  ;;  %v9113_v58 = vld [vmem:[#allocation3 + $0xc8] sm:$0xff] (%p531_p11) }
 0x22f   : >> { %v2490_v29 = vadd.f32 %v2489_v24, %v2488_v30  ;;  %v2527_v38 = vrot.slane %v2526_v43, 1  ;;  %533 = sbr.rel (!%p531_p11) target bundleno = 137 (0x89), region = 125  ;;  %v9111_v30 = vld [vmem:[#allocation3 + $0xc0] sm:$0xff] (%p531_p11) }
 0x231   : >> { %v2491_v37 = vadd.f32 %v10588_v41, %v2490_v29   ;;  %v2528_v42 = vadd.f32 %v2527_v38, %v2526_v43  ;;  %v9123_v41 = vld [vmem:[#allocation3 + $0xd0] sm:$0xff] (%p531_p11) }
 0x233   : >> { %v2529_v57 = vadd.f32 %v10589_v3, %v2528_v42   ;;  %v10591_v19 = vmov %v2491_v37  ;;  %v9035_v36 = vmul.f32 (%p531_p11), 0.00390625, %v2491_v37  ;;  %v9125_v37 = vld [vmem:[#allocation3 + $0xd8] sm:$0xff] (%p531_p11)  ;;  %v9127_v42 = vld [vmem:[#allocation3 + $0xe0] sm:$0xff] (%p531_p11) }
 0x234   : > { %v9043_v19 = vld [vmem:[#allocation3 + $0x10] sm:$0xff] (%p531_p11) }
 0x235   : >> { %v10590_v18 = vmov %v2529_v57  ;;  %v2531_v60 = vmul.f32 (%p531_p11), 0.00390625, %v2529_v57  ;;  %v2532_v31 = vmul.f32 (%p531_p11), %v9035_v36, %v9035_v36  ;;  %v2569_v61 = vsub.f32 (%p531_p11), %v9039_v63, %v9035_v36 }
 0x236   : > { %v9051_v18 = vld [vmem:[#allocation3 + $0x30] sm:$0xff]  ;;  %v2570_v14 = vsub.f32 %v9041_v6, %v9035_v36  ;;  %v2571_v49 = vsub.f32 %v9043_v19, %v9035_v36  ;;  %v2572_v25 = vsub.f32 %v9045_v27, %v9035_v36  ;;  %v2573_v34 = vsub.f32 %v9047_v22, %v9035_v36 }
 0x237   : > { %v2533_v16 = vsub.f32 %v2531_v60, %v2532_v31  ;;  %v2574_v39 = vsub.f32 %v9049_v28, %v9035_v36  ;;  %v2575_v35 = vsub.f32 %v9051_v18, %v9035_v36  ;;  %v2576_v7 = vsub.f32 %v9053_v44, %v9035_v36 }
 0x238   : > { %v2577_v23 = vsub.f32 %v9055_v40, %v9035_v36  ;;  %v2578_v48 = vsub.f32 %v9057_v32, %v9035_v36  ;;  %v2579_v2 = vsub.f32 %v9059_v17, %v9035_v36  ;;  %v2580_v55 = vsub.f32 %v9061_v10, %v9035_v36 }
 0x239   : > { %v2534_v33 = vmax.f32 %v2533_v16, 0.0  ;;  %v2581_v24 = vsub.f32 %v9063_v54, %v9035_v36  ;;  %v2582_v43 = vsub.f32 %v9065_v53, %v9035_v36  ;;  %v2583_v29 = vsub.f32 %v9067_v21, %v9035_v36  ;;  %v9137_v16 = vld [vmem:[#allocation3 + $0xe8] sm:$0xff] }
 0x23a   : > { %v2584_v38 = vsub.f32 %v9069_v20, %v9035_v36  ;;  %v2585_v3 = vsub.f32 %v9071_v12, %v9035_v36  ;;  %v2586_v57 = vsub.f32 %v9081_v15, %v9035_v36  ;;  %v2587_v60 = vsub.f32 %v9083_v5, %v9035_v36 }
 0x23b   : > { %v2535_v4 = vadd.f32 1e-05, %v2534_v33  ;;  %v2588_v31 = vsub.f32 %v9085_v9, %v9035_v36  ;;  %v9139_v33 = vld [vmem:[#allocation3 + $0xf0] sm:$0xff]  ;;  %v2589_v63 = vsub.f32 %v9095_v13, %v9035_v36  ;;  %v10592_v15 = vsub.f32 %v9097_v26, %v9035_v36 }
 0x23d   : > { %7722 = vrsqrt.f32 %v2535_v4  ;;  %v9141_v4 = vld [vmem:[#allocation3 + $0xf8] sm:$0xff] }
 0x247   : > { %v9159_v40 = vpop.eup %7722 }
 0x248   : > { %v2601_v53 = vmul.f32 %v9159_v40, %v2569_v61  ;;  %v2602_v21 = vmul.f32 %v9159_v40, %v2570_v14  ;;  %v2603_v20 = vmul.f32 %v9159_v40, %v2571_v49  ;;  %v2604_v44 = vmul.f32 %v9159_v40, %v2572_v25 }
 0x249   : > { %v2605_v18 = vmul.f32 %v9159_v40, %v2573_v34  ;;  %v2606_v32 = vmul.f32 %v9159_v40, %v2574_v39  ;;  %v2607_v17 = vmul.f32 %v9159_v40, %v2575_v35  ;;  %v2608_v28 = vmul.f32 %v9159_v40, %v2576_v7 }
 0x24a   : > { %v2633_v10 = vmax.f32 %v2601_v53, 0.0  ;;  %v2634_v22 = vmax.f32 %v2602_v21, 0.0  ;;  %v2635_v27 = vmax.f32 %v2603_v20, 0.0  ;;  %v2636_v54 = vmax.f32 %v2604_v44, 0.0 }
 0x24b   : > { %v2637_v19 = vmax.f32 %v2605_v18, 0.0  ;;  %v2638_v61 = vmax.f32 %v2606_v32, 0.0  ;;  %v2639_v6 = vmax.f32 %v2607_v17, 0.0  ;;  %v2640_v14 = vmax.f32 %v2608_v28, 0.0 }
 0x24c   : > { %2665 = vst [vmem:[#allocation2 + $0x10] sm:$0xff] %v2633_v10  ;;  %2666 = vst [vmem:[#allocation2 + $0x18] sm:$0xff] %v2634_v22  ;;  %v2609_v49 = vmul.f32 %v9159_v40, %v2577_v23  ;;  %v2610_v25 = vmul.f32 %v9159_v40, %v2578_v48  ;;  %v2611_v34 = vmul.f32 %v9159_v40, %v2579_v2 }
 0x24d   : > { %2667 = vst [vmem:[#allocation2 + $0x20] sm:$0xff] %v2635_v27  ;;  %2697 = vst [vmem:[#allocation2] sm:$0xff] %v2635_v27  ;;  %v2612_v39 = vmul.f32 %v9159_v40, %v2580_v55  ;;  %v2613_v35 = vmul.f32 %v9159_v40, %v2581_v24  ;;  %v2614_v7 = vmul.f32 %v9159_v40, %v2582_v43 }
 0x24e   : > { %2668 = vst [vmem:[#allocation2 + $0x28] sm:$0xff] %v2636_v54  ;;  %2698 = vst [vmem:[#allocation2 + $0x8] sm:$0xff] %v2636_v54  ;;  %v2615_v27 = vmul.f32 %v9159_v40, %v2583_v29  ;;  %v2616_v22 = vmul.f32 %v9159_v40, %v2584_v38  ;;  %v2641_v28 = vmax.f32 %v2609_v49, 0.0  ;;  %v2642_v23 = vmax.f32 %v2610_v25, 0.0 }
 0x24f   : > { %2669 = vst [vmem:[#allocation2 + $0x30] sm:$0xff] %v2637_v19  ;;  %2670 = vst [vmem:[#allocation2 + $0x38] sm:$0xff] %v2638_v61  ;;  %v2643_v18 = vmax.f32 %v2611_v34, 0.0  ;;  %v2644_v48 = vmax.f32 %v2612_v39, 0.0  ;;  %v2645_v44 = vmax.f32 %v2613_v35, 0.0  ;;  %v2646_v2 = vmax.f32 %v2614_v7, 0.0 }
 0x250   : > { %2671 = vst [vmem:[#allocation2 + $0x40] sm:$0xff] %v2639_v6  ;;  %2672 = vst [vmem:[#allocation2 + $0x48] sm:$0xff] %v2640_v14  ;;  %v2647_v32 = vmax.f32 %v2615_v27, 0.0  ;;  %v2648_v55 = vmax.f32 %v2616_v22, 0.0  ;;  %v2617_v24 = vmul.f32 %v9159_v40, %v2585_v3  ;;  %v2618_v43 = vmul.f32 %v9159_v40, %v2586_v57 }
 0x251   : > { %2673 = vst [vmem:[#allocation2 + $0x50] sm:$0xff] %v2641_v28  ;;  %2674 = vst [vmem:[#allocation2 + $0x58] sm:$0xff] %v2642_v23  ;;  %v2619_v29 = vmul.f32 %v9159_v40, %v2587_v60  ;;  %v2620_v38 = vmul.f32 %v9159_v40, %v2588_v31  ;;  %v2621_v12 = vmul.f32 %v9159_v40, %v2589_v63 }
 0x252   : > { %2675 = vst [vmem:[#allocation2 + $0x60] sm:$0xff] %v2643_v18  ;;  %2676 = vst [vmem:[#allocation2 + $0x68] sm:$0xff] %v2644_v48  ;;  %v2622_v5 = vmul.f32 %v9159_v40, %v10592_v15  ;;  %v10593_v3 = vsub.f32 %v9099_v8, %v9035_v36  ;;  %v10594_v57 = vsub.f32 %v9109_v11, %v9035_v36  ;;  %v2649_v31 = vmax.f32 %v2617_v24, 0.0 }
 0x253   : > { %2677 = vst [vmem:[#allocation2 + $0x70] sm:$0xff] %v2645_v44  ;;  %2678 = vst [vmem:[#allocation2 + $0x78] sm:$0xff] %v2646_v2  ;;  %v2650_v6 = vmax.f32 %v2618_v43, 0.0  ;;  %v2651_v13 = vmax.f32 %v2619_v29, 0.0  ;;  %v2652_v19 = vmax.f32 %v2620_v38, 0.0  ;;  %v2653_v63 = vmax.f32 %v2621_v12, 0.0 }
 0x254   : > { %2679 = vst [vmem:[#allocation2 + $0x80] sm:$0xff] %v2647_v32  ;;  %2680 = vst [vmem:[#allocation2 + $0x88] sm:$0xff] %v2648_v55  ;;  %v2623_v9 = vmul.f32 %v9159_v40, %v10593_v3  ;;  %v2624_v60 = vmul.f32 %v9159_v40, %v10594_v57  ;;  %v2654_v17 = vmax.f32 %v2622_v5, 0.0  ;;  %v10595_v8 = vsub.f32 %v9111_v30, %v9035_v36 }
 0x255   : > { %2681 = vst [vmem:[#allocation2 + $0x90] sm:$0xff] %v2649_v31  ;;  %2682 = vst [vmem:[#allocation2 + $0x98] sm:$0xff] %v2650_v6  ;;  %v10596_v11 = vsub.f32 %v9113_v58, %v9035_v36  ;;  %v10597_v21 = vsub.f32 %v9123_v41, %v9035_v36  ;;  %v10598_v61 = vsub.f32 %v9125_v37, %v9035_v36 }
 0x256   : > { %v2655_v10 = vmax.f32 %v2623_v9, 0.0  ;;  %v2656_v26 = vmax.f32 %v2624_v60, 0.0  ;;  %2683 = vst [vmem:[#allocation2 + $0xa0] sm:$0xff] %v2651_v13  ;;  %2684 = vst [vmem:[#allocation2 + $0xa8] sm:$0xff] %v2652_v19  ;;  %v2625_v54 = vmul.f32 %v9159_v40, %v10595_v8  ;;  %v10599_v30 = vsub.f32 %v9127_v42, %v9035_v36 }
 0x257   : > { %v2626_v53 = vmul.f32 %v9159_v40, %v10596_v11  ;;  %v2627_v20 = vmul.f32 %v9159_v40, %v10597_v21  ;;  %v2628_v14 = vmul.f32 %v9159_v40, %v10598_v61  ;;  %2685 = vst [vmem:[#allocation2 + $0xb0] sm:$0xff] %v2653_v63  ;;  %2686 = vst [vmem:[#allocation2 + $0xb8] sm:$0xff] %v2654_v17 }
 0x258   : > { %2687 = vst [vmem:[#allocation2 + $0xc0] sm:$0xff] %v2655_v10  ;;  %2688 = vst [vmem:[#allocation2 + $0xc8] sm:$0xff] %v2656_v26  ;;  %v2629_v58 = vmul.f32 %v9159_v40, %v10599_v30  ;;  %v10600_v49 = vsub.f32 %v9137_v16, %v9035_v36  ;;  %v10601_v25 = vsub.f32 %v9139_v33, %v9035_v36  ;;  %v2657_v35 = vmax.f32 %v2625_v54, 0.0 }
 0x259   : > { %v10602_v34 = vsub.f32 %v9141_v4, %v9035_v36  ;;  %v2658_v7 = vmax.f32 %v2626_v53, 0.0  ;;  %v2659_v42 = vmax.f32 %v2627_v20, 0.0  ;;  %v2660_v27 = vmax.f32 %v2628_v14, 0.0 }
 0x25a   : > { %v2630_v41 = vmul.f32 %v9159_v40, %v10600_v49  ;;  %v2631_v37 = vmul.f32 %v9159_v40, %v10601_v25  ;;  %v2661_v22 = vmax.f32 %v2629_v58, 0.0  ;;  %2689 = vst [vmem:[#allocation2 + $0xd0] sm:$0xff] %v2657_v35  ;;  %v9249_v36 = vmov 0.0  }
 0x25b   : > { %v2632_v39 = vmul.f32 %v9159_v40, %v10602_v34  ;;  %2690 = vst [vmem:[#allocation2 + $0xd8] sm:$0xff] %v2658_v7  ;;  %2691 = vst [vmem:[#allocation2 + $0xe0] sm:$0xff] %v2659_v42  ;;  %v9251_v33 = vmov 0.0  }
 0x25c   : > { %v2662_v28 = vmax.f32 %v2630_v41, 0.0  ;;  %v2663_v23 = vmax.f32 %v2631_v37, 0.0  ;;  %2692 = vst [vmem:[#allocation2 + $0xe8] sm:$0xff] %v2660_v27  ;;  %2693 = vst [vmem:[#allocation2 + $0xf0] sm:$0xff] %v2661_v22 }
 0x25d   : > { %v2664_v16 = vmax.f32 %v2632_v39, 0.0  ;;  %2699 = vst [vmem:[#allocation2 + $0x110] sm:$0xff] %v2661_v22 }
 0x25e   : > { %2694 = vst [vmem:[#allocation2 + $0xf8] sm:$0xff] %v2662_v28  ;;  %2700 = vst [vmem:[#allocation2 + $0x118] sm:$0xff] %v2662_v28 }
 0x25f   : > { %2695 = vst [vmem:[#allocation2 + $0x100] sm:$0xff] %v2663_v23  ;;  %2696 = vst [vmem:[#allocation2 + $0x108] sm:$0xff] %v2664_v16 }
 0x260 LB: >> { %10603 = vst [vmem:[#allocation51_spill] sm:$0xff] %v7922_v36  ;;  %10604 = vst [vmem:[#allocation52_spill] sm:$0xff] %v7926_v33  ;;  %v2843_v4 = vld [vmem:[#allocation9 + $0x80] sm:$0xff]  ;;  %v2844_v40 = vld [vmem:[#allocation9 + $0x88] sm:$0xff]  ;;  %s5151_s22 = sshll.u32 %s7930_s27, 7  ;;  %vm10619_vm14 = vcmp.lt.s32.totalorder %v8157_v1, 1  ;;  %s7930_s27 = sphi %s9253_s27, %s2706_s27   ;;  %v7926_v33 = vphi %v9251_v33, %v10745_v33   ;;  %v7922_v36 = vphi %v9249_v36, %v10744_v36  }
 0x261   : >> { %v3621_v18 = vld [vmem:[#allocation9 + $0x200] sm:$0xff]  ;;  %v7027_v48 = vpack.c.bf16 %v2844_v40, %v2843_v4  ;;  %v3622_v44 = vld [vmem:[#allocation9 + $0x208] sm:$0xff]  ;;  %v2845_v2 = vld [vmem:[#allocation9 + $0x90] sm:$0xff]  ;;  %s9267_s5 = scalar_lea.vmem [#allocation2], %s5151_s22  ;;  %vm10620_vm11 = vcmp.lt.s32.totalorder %v8157_v1, 7  ;;  %s9928_s11 = scalar_lea.vmem [#allocation3], %s5151_s22 }
 0x262   : >> { %v2846_v32 = vld [vmem:[#allocation9 + $0x98] sm:$0xff]  ;;  %v7155_v55 = vpack.c.bf16 %v3622_v44, %v3621_v18  ;;  %v3623_v43 = vld [vmem:[#allocation9 + $0x210] sm:$0xff]  ;;  %v2847_v38 = vld [vmem:[#allocation9 + $0xa0] sm:$0xff]  ;;  %s2706_s27 = sadd.s32 1, %s7930_s27  }
 0x263   : >> { %v7031_v24 = vpack.c.bf16 %v2846_v32, %v2845_v2  ;;  %v3624_v29 = vld [vmem:[#allocation9 + $0x218] sm:$0xff]  ;;  %7028 = vmatprep.subr.bf16.mxu1 %v7027_v48  ;;  %v2848_v15 = vld [vmem:[#allocation9 + $0xa8] sm:$0xff]  ;;  %v3625_v5 = vld [vmem:[#allocation9 + $0x220] sm:$0xff]  ;;  %p2703_p0 = scmp.ge.s32.totalorder %s2706_s27, 2  }
 0x264   : >> { %v7159_v12 = vpack.c.bf16 %v3624_v29, %v3623_v43  ;;  %v3626_v3 = vld [vmem:[#allocation9 + $0x228] sm:$0xff]  ;;  %7156 = vmatprep.subr.bf16.mxu0 %v7155_v55  ;;  %7030 = vmatpush3.bf16.msra.mxu1 %v7027_v48  ;;  %v7035_v9 = vpack.c.bf16 %v2848_v15, %v2847_v38  ;;  %v2849_v60 = vld [vmem:[#allocation9 + $0xb0] sm:$0xff]  ;;  %v2850_v31 = vld [vmem:[#allocation9 + $0xb8] sm:$0xff]  ;;  %s5154_s25 = sshll.u32 (%p2703_p0), %s7981_s16, 12  ;;  %s4915_s10 = sshll.u32 (%p2703_p0), %s8297_s18, 4  ;;  %s10260_s10 = int_to_ptr.vmem [resolvable:$true] %s4915_s10 }
 0x265   : >> { %7158 = vmatpush3.bf16.msra.mxu0 %v7155_v55  ;;  %7032 = vmatprep.subr.bf16.mxu1 %v7031_v24  ;;  %v7163_v57 = vpack.c.bf16 %v3626_v3, %v3625_v5  ;;  %v3627_v6 = vld [vmem:[#allocation9 + $0x230] sm:$0xff]  ;;  %v3628_v13 = vld [vmem:[#allocation9 + $0x238] sm:$0xff]  ;;  %v7039_v19 = vpack.c.bf16 %v2850_v31, %v2849_v60  ;;  %v2851_v17 = vld [vmem:[#allocation9 + $0xc0] sm:$0xff]  ;;  %s10258_s21 = scalar_lea.hbm (%p2703_p0), %s10311_s3, %s5154_s25  ;;  %s4902_s26 = scalar_lea.sflag (%p2703_p0), [#allocation6], %s8141_s29 }
 0x266   : >> { %7160 = vmatprep.subr.bf16.mxu0 %v7159_v12  ;;  %v7167_v63 = vpack.c.bf16 %v3628_v13, %v3627_v6  ;;  %v2852_v10 = vld [vmem:[#allocation9 + $0xc8] sm:$0xff]  ;;  %v9270_v26 = vld [vmem:[%s9267_s5] sm:$0xff]  ;;  %v9274_v11 = vld [vmem:[%s9267_s5 + $0x10] sm:$0xff]  ;;  %s7812_s30 = scalar_lea.vmem (%p2703_p0), %s10260_s10, 4096  ;;  %p10756_p3 = scmp.ne.s32.totalorder (%p2703_p0), %s10428_s6, 0 }
 0x267   : >> { %10605 = vst [vmem:[#allocation53_spill] sm:$0xff] %v9270_v26  ;;  %v3629_v8 = vld [vmem:[#allocation9 + $0x240] sm:$0xff]  ;;  %v3630_v54 = vld [vmem:[#allocation9 + $0x248] sm:$0xff]  ;;  %6267 = vmatprep.mubr.f32.mxu1 %v9270_v26  ;;  %6491 = vmatprep.mubr.f32.mxu0 %v9274_v11  ;;  %v7043_v53 = vpack.c.bf16 %v2852_v10, %v2851_v17  ;;  %v2853_v20 = vld [vmem:[#allocation9 + $0xd0] sm:$0xff]  ;;  %p7813_p2 = scmp.ne.s32.totalorder (%p2703_p0), %s10260_s10, %s7812_s30  ;;  %s7937_s4 = smov (%p2703_p0), [#allocation10]  }
 0x268   : >> { %7034 = vmatpush3.bf16.msra.mxu1 %v7031_v24  ;;  %v7171_v21 = vpack.c.bf16 %v3630_v54, %v3629_v8  ;;  %v2854_v61 = vld [vmem:[#allocation9 + $0xd8] sm:$0xff]  ;;  %v3631_v14 = vld [vmem:[#allocation9 + $0x250] sm:$0xff]  ;;  %v2855_v41 = vld [vmem:[#allocation9 + $0xe0] sm:$0xff] }
 0x269   : >> { %7162 = vmatpush3.bf16.msra.mxu0 %v7159_v12  ;;  %7036 = vmatprep.subr.bf16.mxu1 %v7035_v9  ;;  %v3632_v30 = vld [vmem:[#allocation9 + $0x258] sm:$0xff]  ;;  %v7047_v58 = vpack.c.bf16 %v2854_v61, %v2853_v20  ;;  %v2856_v25 = vld [vmem:[#allocation9 + $0xe8] sm:$0xff]  ;;  %v3633_v37 = vld [vmem:[#allocation9 + $0x260] sm:$0xff]  ;;  %p7814_p7 = pnand (%p2703_p0), %p7813_p2, %p10756_p3 }
 0x26a   : >> { %7164 = vmatprep.subr.bf16.mxu0 %v7163_v57  ;;  %v7175_v49 = vpack.c.bf16 %v3632_v30, %v3631_v14  ;;  %v3634_v34 = vld [vmem:[#allocation9 + $0x268] sm:$0xff]  ;;  %v7051_v39 = vpack.c.bf16 %v2856_v25, %v2855_v41  ;;  %v2857_v7 = vld [vmem:[#allocation9 + $0xf0] sm:$0xff]  ;;  %v2858_v42 = vld [vmem:[#allocation9 + $0xf8] sm:$0xff] }
 0x26b   : >> { %v7179_v35 = vpack.c.bf16 %v3634_v34, %v3633_v37  ;;  %v3635_v27 = vld [vmem:[#allocation9 + $0x270] sm:$0xff]  ;;  %v3636_v22 = vld [vmem:[#allocation9 + $0x278] sm:$0xff]  ;;  %v7055_v28 = vpack.c.bf16 %v2858_v42, %v2857_v7  ;;  %v2826_v16 = vld [vmem:[#allocation9] sm:$0xff]  ;;  %p7815_p9 = pneg (%p2703_p0), %p7814_p7 }
 0x26c   : >> { %7038 = vmatpush3.bf16.msra.mxu1 %v7035_v9  ;;  %v7183_v23 = vpack.c.bf16 %v3636_v22, %v3635_v27  ;;  %v2827_v4 = vld [vmem:[#allocation9 + $0x8] sm:$0xff]  ;;  %v3799_v40 = vld [vmem:[#allocation9 + $0x280] sm:$0xff]  ;;  %v2828_v2 = vld [vmem:[#allocation9 + $0x10] sm:$0xff] }
 0x26d   : >> { %7166 = vmatpush3.bf16.msra.mxu0 %v7163_v57  ;;  %7040 = vmatprep.subr.bf16.mxu1 %v7039_v19  ;;  %v3800_v18 = vld [vmem:[#allocation9 + $0x288] sm:$0xff]  ;;  %v7059_v48 = vpack.c.bf16 %v2827_v4, %v2826_v16  ;;  %v2829_v32 = vld [vmem:[#allocation9 + $0x18] sm:$0xff]  ;;  %v3801_v24 = vld [vmem:[#allocation9 + $0x290] sm:$0xff] }
 0x26e   : >> { %7168 = vmatprep.subr.bf16.mxu0 %v7167_v63  ;;  %v7187_v44 = vpack.c.bf16 %v3800_v18, %v3799_v40  ;;  %v9278_v55 = vld [vmem:[%s9267_s5 + $0x8] sm:$0xff]  ;;  %v3802_v43 = vld [vmem:[#allocation9 + $0x298] sm:$0xff]  ;;  %v7063_v38 = vpack.c.bf16 %v2829_v32, %v2828_v2  ;;  %v9285_v12 = vld [vmem:[%s9267_s5 + $0x20] sm:$0xff]  ;;  %v2728_v18 = vrot.slane %v9270_v26, 7  ;;  %v10378_v2 = vrot.slane %v9270_v26, 1 }
 0x26f   : >> { %v9281_v29 = vld [vmem:[%s9267_s5 + $0x18] sm:$0xff]  ;;  %10606 = vst [vmem:[#allocation54_spill] sm:$0xff] %v9285_v12  ;;  %v7191_v15 = vpack.c.bf16 %v3802_v43, %v3801_v24  ;;  %v2830_v5 = vld [vmem:[#allocation9 + $0x20] sm:$0xff]  ;;  %v2831_v3 = vld [vmem:[#allocation9 + $0x28] sm:$0xff]  ;;  %v10379_v32 = vrot.slane %v9278_v55, 1 }
 0x270   : >> { %7042 = vmatpush3.bf16.msra.mxu1 %v7039_v19  ;;  %v3803_v9 = vld [vmem:[#allocation9 + $0x2a0] sm:$0xff]  ;;  %v3804_v57 = vld [vmem:[#allocation9 + $0x2a8] sm:$0xff]  ;;  %v7067_v31 = vpack.c.bf16 %v2831_v3, %v2830_v5  ;;  %v9295_v6 = vld [vmem:[%s9267_s5 + $0x30] sm:$0xff] }
 0x271   : >> { %7170 = vmatpush3.bf16.msra.mxu0 %v7167_v63  ;;  %7044 = vmatprep.subr.bf16.mxu1 %v7043_v53  ;;  %v9290_v60 = vld [vmem:[%s9267_s5 + $0x28] sm:$0xff]  ;;  %10608 = vst [vmem:[#allocation56_spill] sm:$0xff] %v9295_v6  ;;  %v7195_v13 = vpack.c.bf16 %v3804_v57, %v3803_v9  ;;  %v2832_v19 = vld [vmem:[#allocation9 + $0x30] sm:$0xff]  ;;  %v2833_v63 = vld [vmem:[#allocation9 + $0x38] sm:$0xff]  ;;  %v9348_v57 = vrot.slane %v9274_v11, 7 }
 0x272   : >> { %7172 = vmatprep.subr.bf16.mxu0 %v7171_v21  ;;  %10607 = vst [vmem:[#allocation55_spill] sm:$0xff] %v9290_v60  ;;  %v3805_v17 = vld [vmem:[#allocation9 + $0x2b0] sm:$0xff]  ;;  %v3806_v10 = vld [vmem:[#allocation9 + $0x2b8] sm:$0xff]  ;;  %v7071_v54 = vpack.c.bf16 %v2833_v63, %v2832_v19  ;;  %v2834_v20 = vld [vmem:[#allocation9 + $0x40] sm:$0xff]  ;;  %v2764_v19 = vrot.slane %v9281_v29, 1  ;;  %v2729_v63 = vrot.slane %v9278_v55, 7 }
 0x273   : >> { %v9300_v8 = vld [vmem:[%s9267_s5 + $0x38] sm:$0xff]  ;;  %v2835_v61 = vld [vmem:[#allocation9 + $0x48] sm:$0xff]  ;;  %v3807_v14 = vld [vmem:[#allocation9 + $0x2c0] sm:$0xff]  ;;  %10618 = vst [vmem:[#allocation66_spill] sm:$0xff] %v9348_v57 }
 0x274   : >> { %7046 = vmatpush3.bf16.msra.mxu1 %v7043_v53  ;;  %10609 = vst [vmem:[#allocation57_spill] sm:$0xff] %v9300_v8  ;;  %v9305_v53 = vld [vmem:[%s9267_s5 + $0x40] sm:$0xff]  ;;  %v3808_v30 = vld [vmem:[#allocation9 + $0x2c8] sm:$0xff]  ;;  %v9315_v41 = vld [vmem:[%s9267_s5 + $0x50] sm:$0xff] }
 0x275   : >> { %7174 = vmatpush3.bf16.msra.mxu0 %v7171_v21  ;;  %7048 = vmatprep.subr.bf16.mxu1 %v7047_v58  ;;  %10610 = vst [vmem:[#allocation58_spill] sm:$0xff] %v9305_v53  ;;  %v7199_v21 = vpack.c.bf16 %v3806_v10, %v3805_v17  ;;  %10612 = vst [vmem:[#allocation60_spill] sm:$0xff] %v9315_v41  ;;  %v7203_v25 = vpack.c.bf16 %v3808_v30, %v3807_v14  ;;  %v2836_v37 = vld [vmem:[#allocation9 + $0x50] sm:$0xff]  ;;  %v2837_v34 = vld [vmem:[#allocation9 + $0x58] sm:$0xff]  ;;  %v9359_v10 = vrot.slane %v9274_v11, 1 }
 0x276   : >> { %7176 = vmatprep.subr.bf16.mxu0 %v7175_v49  ;;  %v9320_v7 = vld [vmem:[%s9267_s5 + $0x58] sm:$0xff]  ;;  %v7079_v42 = vpack.c.bf16 %v2837_v34, %v2836_v37  ;;  %v9325_v27 = vld [vmem:[%s9267_s5 + $0x60] sm:$0xff]  ;;  %v3812_v4 = vld [vmem:[#allocation9 + $0x2e8] sm:$0xff]  ;;  %v9379_v14 = vrot.slane %v9285_v12, 7  ;;  %v10380_v30 = vrot.slane %v9290_v60, 7 }
 0x277   : >> { %10613 = vst [vmem:[#allocation61_spill] sm:$0xff] %v9320_v7  ;;  %10614 = vst [vmem:[#allocation62_spill] sm:$0xff] %v9325_v27  ;;  %v3811_v16 = vld [vmem:[#allocation9 + $0x2e0] sm:$0xff]  ;;  %v9330_v40 = vld [vmem:[%s9267_s5 + $0x68] sm:$0xff] }
 0x278   : >> { %7050 = vmatpush3.bf16.msra.mxu1 %v7047_v58  ;;  %v9310_v58 = vld [vmem:[%s9267_s5 + $0x48] sm:$0xff]  ;;  %10615 = vst [vmem:[#allocation63_spill] sm:$0xff] %v9330_v40  ;;  %v9341_v24 = vld [vmem:[%s9267_s5 + $0x70] sm:$0xff]  ;;  %v2841_v5 = vld [vmem:[#allocation9 + $0x78] sm:$0xff]  ;;  %v2774_v46 = vrot.slane %v9330_v40, 1 }
 0x279   : >> { %7178 = vmatpush3.bf16.msra.mxu0 %v7175_v49  ;;  %7052 = vmatprep.subr.bf16.mxu1 %v7051_v39  ;;  %10611 = vst [vmem:[#allocation59_spill] sm:$0xff] %v9310_v58  ;;  %v7075_v49 = vpack.c.bf16 %v2835_v61, %v2834_v20  ;;  %10617 = vst [vmem:[#allocation65_spill] sm:$0xff] %v9341_v24  ;;  %v3813_v3 = vld [vmem:[#allocation9 + $0x2f0] sm:$0xff]  ;;  %v3814_v9 = vld [vmem:[#allocation9 + $0x2f8] sm:$0xff] }
 0x27a   : >> { %7180 = vmatprep.subr.bf16.mxu0 %v7179_v35  ;;  %v3150_v20 = vld [vmem:[#allocation9 + $0x100] sm:$0xff]  ;;  %v3151_v61 = vld [vmem:[#allocation9 + $0x108] sm:$0xff]  ;;  %vm10621_vm6 = vmmov %vm10619_vm14 }
 0x27b   : >> { %v4092_v37 = vld [vmem:[#allocation9 + $0x300] sm:$0xff]  ;;  %v4093_v34 = vld [vmem:[#allocation9 + $0x308] sm:$0xff]  ;;  %vm10623_vm10 = vmmov %vm10620_vm11 }
 0x27c   : >> { %7054 = vmatpush3.bf16.msra.mxu1 %v7051_v39  ;;  %v3809_v39 = vld [vmem:[#allocation9 + $0x2d0] sm:$0xff]  ;;  %vm10624_vm7 = vmmov %vm10621_vm6  ;;  %v4096_v36 = vld [vmem:[#allocation9 + $0x320] sm:$0xff] }
 0x27d   : >> { %7182 = vmatpush3.bf16.msra.mxu0 %v7179_v35  ;;  %7056 = vmatprep.subr.bf16.mxu1 %v7055_v28  ;;  %v3810_v35 = vld [vmem:[#allocation9 + $0x2d8] sm:$0xff]  ;;  %v4097_v33 = vld [vmem:[#allocation9 + $0x328] sm:$0xff]  ;;  %v10688_v52 = vld [vmem:[#allocation18_spill] sm:$0xff] }
 0x27e   : >> { %7184 = vmatprep.subr.bf16.mxu0 %v7183_v23  ;;  %v7207_v22 = vpack.c.bf16 %v3810_v35, %v3809_v39  ;;  %v10665_v47 = vld [vmem:[#allocation17_spill] sm:$0xff] }
 0x27f   : >> { %vm10666_vm4 = vnez %v10665_v47 }
 0x280   : >> { %7058 = vmatpush3.bf16.msra.mxu1 %v7055_v28  ;;  %v2838_v28 = vld [vmem:[#allocation9 + $0x60] sm:$0xff] }
 0x281   : >> { %7186 = vmatpush3.bf16.msra.mxu0 %v7183_v23  ;;  %7060 = vmatprep.subr.bf16.mxu1 %v7059_v48  ;;  %v2839_v23 = vld [vmem:[#allocation9 + $0x68] sm:$0xff] }
 0x282   : >> { %7188 = vmatprep.subr.bf16.mxu0 %v7187_v44 }
 0x283   : >> { %6268 = vmatmul.mubr.f32.vlgmr.msra.gmra.mrb[0].mxu1 %v9278_v55 }
 0x284   : >> { %6492 = vmatmul.mubr.f32.vlgmr.msra.gmra.mrb[0].mxu0 %v9281_v29  ;;  %7062 = vmatpush3.bf16.msra.mxu1 %v7059_v48  ;;  %v7083_v48 = vpack.c.bf16 %v2839_v23, %v2838_v28  ;;  %v2758_v28 = vsel %vm10624_vm7, %v2729_v63, %v9348_v57  ;;  %vm10632_vm7 = vmmov %vm10621_vm6 }
 0x285   : >> { %7190 = vmatpush3.bf16.msra.mxu0 %v7187_v44  ;;  %6270 = vmatprep.mubr.f32.mxu1 %v9274_v11  ;;  %v9335_v44 = vld [vmem:[%s9267_s5 + $0x78] sm:$0xff]  ;;  %v9376_v11 = vsel %vm10620_vm11, %v10378_v2, %v10379_v32  ;;  %vm10627_vm11 = vmmov %vm10621_vm6 }
 0x286   : >> { %6494 = vmatprep.mubr.f32.mxu0 %v9285_v12  ;;  %7064 = vmatprep.subr.bf16.mxu1 %v7063_v38  ;;  %10616 = vst [vmem:[#allocation64_spill] sm:$0xff] %v9335_v44  ;;  %v9344_v43 = vrot.slane %v9335_v44, 7  ;;  %v9608_v47 = vrot.slane %v9335_v44, 1 }
 0x287   : >> { %6271 = vmatmul.mubr.f32.gmra.mrb[2].mxu1 %v9281_v29  ;;  %7192 = vmatprep.subr.bf16.mxu0 %v7191_v15 }
 0x288   : >> { %6495 = vmatmul.mubr.f32.gmra.mrb[2].mxu0 %v9290_v60  ;;  %7066 = vmatpush3.bf16.msra.mxu1 %v7063_v38  ;;  %v7211_v38 = vpack.c.bf16 %v3812_v4, %v3811_v16  ;;  %10674 = vst [vmem:[#allocation77_spill] sm:$0xff] %v9608_v47 }
 0x289   : >> { %7194 = vmatpush3.bf16.msra.mxu0 %v7191_v15  ;;  %6273 = vmatprep.mubr.f32.mxu1 %v9285_v12  ;;  %v2840_v15 = vld [vmem:[#allocation9 + $0x70] sm:$0xff] }
 0x28a   : >> { %6497 = vmatprep.mubr.f32.mxu0 %v9295_v6  ;;  %7068 = vmatprep.subr.bf16.mxu1 %v7067_v31  ;;  %v7087_v17 = vpack.c.bf16 %v2841_v5, %v2840_v15  ;;  %v3152_v15 = vld [vmem:[#allocation9 + $0x110] sm:$0xff]  ;;  %v3153_v5 = vld [vmem:[#allocation9 + $0x118] sm:$0xff] }
 0x28b   : >> { %6274 = vmatmul.mubr.f32.gmra.mrb[4].mxu1 %v9290_v60  ;;  %7196 = vmatprep.subr.bf16.mxu0 %v7195_v13  ;;  %v7095_v35 = vpack.c.bf16 %v3153_v5, %v3152_v15  ;;  %v3352_v15 = vrot.slane %v9305_v53, 7 }
 0x28c   : >> { %6498 = vmatmul.mubr.f32.gmra.mrb[4].mxu0 %v9300_v8  ;;  %7070 = vmatpush3.bf16.msra.mxu1 %v7067_v31  ;;  %v3347_v31 = vrot.slane %v9281_v29, 7  ;;  %v2760_v29 = vsel %vm10619_vm14, %v9344_v43, %v2728_v18  ;;  %vm10626_vm14 = vmmov %vm10623_vm10 }
 0x28d   : >> { %7198 = vmatpush3.bf16.msra.mxu0 %v7195_v13  ;;  %6276 = vmatprep.mubr.f32.mxu1 %v9295_v6  ;;  %v9352_v13 = vrot.slane %v9285_v12, 1  ;;  %v2794_v4 = vsel %vm8207_vm0, %v9376_v11, %v2760_v29  ;;  %v7219_v29 = vpack.c.bf16 %v4093_v34, %v4092_v37  ;;  %v4094_v37 = vld [vmem:[#allocation9 + $0x310] sm:$0xff] }
 0x28e   : >> { %6500 = vmatprep.mubr.f32.mxu0 %v9305_v53  ;;  %7072 = vmatprep.subr.bf16.mxu1 %v7071_v54  ;;  %v9388_v39 = vsel %vm10621_vm6, %v9348_v57, %v3347_v31 }
 0x28f   : >> { %6277 = vmatmul.mubr.f32.gmra.mrb[6].mxu1 %v9300_v8  ;;  %7200 = vmatprep.subr.bf16.mxu0 %v7199_v21 }
 0x290   : >> { %6501 = vmatmul.mubr.f32.gmra.mrb[6].mxu0 %v9310_v58  ;;  %7074 = vmatpush3.bf16.msra.mxu1 %v7071_v54  ;;  %v9363_v54 = vld [vmem:[%s9267_s5 + $0x80] sm:$0xff] }
 0x291   : >> { %7202 = vmatpush3.bf16.msra.mxu0 %v7199_v21  ;;  %6279 = vmatprep.mubr.f32.mxu1 %v9305_v53  ;;  %v7215_v21 = vpack.c.bf16 %v3814_v9, %v3813_v3  ;;  %v2768_v3 = vrot.slane %v9300_v8, 1  ;;  %v9419_v9 = vsel %vm10627_vm11, %v2728_v18, %v2729_v63  ;;  %v9438_v18 = vsel %vm10621_vm6, %v9379_v14, %v10380_v30  ;;  %vm10637_vm11 = vmmov %vm10621_vm6 }
 0x292   : >> { %6503 = vmatprep.mubr.f32.mxu0 %v9315_v41  ;;  %7076 = vmatprep.subr.bf16.mxu1 %v7075_v49  ;;  %v9452_v30 = vsel %vm10632_vm7, %v3347_v31, %v9379_v14  ;;  %vm10640_vm6 = vmmov %vm10623_vm10 }
 0x293   : >> { %6280 = vmatmul.mubr.f32.gmra.mrb[8].mxu1 %v9310_v58  ;;  %7204 = vmatprep.subr.bf16.mxu0 %v7203_v25  ;;  %10633 = vst [vmem:[#allocation70_spill] sm:$0xff] %v9452_v30 }
 0x294   : >> { %6504 = vmatmul.mubr.f32.gmra.mrb[8].mxu0 %v9320_v7  ;;  %7078 = vmatpush3.bf16.msra.mxu1 %v7075_v49  ;;  %v10381_v49 = vrot.slane %v9295_v6, 1 }
 0x295   : >> { %7206 = vmatpush3.bf16.msra.mxu0 %v7203_v25  ;;  %6282 = vmatprep.mubr.f32.mxu1 %v9315_v41  ;;  %v2766_v25 = vrot.slane %v9290_v60, 1 }
 0x296   : >> { %6506 = vmatprep.mubr.f32.mxu0 %v9325_v27  ;;  %7080 = vmatprep.subr.bf16.mxu1 %v7079_v42 }
 0x297   : >> { %6283 = vmatmul.mubr.f32.gmra.mrb[10].mxu1 %v9320_v7  ;;  %7208 = vmatprep.subr.bf16.mxu0 %v7207_v22  ;;  %v9444_v63 = vsel %vm10623_vm10, %v2766_v25, %v10381_v49  ;;  %v3154_v49 = vld [vmem:[#allocation9 + $0x120] sm:$0xff] }
 0x298   : >> { %6507 = vmatmul.mubr.f32.gmra.mrb[10].mxu0 %v9330_v40  ;;  %7082 = vmatpush3.bf16.msra.mxu1 %v7079_v42  ;;  %v9393_v42 = vld [vmem:[%s9267_s5 + $0x88] sm:$0xff]  ;;  %10630 = vst [vmem:[#allocation69_spill] sm:$0xff] %v9444_v63  ;;  %v3429_v5 = vsel %vm8249_vm9, %v9438_v18, %v9444_v63 }
 0x299   : >> { %7210 = vmatpush3.bf16.msra.mxu0 %v7207_v22  ;;  %6285 = vmatprep.mubr.f32.mxu1 %v9325_v27  ;;  %10622 = vst [vmem:[#allocation67_spill] sm:$0xff] %v9393_v42  ;;  %v9398_v22 = vsel %vm10623_vm10, %v2764_v19, %v9352_v13  ;;  %v9455_v23 = vrot.slane %v9393_v42, 1 }
 0x29a   : >> { %6509 = vmatprep.mubr.f32.mxu0 %v9341_v24  ;;  %7084 = vmatprep.subr.bf16.mxu1 %v7083_v48  ;;  %v3427_v32 = vsel %vm8243_vm8, %v9388_v39, %v9398_v22 }
 0x29b   : >> { %6286 = vmatmul.mubr.f32.gmra.mrb[12].mxu1 %v9330_v40  ;;  %7212 = vmatprep.subr.bf16.mxu0 %v7211_v38 }
 0x29c   : >> { %6510 = vmatmul.mubr.f32.gmra.mrb[12].mxu0 %v9335_v44  ;;  %7086 = vmatpush3.bf16.msra.mxu1 %v7083_v48  ;;  %v7091_v48 = vpack.c.bf16 %v3151_v61, %v3150_v20  ;;  %v9422_v20 = vld [vmem:[%s9267_s5 + $0x98] sm:$0xff]  ;;  %v9425_v61 = vld [vmem:[%s9267_s5 + $0x90] sm:$0xff] }
 0x29d   : >> { %7214 = vmatpush3.bf16.msra.mxu0 %v7211_v38  ;;  %6288 = vmatprep.mubr.f32.mxu1 %v9341_v24  ;;  %v9411_v38 = vsel %vm10626_vm14, %v9359_v10, %v2764_v19  ;;  %10628 = vst [vmem:[#allocation68_spill] sm:$0xff] %v9425_v61  ;;  %vm10634_vm14 = vmmov %vm10623_vm10  ;;  %v10635_v12 = vrot.slane %v9422_v20, 7  ;;  %v10636_v57 = vrot.slane %v9425_v61, 7  ;;  %v10639_v26 = vrot.slane %v9425_v61, 1 }
 0x29e   : >> { %6512 = vmatprep.mubr.f32.mxu0 %v9363_v54  ;;  %7088 = vmatprep.subr.bf16.mxu1 %v7087_v17  ;;  %v2796_v19 = vsel %vm8213_vm1, %v9411_v38, %v2758_v28  ;;  %v9467_v31 = vsel %vm10634_vm14, %v9352_v13, %v2766_v25  ;;  %vm10643_vm10 = vmmov %vm10640_vm6  ;;  %v2772_v61 = vrot.slane %v9320_v7, 1 }
 0x29f   : >> { %6289 = vmatmul.mubr.f32.gmra.mrb[14].mxu1 %v9335_v44  ;;  %7216 = vmatprep.subr.bf16.mxu0 %v7215_v21  ;;  %v9480_v25 = vsel %vm10637_vm11, %v10636_v57, %v10635_v12  ;;  %v2798_v12 = vsel %vm8217_vm2, %v9467_v31, %v9452_v30  ;;  %v10645_v57 = vrot.slane %v9300_v8, 7  ;;  %vm10648_vm14 = vmmov %vm10640_vm6  ;;  %v4104_v44 = vld [vmem:[#allocation9 + $0x360] sm:$0xff] }
 0x2a0   : >> { %6513 = vmatmul.mubr.f32.gmra.mrb[14].mxu0 %v9393_v42  ;;  %7090 = vmatpush3.bf16.msra.mxu1 %v7087_v17  ;;  %v4095_v17 = vld [vmem:[#allocation9 + $0x318] sm:$0xff]  ;;  %10638 = vst [vmem:[#allocation71_spill] sm:$0xff] %v9480_v25  ;;  %vm10652_vm11 = vmmov %vm10632_vm7  ;;  %v3354_v25 = vrot.slane %v9315_v41, 7 }
 0x2a1   : >> { %7218 = vmatpush3.bf16.msra.mxu0 %v7215_v21  ;;  %6323 = vmatprep.mubr.f32.mxu1 %v2794_v4  ;;  %v7223_v21 = vpack.c.bf16 %v4095_v17, %v4094_v37  ;;  %v3155_v4 = vld [vmem:[#allocation9 + $0x128] sm:$0xff]  ;;  %v9487_v37 = vsel %vm10640_vm6, %v9455_v23, %v10639_v26  ;;  %v2770_v17 = vrot.slane %v9310_v58, 1  ;;  %v10646_v26 = vrot.slane %v9295_v6, 7 }
 0x2a2   : >> { %6547 = vmatprep.mubr.f32.mxu0 %v9411_v38  ;;  %7092 = vmatprep.subr.bf16.mxu1 %v7091_v48  ;;  %10641 = vst [vmem:[#allocation72_spill] sm:$0xff] %v9487_v37 }
 0x2a3   : >> { %6324 = vmatmul.mubr.f32.vlgmr.msra.gmra.mrb[0].mxu1 %v9419_v9  ;;  %7220 = vmatprep.subr.bf16.mxu0 %v7219_v29  ;;  %v9507_v28 = vsel %vm10632_vm7, %v10646_v26, %v10645_v57  ;;  %v10650_v57 = vmov %v10646_v26  ;;  %v10651_v26 = vrot.slane %v9290_v60, 7  ;;  %v10662_v60 = vrot.slane %v9305_v53, 1 }
 0x2a4   : >> { %6548 = vmatmul.mubr.f32.vlgmr.msra.gmra.mrb[0].mxu0 %v3427_v32  ;;  %7094 = vmatpush3.bf16.msra.mxu1 %v7091_v48  ;;  %v10642_v32 = vrot.slane %v9422_v20, 1 }
 0x2a5   : >> { %7222 = vmatpush3.bf16.msra.mxu0 %v7219_v29  ;;  %6326 = vmatprep.mubr.f32.mxu1 %v2796_v19  ;;  %v3386_v29 = vrot.slane %v9315_v41, 1  ;;  %v7099_v19 = vpack.c.bf16 %v3155_v4, %v3154_v49  ;;  %v9527_v30 = vsel %vm10652_vm11, %v10651_v26, %v10650_v57  ;;  %v10653_v49 = vrot.slane %v9295_v6, 1  ;;  %v4098_v57 = vld [vmem:[#allocation9 + $0x330] sm:$0xff]  ;;  %v4099_v26 = vld [vmem:[#allocation9 + $0x338] sm:$0xff]  ;;  %vm10661_vm11 = vmmov %vm10632_vm7 }
 0x2a6   : >> { %v9494_v48 = vsel %vm10643_vm10, %v10642_v32, %v9352_v13  ;;  %6550 = vmatprep.mubr.f32.mxu0 %v9467_v31  ;;  %7096 = vmatprep.subr.bf16.mxu1 %v7095_v35  ;;  %v10647_v32 = vrot.slane %v9305_v53, 1  ;;  %v3156_v13 = vld [vmem:[#allocation9 + $0x130] sm:$0xff]  ;;  %v7231_v41 = vpack.c.bf16 %v4099_v26, %v4098_v57  ;;  %v10663_v53 = vld [vmem:[#allocation21_spill] sm:$0xff]  ;;  %v10671_v26 = vrot.slane %v9310_v58, 7 }
 0x2a7   : >> { %10644 = vst [vmem:[#allocation73_spill] sm:$0xff] %v9494_v48  ;;  %v3157_v48 = vld [vmem:[#allocation9 + $0x138] sm:$0xff]  ;;  %6327 = vmatmul.mubr.f32.gmra.mrb[2].mxu1 %v9388_v39  ;;  %7224 = vmatprep.subr.bf16.mxu0 %v7223_v21  ;;  %v9534_v4 = vsel %vm10640_vm6, %v10653_v49, %v2768_v3  ;;  %v10654_v6 = vld [vmem:[#allocation20_spill] sm:$0xff]  ;;  %v3159_v49 = vld [vmem:[#allocation9 + $0x148] sm:$0xff] }
 0x2a8   : >> { %v9519_v37 = vsel %vm10648_vm14, %v2768_v3, %v10647_v32  ;;  %v7227_v32 = vpack.c.bf16 %v4097_v33, %v4096_v36  ;;  %6551 = vmatmul.mubr.f32.gmra.mrb[2].mxu0 %v3429_v5  ;;  %7098 = vmatpush3.bf16.msra.mxu1 %v7095_v35  ;;  %vm10655_vm10 = vnez %v10654_v6  ;;  %v2800_v36 = vsel %vm8221_vm3, %v9534_v4, %v9527_v30  ;;  %vm10658_vm14 = vmmov %vm10640_vm6 }
 0x2a9   : >> { %10649 = vst [vmem:[#allocation74_spill] sm:$0xff] %v9519_v37  ;;  %7226 = vmatpush3.bf16.msra.mxu0 %v7223_v21  ;;  %6329 = vmatprep.mubr.f32.mxu1 %v2798_v12  ;;  %v3431_v63 = vsel %vm10655_vm10, %v9507_v28, %v9519_v37  ;;  %v7103_v33 = vpack.c.bf16 %v3157_v48, %v3156_v13  ;;  %v3388_v3 = vrot.slane %v9325_v27, 1  ;;  %v10657_v35 = vrot.slane %v9310_v58, 7  ;;  %v3158_v13 = vld [vmem:[#allocation9 + $0x140] sm:$0xff]  ;;  %v4103_v58 = vld [vmem:[#allocation9 + $0x358] sm:$0xff]  ;;  %v10733_v2 = vld [vmem:[#allocation72_spill] sm:$0xff] }
 0x2aa   : >> { %6553 = vmatprep.mubr.f32.mxu0 %v9534_v4  ;;  %7100 = vmatprep.subr.bf16.mxu1 %v7099_v19  ;;  %v9557_v5 = vsel %vm10658_vm14, %v2770_v17, %v3386_v29  ;;  %v10660_v12 = vrot.slane %v9300_v8, 7  ;;  %v3356_v37 = vrot.slane %v9325_v27, 7  ;;  %v3357_v8 = vrot.slane %v9330_v40, 7  ;;  %vm10668_vm14 = vmmov %vm10661_vm11 }
 0x2ab   : >> { %v9553_v21 = vsel %vm10632_vm7, %v3352_v15, %v10657_v35  ;;  %10659 = vst [vmem:[#allocation75_spill] sm:$0xff] %v9557_v5  ;;  %6330 = vmatmul.mubr.f32.gmra.mrb[4].mxu1 %v9438_v18  ;;  %7228 = vmatprep.subr.bf16.mxu0 %v7227_v32  ;;  %v9570_v35 = vsel %vm10640_vm6, %v10662_v60, %v2770_v17  ;;  %vm10664_vm7 = vnez %v10663_v53  ;;  %v3358_v27 = vrot.slane %v9341_v24, 7 }
 0x2ac   : >> { %v9563_v48 = vsel %vm10661_vm11, %v10660_v12, %v3352_v15  ;;  %6554 = vmatmul.mubr.f32.gmra.mrb[4].mxu0 %v3431_v63  ;;  %7102 = vmatpush3.bf16.msra.mxu1 %v7099_v19  ;;  %v4100_v15 = vld [vmem:[#allocation9 + $0x340] sm:$0xff]  ;;  %v4101_v12 = vld [vmem:[#allocation9 + $0x348] sm:$0xff]  ;;  %v3433_v6 = vsel %vm10664_vm7, %v9553_v21, %v9557_v5  ;;  %v7107_v17 = vpack.c.bf16 %v3159_v49, %v3158_v13  ;;  %v3390_v63 = vrot.slane %v9341_v24, 1  ;;  %vm10669_vm11 = vmmov %vm10640_vm6 }
 0x2ad   : >> { %7230 = vmatpush3.bf16.msra.mxu0 %v7227_v32  ;;  %6332 = vmatprep.mubr.f32.mxu1 %v2800_v36  ;;  %v2802_v60 = vsel %vm10666_vm4, %v9570_v35, %v9563_v48  ;;  %v10667_v19 = vrot.slane %v9320_v7, 7  ;;  %v9593_v57 = vsel %vm10669_vm11, %v2772_v61, %v3388_v3  ;;  %vm10672_vm6 = vmmov %vm10668_vm14  ;;  %v3160_v13 = vld [vmem:[#allocation9 + $0x150] sm:$0xff]  ;;  %v3161_v49 = vld [vmem:[#allocation9 + $0x158] sm:$0xff]  ;;  %v3414_v34 = vsel %vm8217_vm2, %v9534_v4, %v9527_v30 }
 0x2ae   : >> { %6556 = vmatprep.mubr.f32.mxu0 %v9570_v35  ;;  %7104 = vmatprep.subr.bf16.mxu1 %v7103_v33  ;;  %10670 = vst [vmem:[#allocation76_spill] sm:$0xff] %v9593_v57  ;;  %v9599_v36 = vsel %vm10672_vm6, %v10671_v26, %v3354_v25  ;;  %vm10673_vm4 = vmmov %vm10669_vm11  ;;  %v4102_v5 = vld [vmem:[#allocation9 + $0x350] sm:$0xff]  ;;  %v3163_v26 = vld [vmem:[#allocation9 + $0x168] sm:$0xff] }
 0x2af   : >> { %v9589_v32 = vsel %vm10668_vm14, %v3354_v25, %v10667_v19  ;;  %6333 = vmatmul.mubr.f32.gmra.mrb[6].mxu1 %v9507_v28  ;;  %7232 = vmatprep.subr.bf16.mxu0 %v7231_v41  ;;  %v9604_v40 = vsel %vm10673_vm4, %v3386_v29, %v2772_v61  ;;  %v7235_v19 = vpack.c.bf16 %v4101_v12, %v4100_v15  ;;  %vm10675_vm4 = vmmov %vm10672_vm6  ;;  %v10677_v15 = vrot.slane %v9320_v7, 7  ;;  %v4105_v24 = vld [vmem:[#allocation9 + $0x368] sm:$0xff]  ;;  %v4107_v7 = vld [vmem:[#allocation9 + $0x378] sm:$0xff] }
 0x2b0   : >> { %6557 = vmatmul.mubr.f32.gmra.mrb[6].mxu0 %v3433_v6  ;;  %7106 = vmatpush3.bf16.msra.mxu1 %v7103_v33  ;;  %v3435_v25 = vsel %vm8261_vm12, %v9589_v32, %v9593_v57  ;;  %v2804_v61 = vsel %vm8231_vm5, %v9604_v40, %v9599_v36  ;;  %v7111_v29 = vpack.c.bf16 %v3161_v49, %v3160_v13  ;;  %v3392_v6 = vrot.slane %v9363_v54, 1  ;;  %vm10676_vm14 = vmmov %vm10669_vm11 }
 0x2b1   : >> { %7234 = vmatpush3.bf16.msra.mxu0 %v7231_v41  ;;  %6335 = vmatprep.mubr.f32.mxu1 %v2802_v60  ;;  %v9622_v41 = vsel %vm10675_vm4, %v3356_v37, %v3357_v8  ;;  %v9626_v33 = vsel %vm10676_vm14, %v2774_v46, %v3390_v63  ;;  %vm10678_vm11 = vmmov %vm10675_vm4  ;;  %v3162_v60 = vld [vmem:[#allocation9 + $0x160] sm:$0xff]  ;;  %v7239_v49 = vpack.c.bf16 %v4103_v58, %v4102_v5  ;;  %v9649_v58 = vrot.slane %v9393_v42, 7 }
 0x2b2   : >> { %6559 = vmatprep.mubr.f32.mxu0 %v9604_v40  ;;  %7108 = vmatprep.subr.bf16.mxu1 %v7107_v17  ;;  %v9632_v12 = vsel %vm10678_vm11, %v10677_v15, %v3356_v37  ;;  %vm10679_vm6 = vmmov %vm10676_vm14  ;;  %v3437_v37 = vsel %vm8267_vm13, %v9622_v41, %v9626_v33  ;;  %vm10680_vm4 = vnez %v10450_v51  ;;  %v3164_v15 = vld [vmem:[#allocation9 + $0x170] sm:$0xff]  ;;  %v4270_v42 = vld [vmem:[#allocation9 + $0x380] sm:$0xff] }
 0x2b3   : >> { %6336 = vmatmul.mubr.f32.gmra.mrb[8].mxu1 %v9553_v21  ;;  %7236 = vmatprep.subr.bf16.mxu0 %v7235_v19  ;;  %v9637_v13 = vsel %vm10679_vm6, %v3388_v3, %v2774_v46  ;;  %v7115_v3 = vpack.c.bf16 %v3163_v26, %v3162_v60  ;;  %vm10681_vm14 = vmmov %vm10678_vm11  ;;  %v3165_v60 = vld [vmem:[#allocation9 + $0x178] sm:$0xff]  ;;  %v4106_v26 = vld [vmem:[#allocation9 + $0x370] sm:$0xff] }
 0x2b4   : >> { %6560 = vmatmul.mubr.f32.gmra.mrb[8].mxu0 %v3435_v25  ;;  %7110 = vmatpush3.bf16.msra.mxu1 %v7107_v17  ;;  %v2806_v46 = vsel %vm10680_vm4, %v9637_v13, %v9632_v12  ;;  %v9655_v5 = vsel %vm10681_vm14, %v3358_v27, %v9344_v43  ;;  %vm10682_vm11 = vmmov %vm10679_vm6 }
 0x2b5   : >> { %7238 = vmatpush3.bf16.msra.mxu0 %v7235_v19  ;;  %6338 = vmatprep.mubr.f32.mxu1 %v2804_v61  ;;  %v9660_v17 = vsel %vm10682_vm11, %v9608_v47, %v3392_v6  ;;  %vm10684_vm6 = vmmov %vm10681_vm14  ;;  %v7243_v61 = vpack.c.bf16 %v4105_v24, %v4104_v44  ;;  %v7119_v44 = vpack.c.bf16 %v3165_v60, %v3164_v15  ;;  %v10690_v24 = vrot.slane %v9363_v54, 7  ;;  %v3443_v15 = vld [vmem:[#allocation9 + $0x180] sm:$0xff]  ;;  %v3444_v60 = vld [vmem:[#allocation9 + $0x188] sm:$0xff] }
 0x2b6   : >> { %6562 = vmatprep.mubr.f32.mxu0 %v9637_v13  ;;  %7112 = vmatprep.subr.bf16.mxu1 %v7111_v29  ;;  %10683 = vst [vmem:[#allocation78_spill] sm:$0xff] %v9660_v17  ;;  %v9664_v19 = vsel %vm10684_vm6, %v3357_v8, %v3358_v27  ;;  %vm10685_vm4 = vmmov %vm10682_vm11  ;;  %v10686_v8 = vld [vmem:[#allocation22_spill] sm:$0xff]  ;;  %vm10689_vm11 = vnez %v10688_v52  ;;  %v4271_v52 = vld [vmem:[#allocation9 + $0x388] sm:$0xff] }
 0x2b7   : >> { %6339 = vmatmul.mubr.f32.gmra.mrb[10].mxu1 %v9589_v32  ;;  %7240 = vmatprep.subr.bf16.mxu0 %v7239_v49  ;;  %v9670_v25 = vsel %vm10685_vm4, %v3390_v63, %v9608_v47  ;;  %vm10687_vm14 = vnez %v10686_v8  ;;  %vm10691_vm4 = vmmov %vm10684_vm6  ;;  %vm10692_vm6 = vcmp.lt.s32.totalorder %v8157_v1, 7  ;;  %v10695_v47 = vrot.slane %v9278_v55, 1 }
 0x2b8   : >> { %6563 = vmatmul.mubr.f32.gmra.mrb[10].mxu0 %v3437_v37  ;;  %7114 = vmatpush3.bf16.msra.mxu1 %v7111_v29  ;;  %v3439_v27 = vsel %vm10687_vm14, %v9655_v5, %v9660_v17  ;;  %v2808_v63 = vsel %vm10689_vm11, %v9670_v25, %v9664_v19  ;;  %v9686_v29 = vsel %vm10691_vm4, %v10690_v24, %v9649_v58  ;;  %vm10693_vm11 = vmmov %vm10692_vm6  ;;  %v10694_v24 = vrot.slane %v9422_v20, 7 }
 0x2b9   : >> { %7242 = vmatpush3.bf16.msra.mxu0 %v7239_v49  ;;  %6341 = vmatprep.mubr.f32.mxu1 %v2806_v46  ;;  %v3409_v49 = vsel %vm10692_vm6, %v9455_v23, %v9359_v10  ;;  %v9696_v37 = vsel %vm10693_vm11, %v3392_v6, %v9455_v23  ;;  %v7247_v46 = vpack.c.bf16 %v4107_v7, %v4106_v26  ;;  %v4273_v26 = vld [vmem:[#allocation9 + $0x398] sm:$0xff] }
 0x2ba   : >> { %6565 = vmatprep.mubr.f32.mxu0 %v9670_v25  ;;  %7116 = vmatprep.subr.bf16.mxu1 %v7115_v3  ;;  %v4026_v17 = vsel %vm10691_vm4, %v10694_v24, %v9379_v14  ;;  %v2791_v23 = vsel %vm10692_vm6, %v10695_v47, %v9359_v10  ;;  %v3441_v7 = vsel %vm8275_vm15, %v9686_v29, %v3409_v49  ;;  %v3446_v47 = vld [vmem:[#allocation9 + $0x198] sm:$0xff] }
 0x2bb   : >> { %6342 = vmatmul.mubr.f32.gmra.mrb[12].mxu1 %v9622_v41  ;;  %7244 = vmatprep.subr.bf16.mxu0 %v7243_v61  ;;  %v7123_v6 = vpack.c.bf16 %v3444_v60, %v3443_v15  ;;  %v4059_v55 = vsel %vm8207_vm0, %v9467_v31, %v4026_v17  ;;  %v7251_v14 = vpack.c.bf16 %v4271_v52, %v4270_v42  ;;  %v3447_v17 = vld [vmem:[#allocation9 + $0x1a0] sm:$0xff]  ;;  %v3449_v60 = vld [vmem:[#allocation9 + $0x1b0] sm:$0xff]  ;;  %v3450_v24 = vld [vmem:[#allocation9 + $0x1b8] sm:$0xff] }
 0x2bc   : >> { %6566 = vmatmul.mubr.f32.gmra.mrb[12].mxu0 %v3439_v27  ;;  %7118 = vmatpush3.bf16.msra.mxu1 %v7115_v3  ;;  %v3445_v3 = vld [vmem:[#allocation9 + $0x190] sm:$0xff]  ;;  %v2811_v10 = vsel %vm8243_vm8, %v9419_v9, %v2791_v23  ;;  %v4061_v52 = vsel %vm8213_vm1, %v9534_v4, %v9527_v30  ;;  %v4274_v9 = vld [vmem:[#allocation9 + $0x3a0] sm:$0xff]  ;;  %vm10704_vm6 = vnez %v10450_v51 }
 0x2bd   : >> { %7246 = vmatpush3.bf16.msra.mxu0 %v7243_v61  ;;  %6344 = vmatprep.mubr.f32.mxu1 %v2808_v63  ;;  %v4272_v61 = vld [vmem:[#allocation9 + $0x390] sm:$0xff]  ;;  %v7127_v27 = vpack.c.bf16 %v3446_v47, %v3445_v3  ;;  %v3448_v63 = vld [vmem:[#allocation9 + $0x1a8] sm:$0xff]  ;;  %v4065_v47 = vsel %vm8221_vm3, %v9604_v40, %v9599_v36  ;;  %v10716_v23 = vld [vmem:[#allocation66_spill] sm:$0xff] }
 0x2be   : >> { %6568 = vmatprep.mubr.f32.mxu0 %v9696_v37  ;;  %7120 = vmatprep.subr.bf16.mxu1 %v7119_v44  ;;  %v7255_v42 = vpack.c.bf16 %v4273_v26, %v4272_v61  ;;  %v7131_v49 = vpack.c.bf16 %v3448_v63, %v3447_v17  ;;  %v3451_v61 = vld [vmem:[#allocation9 + $0x1c0] sm:$0xff]  ;;  %v3452_v26 = vld [vmem:[#allocation9 + $0x1c8] sm:$0xff] }
 0x2bf   : >> { %6345 = vmatmul.mubr.f32.gmra.mrb[14].mxu1 %v9655_v5  ;;  %7248 = vmatprep.subr.bf16.mxu0 %v7247_v46  ;;  %v4279_v17 = vld [vmem:[#allocation9 + $0x3c8] sm:$0xff]  ;;  %v7139_v63 = vpack.c.bf16 %v3452_v26, %v3451_v61  ;;  %v10703_v26 = vrot.slane %v9363_v54, 7 }
 0x2c0   : >> { %6569 = vmatmul.mubr.f32.gmra.mrb[14].mxu0 %v3441_v7  ;;  %7122 = vmatpush3.bf16.msra.mxu1 %v7119_v44  ;;  %v4275_v44 = vld [vmem:[#allocation9 + $0x3a8] sm:$0xff] }
 0x2c1   : >> { %7250 = vmatpush3.bf16.msra.mxu0 %v7247_v46  ;;  %6379 = vmatprep.mubr.f32.mxu1 %v9376_v11  ;;  %v2813_v11 = vsel %vm8249_vm9, %v9388_v39, %v9398_v22  ;;  %v4063_v46 = vsel %vm8217_vm2, %v9570_v35, %v9563_v48  ;;  %v7259_v15 = vpack.c.bf16 %v4275_v44, %v4274_v9  ;;  %v10696_v22 = vld [vmem:[#allocation69_spill] sm:$0xff]  ;;  %v3456_v61 = vld [vmem:[#allocation9 + $0x1e8] sm:$0xff] }
 0x2c2   : >> { %6603 = vmatprep.mubr.f32.mxu0 %v4059_v55  ;;  %7124 = vmatprep.subr.bf16.mxu1 %v7123_v6  ;;  %v2815_v7 = vsel %vm10655_vm10, %v9438_v18, %v10696_v22  ;;  %v4277_v55 = vld [vmem:[#allocation9 + $0x3b8] sm:$0xff] }
 0x2c3   : >> { %6380 = vmatmul.mubr.f32.vlgmr.msra.gmra.mrb[0].mxu1 %v2811_v10  ;;  %7252 = vmatprep.subr.bf16.mxu0 %v7251_v14 }
 0x2c4   : >> { %6604 = vmatmul.mubr.f32.vlgmr.msra.gmra.mrb[0].mxu0 %v9438_v18  ;;  %7126 = vmatpush3.bf16.msra.mxu1 %v7123_v6  ;;  %v4276_v6 = vld [vmem:[#allocation9 + $0x3b0] sm:$0xff] }
 0x2c5   : >> { %7254 = vmatpush3.bf16.msra.mxu0 %v7251_v14  ;;  %6382 = vmatprep.mubr.f32.mxu1 %v9411_v38  ;;  %v7135_v14 = vpack.c.bf16 %v3450_v24, %v3449_v60  ;;  %v7263_v10 = vpack.c.bf16 %v4277_v55, %v4276_v6  ;;  %v10702_v60 = vld [vmem:[#allocation75_spill] sm:$0xff]  ;;  %v4280_v24 = vld [vmem:[#allocation9 + $0x3d0] sm:$0xff]  ;;  %v4069_v55 = vsel %vm8231_vm5, %v9670_v25, %v9664_v19 }
 0x2c6   : >> { %6606 = vmatprep.mubr.f32.mxu0 %v4061_v52  ;;  %7128 = vmatprep.subr.bf16.mxu1 %v7127_v27 }
 0x2c7   : >> { %6383 = vmatmul.mubr.f32.gmra.mrb[2].mxu1 %v2813_v11  ;;  %7256 = vmatprep.subr.bf16.mxu0 %v7255_v42  ;;  %v10700_v11 = vld [vmem:[#allocation17_spill] sm:$0xff] }
 0x2c8   : >> { %6607 = vmatmul.mubr.f32.gmra.mrb[2].mxu0 %v9507_v28  ;;  %7130 = vmatpush3.bf16.msra.mxu1 %v7127_v27  ;;  %v10699_v27 = vld [vmem:[#allocation74_spill] sm:$0xff]  ;;  %vm10701_vm11 = vnez %v10700_v11  ;;  %v3420_v11 = vsel %vm8231_vm5, %v9637_v13, %v9632_v12 }
 0x2c9   : >> { %7258 = vmatpush3.bf16.msra.mxu0 %v7255_v42  ;;  %6385 = vmatprep.mubr.f32.mxu1 %v9467_v31  ;;  %v2817_v52 = vsel %vm10664_vm7, %v9507_v28, %v10699_v27  ;;  %v4278_v42 = vld [vmem:[#allocation9 + $0x3c0] sm:$0xff]  ;;  %v4067_v9 = vsel %vm10701_vm11, %v9637_v13, %v9632_v12  ;;  %vm10709_vm7 = vcmp.lt.s32.totalorder %v8157_v1, 7  ;;  %v3418_v3 = vsel %vm10701_vm11, %v9604_v40, %v9599_v36 }
 0x2ca   : >> { %6609 = vmatprep.mubr.f32.mxu0 %v4063_v46  ;;  %7132 = vmatprep.subr.bf16.mxu1 %v7131_v49  ;;  %v7267_v44 = vpack.c.bf16 %v4279_v17, %v4278_v42  ;;  %v3454_v46 = vld [vmem:[#allocation9 + $0x1d8] sm:$0xff]  ;;  %v4282_v42 = vld [vmem:[#allocation9 + $0x3e0] sm:$0xff]  ;;  %v4283_v17 = vld [vmem:[#allocation9 + $0x3e8] sm:$0xff] }
 0x2cb   : >> { %6386 = vmatmul.mubr.f32.gmra.mrb[4].mxu1 %v2815_v7  ;;  %7260 = vmatprep.subr.bf16.mxu0 %v7259_v15  ;;  %v4281_v7 = vld [vmem:[#allocation9 + $0x3d8] sm:$0xff]  ;;  %vm10713_vm10 = vmmov %vm10709_vm7 }
 0x2cc   : >> { %6610 = vmatmul.mubr.f32.gmra.mrb[4].mxu0 %v9553_v21  ;;  %7134 = vmatpush3.bf16.msra.mxu1 %v7131_v49  ;;  %v3453_v49 = vld [vmem:[#allocation9 + $0x1d0] sm:$0xff] }
 0x2cd   : >> { %7262 = vmatpush3.bf16.msra.mxu0 %v7259_v15  ;;  %6388 = vmatprep.mubr.f32.mxu1 %v9534_v4  ;;  %v2819_v15 = vsel %vm8261_vm12, %v9553_v21, %v10702_v60  ;;  %v7143_v6 = vpack.c.bf16 %v3454_v46, %v3453_v49  ;;  %v7275_v49 = vpack.c.bf16 %v4283_v17, %v4282_v42  ;;  %v3457_v46 = vld [vmem:[#allocation9 + $0x1f0] sm:$0xff]  ;;  %v10712_v17 = vld [vmem:[#allocation77_spill] sm:$0xff]  ;;  %v4449_v60 = vld [vmem:[#allocation9 + $0x408] sm:$0xff] }
 0x2ce   : >> { %6612 = vmatprep.mubr.f32.mxu0 %v4065_v47  ;;  %7136 = vmatprep.subr.bf16.mxu1 %v7135_v14  ;;  %v3455_v47 = vld [vmem:[#allocation9 + $0x1e0] sm:$0xff] }
 0x2cf   : >> { %6389 = vmatmul.mubr.f32.gmra.mrb[6].mxu1 %v2817_v52  ;;  %7264 = vmatprep.subr.bf16.mxu0 %v7263_v10  ;;  %v9774_v52 = vsel %vm10691_vm4, %v9344_v43, %v10703_v26  ;;  %v2823_v43 = vsel %vm10687_vm14, %v9622_v41, %v9626_v33  ;;  %v10710_v26 = vld [vmem:[#allocation53_spill] sm:$0xff] }
 0x2d0   : >> { %6613 = vmatmul.mubr.f32.gmra.mrb[6].mxu0 %v9589_v32  ;;  %7138 = vmatpush3.bf16.msra.mxu1 %v7135_v14  ;;  %v7271_v14 = vpack.c.bf16 %v4281_v7, %v4280_v24  ;;  %v10711_v42 = vrot.slane %v10710_v26, 1  ;;  %v4448_v26 = vld [vmem:[#allocation9 + $0x400] sm:$0xff] }
 0x2d1   : >> { %7266 = vmatpush3.bf16.msra.mxu0 %v7263_v10  ;;  %6391 = vmatprep.mubr.f32.mxu1 %v9570_v35  ;;  %v2821_v10 = vsel %vm8267_vm13, %v9589_v32, %v9593_v57  ;;  %v10714_v57 = vld [vmem:[#allocation18_spill] sm:$0xff] }
 0x2d2   : >> { %6615 = vmatprep.mubr.f32.mxu0 %v4067_v9  ;;  %7140 = vmatprep.subr.bf16.mxu1 %v7139_v63  ;;  %v4071_v9 = vsel %vm10704_vm6, %v9696_v37, %v9774_v52  ;;  %v2793_v53 = vsel %vm10713_vm10, %v10712_v17, %v10711_v42  ;;  %v4455_v42 = vld [vmem:[#allocation9 + $0x438] sm:$0xff] }
 0x2d3   : >> { %6392 = vmatmul.mubr.f32.gmra.mrb[8].mxu1 %v2819_v15  ;;  %7268 = vmatprep.subr.bf16.mxu0 %v7267_v44  ;;  %v3458_v15 = vld [vmem:[#allocation9 + $0x1f8] sm:$0xff] }
 0x2d4   : >> { %6616 = vmatmul.mubr.f32.gmra.mrb[8].mxu0 %v9622_v41  ;;  %7142 = vmatpush3.bf16.msra.mxu1 %v7139_v63  ;;  %v7147_v63 = vpack.c.bf16 %v3456_v61, %v3455_v47  ;;  %v10722_v17 = vld [vmem:[#allocation57_spill] sm:$0xff] }
 0x2d5   : >> { %7270 = vmatpush3.bf16.msra.mxu0 %v7267_v44  ;;  %6394 = vmatprep.mubr.f32.mxu1 %v9604_v40  ;;  %v10705_v44 = vld [vmem:[#allocation68_spill] sm:$0xff] }
 0x2d6   : >> { %6618 = vmatprep.mubr.f32.mxu0 %v4069_v55  ;;  %7144 = vmatprep.subr.bf16.mxu1 %v7143_v6  ;;  %v10706_v24 = vrot.slane %v10705_v44, 7  ;;  %v10707_v55 = vrot.slane %v9422_v20, 1  ;;  %v10708_v47 = vrot.slane %v10705_v44, 1 }
 0x2d7   : >> { %6395 = vmatmul.mubr.f32.gmra.mrb[10].mxu1 %v2821_v10  ;;  %7272 = vmatprep.subr.bf16.mxu0 %v7271_v14  ;;  %v4285_v10 = vld [vmem:[#allocation9 + $0x3f8] sm:$0xff] }
 0x2d8   : >> { %6619 = vmatmul.mubr.f32.gmra.mrb[10].mxu0 %v9655_v5  ;;  %7146 = vmatpush3.bf16.msra.mxu1 %v7143_v6  ;;  %v4012_v7 = vsel %vm10691_vm4, %v9649_v58, %v10706_v24  ;;  %v9797_v61 = vsel %vm10709_vm7, %v10708_v47, %v10707_v55  ;;  %v4284_v6 = vld [vmem:[#allocation9 + $0x3f0] sm:$0xff]  ;;  %v7151_v24 = vpack.c.bf16 %v3458_v15, %v3457_v46 }
 0x2d9   : >> { %7274 = vmatpush3.bf16.msra.mxu0 %v7271_v14  ;;  %6397 = vmatprep.mubr.f32.mxu1 %v9637_v13  ;;  %vm10715_vm7 = vnez %v10714_v57  ;;  %v7279_v47 = vpack.c.bf16 %v4285_v10, %v4284_v6  ;;  %v3377_v14 = vsel %vm10691_vm4, %v9649_v58, %v10716_v23  ;;  %v7283_v15 = vpack.c.bf16 %v4449_v60, %v4448_v26  ;;  %v4450_v58 = vld [vmem:[#allocation9 + $0x410] sm:$0xff]  ;;  %v4451_v23 = vld [vmem:[#allocation9 + $0x418] sm:$0xff]  ;;  %v4453_v60 = vld [vmem:[#allocation9 + $0x428] sm:$0xff] }
 0x2da   : >> { %6621 = vmatprep.mubr.f32.mxu0 %v4071_v9  ;;  %7148 = vmatprep.subr.bf16.mxu1 %v7147_v63  ;;  %v4073_v55 = vsel %vm10715_vm7, %v9797_v61, %v4012_v7  ;;  %v2825_v9 = vsel %vm8275_vm15, %v9655_v5, %v2793_v53  ;;  %v3410_v46 = vsel %vm8207_vm0, %v9411_v38, %v3377_v14  ;;  %v10718_v53 = vld [vmem:[#allocation54_spill] sm:$0xff]  ;;  %v10720_v7 = vld [vmem:[#allocation55_spill] sm:$0xff]  ;;  %v10721_v6 = vld [vmem:[#allocation56_spill] sm:$0xff] }
 0x2db   : >> { %6398 = vmatmul.mubr.f32.gmra.mrb[12].mxu1 %v2823_v43  ;;  %7276 = vmatprep.subr.bf16.mxu0 %v7275_v49  ;;  %v10717_v43 = vld [vmem:[#allocation71_spill] sm:$0xff]  ;;  %v7287_v16 = vpack.c.bf16 %v4451_v23, %v4450_v58  ;;  %v4452_v38 = vld [vmem:[#allocation9 + $0x420] sm:$0xff]  ;;  %v10726_v58 = vld [vmem:[#allocation61_spill] sm:$0xff]  ;;  %v4076_v57 = vsel %vm8243_vm8, %v9438_v18, %v10696_v22 }
 0x2dc   : >> { %6622 = vmatmul.mubr.f32.gmra.mrb[12].mxu0 %v9686_v29  ;;  %7150 = vmatpush3.bf16.msra.mxu1 %v7147_v63  ;;  %v10719_v63 = vld [vmem:[#allocation70_spill] sm:$0xff]  ;;  %v7291_v10 = vpack.c.bf16 %v4453_v60, %v4452_v38  ;;  %v4457_v14 = vld [vmem:[#allocation9 + $0x448] sm:$0xff]  ;;  %v3422_v38 = vsel %vm10704_vm6, %v9670_v25, %v9664_v19  ;;  %v4462_v60 = vld [vmem:[#allocation9 + $0x470] sm:$0xff] }
 0x2dd   : >> { %7278 = vmatpush3.bf16.msra.mxu0 %v7275_v49  ;;  %6400 = vmatprep.mubr.f32.mxu1 %v9670_v25  ;;  %v3412_v49 = vsel %vm8213_vm1, %v9467_v31, %v10719_v63  ;;  %v10724_v26 = vld [vmem:[#allocation59_spill] sm:$0xff]  ;;  %v10727_v23 = vld [vmem:[#allocation62_spill] sm:$0xff] }
 0x2de   : >> { %6624 = vmatprep.mubr.f32.mxu0 %v4073_v55  ;;  %7152 = vmatprep.subr.bf16.mxu1 %v7151_v24  ;;  %v3416_v55 = vsel %vm8221_vm3, %v9570_v35, %v9563_v48  ;;  %v4461_v63 = vld [vmem:[#allocation9 + $0x468] sm:$0xff] }
 0x2df   : >> { %6401 = vmatmul.mubr.f32.gmra.mrb[14].mxu1 %v2825_v9  ;;  %7280 = vmatprep.subr.bf16.mxu0 %v7279_v47  ;;  %v10725_v9 = vld [vmem:[#allocation60_spill] sm:$0xff] }
 0x2e0   : >> { %6625 = vmatmul.mubr.f32.gmra.mrb[14].mxu0 %v10717_v43  ;;  %7154 = vmatpush3.bf16.msra.mxu1 %v7151_v24  ;;  %v10723_v24 = vld [vmem:[#allocation58_spill] sm:$0xff] }
 0x2e1   : >> { %7282 = vmatpush3.bf16.msra.mxu0 %v7279_v47  ;;  %6435 = vmatprep.mubr.f32.mxu1 %v3410_v46  ;;  %v4456_v47 = vld [vmem:[#allocation9 + $0x440] sm:$0xff]  ;;  %v4458_v46 = vld [vmem:[#allocation9 + $0x450] sm:$0xff] }
 0x2e2   : >> { %6659 = vmatprep.mubr.f32.mxu0 %v10718_v53  ;;  %7284 = vmatprep.subr.bf16.mxu0 %v7283_v15  ;;  %v7299_v48 = vpack.c.bf16 %v4457_v14, %v4456_v47  ;;  %v4460_v53 = vld [vmem:[#allocation9 + $0x460] sm:$0xff] }
 0x2e3   : >> { %6436 = vmatmul.mubr.f32.vlgmr.msra.gmra.mrb[0].mxu1 %v9388_v39  ;;  %7459 = vmatprep.subr.bf16.mxu1 %v7283_v15  ;;  %v4454_v39 = vld [vmem:[#allocation9 + $0x430] sm:$0xff]  ;;  %v7307_v12 = vpack.c.bf16 %v4461_v63, %v4460_v53 }
 0x2e4   : >> { %6660 = vmatmul.mubr.f32.vlgmr.msra.gmra.mrb[0].mxu0 %v10720_v7  ;;  %7467 = vmatpush3.bf16.msra.mxu1 %v7283_v15  ;;  %v7295_v30 = vpack.c.bf16 %v4455_v42, %v4454_v39  ;;  %v4463_v7 = vld [vmem:[#allocation9 + $0x478] sm:$0xff] }
 0x2e5   : >> { %7286 = vmatpush3.bf16.msra.mxu0 %v7283_v15  ;;  %6438 = vmatprep.mubr.f32.mxu1 %v3412_v49  ;;  %v4459_v15 = vld [vmem:[#allocation9 + $0x458] sm:$0xff]  ;;  %v10728_v49 = vld [vmem:[#allocation63_spill] sm:$0xff]  ;;  %v7311_v19 = vpack.c.bf16 %v4463_v7, %v4462_v60 }
 0x2e6   : >> { %6662 = vmatprep.mubr.f32.mxu0 %v10721_v6  ;;  %7288 = vmatprep.subr.bf16.mxu0 %v7287_v16  ;;  %v7303_v36 = vpack.c.bf16 %v4459_v15, %v4458_v46  ;;  %v10730_v6 = vld [vmem:[#allocation64_spill] sm:$0xff] }
 0x2e7   : >> { %6439 = vmatmul.mubr.f32.gmra.mrb[2].mxu1 %v9438_v18  ;;  %7460 = vmatprep.subr.bf16.mxu1 %v7287_v16  ;;  %v4088_v18 = vsel %vm10687_vm14, %v9686_v29, %v10733_v2 }
 0x2e8   : >> { %6663 = vmatmul.mubr.f32.gmra.mrb[2].mxu0 %v10722_v17  ;;  %7468 = vmatpush3.bf16.msra.mxu1 %v7287_v16 }
 0x2e9   : >> { %7290 = vmatpush3.bf16.msra.mxu0 %v7287_v16  ;;  %6441 = vmatprep.mubr.f32.mxu1 %v3414_v34  ;;  %v10729_v16 = vld [vmem:[#allocation65_spill] sm:$0xff]  ;;  %v3424_v34 = vsel %vm10715_vm7, %v9696_v37, %v9774_v52  ;;  %v10732_v52 = vld [vmem:[#allocation78_spill] sm:$0xff] }
 0x2ea   : >> { %6665 = vmatprep.mubr.f32.mxu0 %v10723_v24  ;;  %7292 = vmatprep.subr.bf16.mxu0 %v7291_v10 }
 0x2eb   : >> { %6442 = vmatmul.mubr.f32.gmra.mrb[4].mxu1 %v9507_v28  ;;  %7461 = vmatprep.subr.bf16.mxu1 %v7291_v10 }
 0x2ec   : >> { %6666 = vmatmul.mubr.f32.gmra.mrb[4].mxu0 %v10724_v26  ;;  %7469 = vmatpush3.bf16.msra.mxu1 %v7291_v10 }
 0x2ed   : >> { %7294 = vmatpush3.bf16.msra.mxu0 %v7291_v10  ;;  %6444 = vmatprep.mubr.f32.mxu1 %v3416_v55  ;;  %v10731_v10 = vld [vmem:[#allocation67_spill] sm:$0xff] }
 0x2ee   : >> { %6668 = vmatprep.mubr.f32.mxu0 %v10725_v9  ;;  %7296 = vmatprep.subr.bf16.mxu0 %v7295_v30 }
 0x2ef   : >> { %6445 = vmatmul.mubr.f32.gmra.mrb[6].mxu1 %v9553_v21  ;;  %7462 = vmatprep.subr.bf16.mxu1 %v7295_v30 }
 0x2f0   : >> { %6669 = vmatmul.mubr.f32.gmra.mrb[6].mxu0 %v10726_v58  ;;  %7470 = vmatpush3.bf16.msra.mxu1 %v7295_v30 }
 0x2f1   : >> { %7298 = vmatpush3.bf16.msra.mxu0 %v7295_v30  ;;  %6447 = vmatprep.mubr.f32.mxu1 %v3418_v3 }
 0x2f2   : >> { %6671 = vmatprep.mubr.f32.mxu0 %v10727_v23  ;;  %7300 = vmatprep.subr.bf16.mxu0 %v7299_v48 }
 0x2f3   : >> { %6448 = vmatmul.mubr.f32.gmra.mrb[8].mxu1 %v9589_v32  ;;  %7463 = vmatprep.subr.bf16.mxu1 %v7299_v48 }
 0x2f4   : >> { %6672 = vmatmul.mubr.f32.gmra.mrb[8].mxu0 %v10728_v49  ;;  %7471 = vmatpush3.bf16.msra.mxu1 %v7299_v48 }
 0x2f5   : >> { %7302 = vmatpush3.bf16.msra.mxu0 %v7299_v48  ;;  %6450 = vmatprep.mubr.f32.mxu1 %v3420_v11 }
 0x2f6   : >> { %6674 = vmatprep.mubr.f32.mxu0 %v10729_v16  ;;  %7304 = vmatprep.subr.bf16.mxu0 %v7303_v36 }
 0x2f7   : >> { %6451 = vmatmul.mubr.f32.gmra.mrb[10].mxu1 %v9622_v41  ;;  %7464 = vmatprep.subr.bf16.mxu1 %v7303_v36 }
 0x2f8   : >> { %6675 = vmatmul.mubr.f32.gmra.mrb[10].mxu0 %v10730_v6  ;;  %7472 = vmatpush3.bf16.msra.mxu1 %v7303_v36 }
 0x2f9   : >> { %7306 = vmatpush3.bf16.msra.mxu0 %v7303_v36  ;;  %6453 = vmatprep.mubr.f32.mxu1 %v3422_v38 }
 0x2fa   : >> { %6677 = vmatprep.mubr.f32.mxu0 %v9363_v54  ;;  %7308 = vmatprep.subr.bf16.mxu0 %v7307_v12  ;;  %v4084_v54 = vsel %vm8261_vm12, %v9622_v41, %v9626_v33  ;;  %v10734_v41 = vld [vmem:[#allocation75_spill] sm:$0xff]  ;;  %v10735_v33 = vld [vmem:[#allocation20_spill] sm:$0xff] }
 0x2fb   : >> { %6454 = vmatmul.mubr.f32.gmra.mrb[12].mxu1 %v9655_v5  ;;  %7465 = vmatprep.subr.bf16.mxu1 %v7307_v12  ;;  %vm10736_vm10 = vnez %v10735_v33 }
 0x2fc   : >> { %6678 = vmatmul.mubr.f32.gmra.mrb[12].mxu0 %v10731_v10  ;;  %7473 = vmatpush3.bf16.msra.mxu1 %v7307_v12 }
 0x2fd   : >> { %7310 = vmatpush3.bf16.msra.mxu0 %v7307_v12  ;;  %6456 = vmatprep.mubr.f32.mxu1 %v3424_v34 }
 0x2fe   : >> { %6680 = vmatprep.mubr.f32.mxu0 %v10705_v44  ;;  %7312 = vmatprep.subr.bf16.mxu0 %v7311_v19 }
 0x2ff   : >> { %6457 = vmatmul.mubr.f32.gmra.mrb[14].mxu1 %v9686_v29  ;;  %7466 = vmatprep.subr.bf16.mxu1 %v7311_v19 }
 0x300   : >> { %6681 = vmatmul.mubr.f32.gmra.mrb[14].mxu0 %v9422_v20  ;;  %7474 = vmatpush3.bf16.msra.mxu1 %v7311_v19  ;;  %v4086_v20 = vsel %vm8267_vm13, %v9655_v5, %v10732_v52 }
 0x301   : >> { %7314 = vmatpush3.bf16.msra.mxu0 %v7311_v19  ;;  %6715 = vmatprep.mubr.f32.mxu0 %v9467_v31  ;;  %v4078_v31 = vsel %vm8249_vm9, %v9507_v28, %v10699_v27  ;;  %v10737_v28 = vld [vmem:[#allocation76_spill] sm:$0xff] }
 0x302   : >> { %6727 = vmatprep.mubr.f32.mxu1 %v9637_v13  ;;  %v10738_v13 = vld [vmem:[#allocation21_spill] sm:$0xff] }
 0x303   : >> { %6728 = vmatmul.mubr.f32.vlgmr.msra.gmra.mrb[16].mxu1 %v4084_v54  ;;  %vm10739_vm11 = vnez %v10738_v13 }
 0x304   : >> { %6716 = vmatmul.mubr.f32.vlgmr.msra.gmra.mrb[0].mxu0 %v4076_v57  ;;  %6730 = vmatprep.mubr.f32.mxu1 %v9670_v25  ;;  %v4082_v5 = vsel %vm10739_vm11, %v9589_v32, %v10737_v28 }
 0x305   : >> { %6718 = vmatprep.mubr.f32.mxu0 %v9534_v4  ;;  %v4080_v4 = vsel %vm10736_vm10, %v9553_v21, %v10734_v41 }
 0x307   : >> { %6731 = vmatmul.mubr.f32.gmra.mrb[18].mxu1 %v4086_v20 }
 0x308   : >> { %6719 = vmatmul.mubr.f32.gmra.mrb[2].mxu0 %v4078_v31  ;;  %6733 = vmatprep.mubr.f32.mxu1 %v9696_v37 }
 0x309   : >> { %6721 = vmatprep.mubr.f32.mxu0 %v9570_v35  ;;  %v10740_v35 = vld [vmem:[#allocation73_spill] sm:$0xff] }
 0x30a   : >> { %v10741_v25 = vsel %vm8275_vm15, %v10717_v43, %v10740_v35 }
 0x30b   : >> { %6734 = vmatmul.mubr.f32.gmra.mrb[20].mxu1 %v4088_v18 }
 0x30c   : >> { %6722 = vmatmul.mubr.f32.gmra.mrb[4].mxu0 %v4080_v4  ;;  %6736 = vmatprep.mubr.f32.mxu1 %v9797_v61 }
 0x30d   : >> { %6724 = vmatprep.mubr.f32.mxu0 %v9604_v40 }
 0x30f   : >> { %6737 = vmatmul.mubr.f32.gmra.mrb[22].mxu1 %v10741_v25 }
 0x310   : >> { %6725 = vmatmul.mubr.f32.gmra.mrb[6].mxu0 %v4082_v5 }
 0x3b6   : >> { %v6437_v8 = vpop.f32.mrb[0].mxu1 }
 0x3b7   : >> { %v3525_v21 = vpop.f32.mrb[1].mxu1 }
 0x3ba   : >> { %v6440_v29 = vpop.f32.mrb[2].mxu1 }
 0x3bb   : >> { %v3535_v37 = vpop.f32.mrb[3].mxu1 }
 0x3be   : >> { %v9914_v22 = vpop.f32.mrb[4].mxu1 }
 0x3bf   : >> { %v9916_v27 = vpop.f32.mrb[5].mxu1 }
 0x3c2   : >> { %v9918_v40 = vpop.f32.mrb[6].mxu1 }
 0x3c3   : >> { %v9920_v44 = vpop.f32.mrb[7].mxu1 }
 0x3c6   : >> { %v6449_v32 = vpop.f32.mrb[8].mxu1 }
 0x3c7   : >> { %v6673_v61 = vpop.f32.mrb[8].mxu0  ;;  %v3565_v39 = vpop.f32.mrb[9].mxu1 }
 0x3c8   : >> { %v7483_v42 = vadd.f32 %v6673_v61, %v6449_v32  ;;  %v4392_v17 = vpop.f32.mrb[9].mxu0 }
 0x3c9   : >> { %v7485_v43 = vadd.f32 %v4392_v17, %v3565_v39 }
 0x3ca   : >> { %v6452_v24 = vpop.f32.mrb[10].mxu1 }
 0x3cb   : >> { %v6676_v55 = vpop.f32.mrb[10].mxu0  ;;  %v3575_v30 = vpop.f32.mrb[11].mxu1 }
 0x3cc   : >> { %v7487_v47 = vadd.f32 %v6676_v55, %v6452_v24  ;;  %v4402_v14 = vpop.f32.mrb[11].mxu0 }
 0x3cd   : >> { %v7489_v26 = vadd.f32 %v4402_v14, %v3575_v30 }
 0x3ce   : >> { %v6455_v9 = vpop.f32.mrb[12].mxu1 }
 0x3cf   : >> { %v6679_v3 = vpop.f32.mrb[12].mxu0  ;;  %v3585_v48 = vpop.f32.mrb[13].mxu1 }
 0x3d0   : >> { %v7491_v46 = vadd.f32 %v6679_v3, %v6455_v9  ;;  %v4412_v15 = vpop.f32.mrb[13].mxu0 }
 0x3d1   : >> { %v7493_v58 = vadd.f32 %v4412_v15, %v3585_v48 }
 0x3d2   : >> { %v6458_v23 = vpop.f32.mrb[14].mxu1 }
 0x3d3   : >> { %v6682_v11 = vpop.f32.mrb[14].mxu0  ;;  %v3595_v36 = vpop.f32.mrb[15].mxu1 }
 0x3d4   : >> { %v7495_v53 = vadd.f32 %v6682_v11, %v6458_v23  ;;  %v4422_v63 = vpop.f32.mrb[15].mxu0 }
 0x3d5   : >> { %v7497_v49 = vadd.f32 %v4422_v63, %v3595_v36 }
 0x3d6   : >> { %v6729_v16 = vpop.f32.mrb[16].mxu1 }
 0x3d7   : >> { %v6717_v38 = vpop.f32.mrb[0].mxu0  ;;  %v9922_v12 = vadd.f32 %v7483_v42, %v6729_v16  ;;  %v4570_v60 = vpop.f32.mrb[17].mxu1 }
 0x3d8   : >> { %v7475_v7 = vadd.f32 %v6717_v38, %v6437_v8  ;;  %v4530_v6 = vpop.f32.mrb[1].mxu0  ;;  %v9924_v34 = vadd.f32 %v7485_v43, %v4570_v60 }
 0x3d9   : >> { %4635 = vst [vmem:[%s9928_s11 + $0x48] sm:$0xff] %v9922_v12  ;;  %v7476_v19 = vadd.f32 %v4530_v6, %v3525_v21  ;;  %v4673_v38 = vmul.f32 %v9922_v12, %v9922_v12 }
 0x3da   : >> { %4627 = vst [vmem:[%s9928_s11 + $0x8] sm:$0xff] %v7475_v7  ;;  %v4665_v10 = vmul.f32 %v7475_v7, %v7475_v7  ;;  %4634 = vst [vmem:[%s9928_s11 + $0x40] sm:$0xff] %v9924_v34  ;;  %v6732_v54 = vpop.f32.mrb[18].mxu1 }
 0x3db   : >> { %4626 = vst [vmem:[%s9928_s11] sm:$0xff] %v7476_v19  ;;  %v4642_v57 = vadd.f32 %v7476_v19, %v7475_v7  ;;  %v4664_v52 = vmul.f32 %v7476_v19, %v7476_v19  ;;  %v6720_v20 = vpop.f32.mrb[2].mxu0  ;;  %v7488_v31 = vadd.f32 %v7487_v47, %v6732_v54  ;;  %v4580_v2 = vpop.f32.mrb[19].mxu1 }
 0x3dc   : >> { %v7477_v18 = vadd.f32 %v6720_v20, %v6440_v29  ;;  %v4540_v41 = vpop.f32.mrb[3].mxu0  ;;  %v7490_v33 = vadd.f32 %v7489_v26, %v4580_v2 }
 0x3dd   : >> { %v4680_v4 = vadd.f32 %v4665_v10, %v4664_v52  ;;  %4637 = vst [vmem:[%s9928_s11 + $0x58] sm:$0xff] %v7488_v31  ;;  %v7478_v28 = vadd.f32 %v4540_v41, %v3535_v37  ;;  %v4675_v10 = vmul.f32 %v7488_v31, %v7488_v31 }
 0x3de   : >> { %4629 = vst [vmem:[%s9928_s11 + $0x18] sm:$0xff] %v7477_v18  ;;  %4636 = vst [vmem:[%s9928_s11 + $0x50] sm:$0xff] %v7490_v33  ;;  %v6735_v13 = vpop.f32.mrb[20].mxu1  ;;  %v4667_v39 = vmul.f32 %v7477_v18, %v7477_v18  ;;  %v4674_v7 = vmul.f32 %v7490_v33, %v7490_v33 }
 0x3df   : >> { %4628 = vst [vmem:[%s9928_s11 + $0x10] sm:$0xff] %v7478_v28  ;;  %v4643_v5 = vadd.f32 %v7478_v28, %v4642_v57  ;;  %v4666_v35 = vmul.f32 %v7478_v28, %v7478_v28  ;;  %v6723_v25 = vpop.f32.mrb[4].mxu0  ;;  %v7492_v8 = vadd.f32 %v7491_v46, %v6735_v13  ;;  %v4590_v21 = vpop.f32.mrb[21].mxu1 }
 0x3e0   : >> { %v7479_v29 = vadd.f32 %v6723_v25, %v9914_v22  ;;  %v4550_v32 = vpop.f32.mrb[5].mxu0  ;;  %v7494_v61 = vadd.f32 %v7493_v58, %v4590_v21 }
 0x3e1   : >> { %v4681_v42 = vadd.f32 %v4680_v4, %v4666_v35  ;;  %4639 = vst [vmem:[%s9928_s11 + $0x68] sm:$0xff] %v7492_v8  ;;  %v7480_v37 = vadd.f32 %v4550_v32, %v9916_v27  ;;  %v4644_v17 = vadd.f32 %v7477_v18, %v4643_v5  ;;  %v4677_v18 = vmul.f32 %v7492_v8, %v7492_v8 }
 0x3e2   : >> { %4631 = vst [vmem:[%s9928_s11 + $0x28] sm:$0xff] %v7479_v29  ;;  %4638 = vst [vmem:[%s9928_s11 + $0x60] sm:$0xff] %v7494_v61  ;;  %v6738_v43 = vpop.f32.mrb[22].mxu1  ;;  %v4669_v27 = vmul.f32 %v7479_v29, %v7479_v29  ;;  %v4676_v52 = vmul.f32 %v7494_v61, %v7494_v61 }
 0x3e3   : >> { %4630 = vst [vmem:[%s9928_s11 + $0x20] sm:$0xff] %v7480_v37  ;;  %v4645_v24 = vadd.f32 %v7480_v37, %v4644_v17  ;;  %v4668_v55 = vmul.f32 %v7480_v37, %v7480_v37  ;;  %v4682_v30 = vadd.f32 %v4681_v42, %v4667_v39  ;;  %v6726_v22 = vpop.f32.mrb[6].mxu0  ;;  %v7496_v47 = vadd.f32 %v7495_v53, %v6738_v43  ;;  %v4600_v14 = vpop.f32.mrb[23].mxu1 }
 0x3e4   : >> { %v7481_v26 = vadd.f32 %v6726_v22, %v9918_v40  ;;  %v4560_v9 = vpop.f32.mrb[7].mxu0  ;;  %v7498_v3 = vadd.f32 %v7497_v49, %v4600_v14  ;;  %v4672_v40 = vmul.f32 %v9924_v34, %v9924_v34 }
 0x3e5   : >> { %v4683_v48 = vadd.f32 %v4682_v30, %v4668_v55  ;;  %4641 = vst [vmem:[%s9928_s11 + $0x78] sm:$0xff] %v7496_v47  ;;  %v7482_v46 = vadd.f32 %v4560_v9, %v9920_v44  ;;  %v4646_v15 = vadd.f32 %v7479_v29, %v4645_v24  ;;  %v4679_v5 = vmul.f32 %v7496_v47, %v7496_v47  ;;  %v10743_v30 = vld [vmem:[#allocation51_spill] sm:$0xff] }
 0x3e6   : >> { %4633 = vst [vmem:[%s9928_s11 + $0x38] sm:$0xff] %v7481_v26  ;;  %4640 = vst [vmem:[%s9928_s11 + $0x70] sm:$0xff] %v7498_v3  ;;  %v4671_v36 = vmul.f32 %v7481_v26, %v7481_v26  ;;  %v4678_v28 = vmul.f32 %v7498_v3, %v7498_v3 }
 0x3e7   : >> { %4632 = vst [vmem:[%s9928_s11 + $0x30] sm:$0xff] %v7482_v46  ;;  %v4647_v58 = vadd.f32 %v7482_v46, %v4646_v15  ;;  %v4670_v23 = vmul.f32 %v7482_v46, %v7482_v46  ;;  %v4684_v11 = vadd.f32 %v4683_v48, %v4669_v27 }
 0x3e9   : >> { %v4648_v63 = vadd.f32 %v7481_v26, %v4647_v58  ;;  %v4685_v53 = vadd.f32 %v4684_v11, %v4670_v23 }
 0x3eb   : >> { %v4649_v49 = vadd.f32 %v9924_v34, %v4648_v63  ;;  %v4686_v16 = vadd.f32 %v4685_v53, %v4671_v36 }
 0x3ed   : >> { %v4650_v44 = vadd.f32 %v9922_v12, %v4649_v49  ;;  %v4687_v60 = vadd.f32 %v4686_v16, %v4672_v40 }
 0x3ee   : > { %v9971_v48 = vld [vmem:[#allocation3] sm:$0xff] (%p2703_p0)  ;;  %v9973_v46 = vld [vmem:[#allocation3 + $0x8] sm:$0xff] (%p2703_p0)  ;;  %v9975_v15 = vld [vmem:[#allocation3 + $0x10] sm:$0xff] (%p2703_p0) }
 0x3ef   : >> { %v4688_v6 = vadd.f32 %v4687_v60, %v4673_v38  ;;  %v4651_v19 = vadd.f32 %v7490_v33, %v4650_v44  ;;  %v9977_v58 = vld [vmem:[#allocation3 + $0x18] sm:$0xff] (%p2703_p0)  ;;  %v9979_v23 = vld [vmem:[#allocation3 + $0x20] sm:$0xff] (%p2703_p0)  ;;  %v9981_v1 = vld [vmem:[#allocation3 + $0x28] sm:$0xff] (%p2703_p0) }
 0x3f0   : > { %v9983_v45 = vld [vmem:[#allocation3 + $0x30] sm:$0xff] (%p2703_p0)  ;;  %v9985_v50 = vld [vmem:[#allocation3 + $0x38] sm:$0xff] (%p2703_p0)  ;;  %v9987_v51 = vld [vmem:[#allocation3 + $0x40] sm:$0xff] (%p2703_p0) }
 0x3f1   : >> { %v4652_v54 = vadd.f32 %v7488_v31, %v4651_v19  ;;  %v4689_v57 = vadd.f32 %v4688_v6, %v4674_v7  ;;  %v9989_v56 = vld [vmem:[#allocation3 + $0x48] sm:$0xff] (%p2703_p0)  ;;  %v9991_v59 = vld [vmem:[#allocation3 + $0x50] sm:$0xff] (%p2703_p0)  ;;  %v9993_v62 = vld [vmem:[#allocation3 + $0x58] sm:$0xff] (%p2703_p0) }
 0x3f2   : > { %v9995_v0 = vld [vmem:[#allocation3 + $0x60] sm:$0xff] (%p2703_p0)  ;;  %v9997_v11 = vld [vmem:[#allocation3 + $0x68] sm:$0xff] (%p2703_p0)  ;;  %v10003_v53 = vld [vmem:[#allocation3 + $0x70] sm:$0xff] (%p2703_p0) }
 0x3f3   : >> { %v4653_v20 = vadd.f32 %v7494_v61, %v4652_v54  ;;  %v4690_v2 = vadd.f32 %v4689_v57, %v4675_v10  ;;  %v10005_v40 = vld [vmem:[#allocation3 + $0x78] sm:$0xff] (%p2703_p0)  ;;  %v10007_v49 = vld [vmem:[#allocation3 + $0x80] sm:$0xff] (%p2703_p0)  ;;  %v10017_v7 = vld [vmem:[#allocation3 + $0x88] sm:$0xff] (%p2703_p0) }
 0x3f4   : > { %v10019_v6 = vld [vmem:[#allocation3 + $0x90] sm:$0xff] (%p2703_p0)  ;;  %v10021_v19 = vld [vmem:[#allocation3 + $0x98] sm:$0xff] (%p2703_p0) }
 0x3f5   : >> { %v4654_v41 = vadd.f32 %v7492_v8, %v4653_v20  ;;  %v4691_v4 = vadd.f32 %v4690_v2, %v4676_v52  ;;  %v10742_v8 = vld [vmem:[#allocation52_spill] sm:$0xff]  ;;  %v10031_v20 = vld [vmem:[#allocation3 + $0xa0] sm:$0xff] (%p2703_p0)  ;;  %v10033_v2 = vld [vmem:[#allocation3 + $0xa8] sm:$0xff] (%p2703_p0) }
 0x3f7   : >> { %v4655_v34 = vadd.f32 %v7498_v3, %v4654_v41  ;;  %v4692_v13 = vadd.f32 %v4691_v4, %v4677_v18  ;;  %v10035_v18 = vld [vmem:[#allocation3 + $0xb0] sm:$0xff] (%p2703_p0) }
 0x3f9   : >> { %v4656_v35 = vadd.f32 %v7496_v47, %v4655_v34  ;;  %v4693_v25 = vadd.f32 %v4692_v13, %v4678_v28  ;;  %v10045_v13 = vld [vmem:[#allocation3 + $0xb8] sm:$0xff] (%p2703_p0) }
 0x3fb   : >> { %v4657_v12 = vrot.slane %v4656_v35, 4  ;;  %v4694_v21 = vadd.f32 %v4693_v25, %v4679_v5  ;;  %v10047_v5 = vld [vmem:[#allocation3 + $0xc0] sm:$0xff] (%p2703_p0) }
 0x3fd   : >> { %v4658_v29 = vadd.f32 %v4657_v12, %v4656_v35  ;;  %v4695_v32 = vrot.slane %v4694_v21, 4  ;;  %v10049_v35 = vld [vmem:[#allocation3 + $0xc8] sm:$0xff] (%p2703_p0) }
 0x3ff   : >> { %v4659_v33 = vrot.slane %v4658_v29, 2  ;;  %v4696_v39 = vadd.f32 %v4695_v32, %v4694_v21  ;;  %v10059_v32 = vld [vmem:[#allocation3 + $0xd0] sm:$0xff] (%p2703_p0) }
 0x401   : >> { %v4660_v31 = vadd.f32 %v4659_v33, %v4658_v29  ;;  %v4697_v42 = vrot.slane %v4696_v39, 2 }
 0x403   : >> { %v4661_v37 = vrot.slane %v4660_v31, 1  ;;  %v4698_v61 = vadd.f32 %v4697_v42, %v4696_v39 }
 0x405   : >> { %v4662_v17 = vadd.f32 %v4661_v37, %v4660_v31  ;;  %v4699_v43 = vrot.slane %v4698_v61, 1  ;;  %2705 = sbr.rel (!%p2703_p0) target bundleno = 608 (0x260), region = 136  ;;  %v10069_v37 = vld [vmem:[#allocation3 + $0xd8] sm:$0xff] (%p2703_p0) }
 0x407   : >> { %v4663_v24 = vadd.f32 %v10742_v8, %v4662_v17   ;;  %v4700_v55 = vadd.f32 %v4699_v43, %v4698_v61  ;;  %v10071_v61 = vld [vmem:[#allocation3 + $0xe0] sm:$0xff] (%p2703_p0)  ;;  %v4806_v43 = vld [vmem:[%s8147_s28 + $0x8] sm:$0xff] (%p2703_p0) }
 0x408   : > { %v4805_v17 = vld [vmem:[%s8147_s28] sm:$0xff] (%p2703_p0)  ;;  %v4814_v8 = vld [vmem:[%s8147_s28 + $0x48] sm:$0xff] (%p2703_p0) }
 0x409   : >> { %v4701_v22 = vadd.f32 %v10743_v30, %v4700_v55   ;;  %v10745_v33 = vmov %v4663_v24  ;;  %v9967_v47 = vmul.f32 (%p2703_p0), 0.00390625, %v4663_v24  ;;  %v4813_v24 = vld [vmem:[%s8147_s28 + $0x40] sm:$0xff] (%p2703_p0) }
 0x40b   : >> { %v10744_v36 = vmov %v4701_v22  ;;  %v4703_v14 = vmul.f32 (%p2703_p0), 0.00390625, %v4701_v22  ;;  %v4704_v26 = vmul.f32 (%p2703_p0), %v9967_v47, %v9967_v47  ;;  %v4742_v63 = vsub.f32 (%p2703_p0), %v9973_v46, %v9967_v47  ;;  %v10083_v22 = vld [vmem:[#allocation3 + $0xe8] sm:$0xff] (%p2703_p0) }
 0x40c   : > { %v4741_v36 = vsub.f32 %v9971_v48, %v9967_v47  ;;  %v4743_v16 = vsub.f32 %v9975_v15, %v9967_v47  ;;  %v4744_v38 = vsub.f32 %v9977_v58, %v9967_v47  ;;  %v4745_v44 = vsub.f32 %v9979_v23, %v9967_v47  ;;  %v4812_v48 = vld [vmem:[%s8147_s28 + $0x38] sm:$0xff] }
 0x40d   : > { %v4705_v9 = vsub.f32 %v4703_v14, %v4704_v26  ;;  %v4746_v60 = vsub.f32 %v9981_v1, %v9967_v47  ;;  %v4747_v10 = vsub.f32 %v9983_v45, %v9967_v47  ;;  %v4748_v54 = vsub.f32 %v9985_v50, %v9967_v47  ;;  %v4807_v26 = vld [vmem:[%s8147_s28 + $0x10] sm:$0xff]  ;;  %v4810_v50 = vld [vmem:[%s8147_s28 + $0x28] sm:$0xff] }
 0x40e   : > { %v4749_v57 = vsub.f32 %v9987_v51, %v9967_v47  ;;  %v4750_v52 = vsub.f32 %v9989_v56, %v9967_v47  ;;  %v4751_v41 = vsub.f32 %v9991_v59, %v9967_v47  ;;  %v4752_v4 = vsub.f32 %v9993_v62, %v9967_v47  ;;  %v4819_v51 = vld [vmem:[%s8147_s28 + $0x70] sm:$0xff] }
 0x40f   : > { %v4706_v3 = vmax.f32 %v4705_v9, 0.0  ;;  %v4753_v34 = vsub.f32 %v9995_v0, %v9967_v47  ;;  %v4754_v28 = vsub.f32 %v9997_v11, %v9967_v47  ;;  %v4755_v25 = vsub.f32 %v10003_v53, %v9967_v47  ;;  %v4808_v9 = vld [vmem:[%s8147_s28 + $0x18] sm:$0xff] }
 0x410   : > { %v4756_v12 = vsub.f32 %v10005_v40, %v9967_v47  ;;  %v4757_v21 = vsub.f32 %v10007_v49, %v9967_v47  ;;  %v4758_v29 = vsub.f32 %v10017_v7, %v9967_v47  ;;  %v4759_v33 = vsub.f32 %v10019_v6, %v9967_v47  ;;  %v4823_v40 = vld [vmem:[%s8147_s28 + $0x90] sm:$0xff] }
 0x411   : > { %v4707_v27 = vadd.f32 1e-05, %v4706_v3  ;;  %v4760_v39 = vsub.f32 %v10021_v19, %v9967_v47  ;;  %v4809_v3 = vld [vmem:[%s8147_s28 + $0x20] sm:$0xff]  ;;  %v4827_v49 = vld [vmem:[%s8147_s28 + $0xb0] sm:$0xff]  ;;  %v10746_v7 = vsub.f32 %v10031_v20, %v9967_v47 }
 0x413   : > { %7724 = vrsqrt.f32 %v4707_v27  ;;  %v4811_v27 = vld [vmem:[%s8147_s28 + $0x30] sm:$0xff] }
 0x41d   : > { %v10085_v14 = vpop.eup %7724 }
 0x41e   : > { %v4773_v58 = vmul.f32 %v10085_v14, %v4741_v36  ;;  %v4774_v23 = vmul.f32 %v10085_v14, %v4742_v63  ;;  %v4775_v1 = vmul.f32 %v10085_v14, %v4743_v16  ;;  %v4776_v45 = vmul.f32 %v10085_v14, %v4744_v38 }
 0x41f   : > { %v4777_v46 = vmul.f32 %v10085_v14, %v4745_v44  ;;  %v4778_v15 = vmul.f32 %v10085_v14, %v4746_v60  ;;  %v4779_v36 = vmul.f32 %v10085_v14, %v4747_v10  ;;  %v4780_v63 = vmul.f32 %v10085_v14, %v4748_v54  ;;  %v4815_v10 = vld [vmem:[%s8147_s28 + $0x50] sm:$0xff]  ;;  %v4816_v54 = vld [vmem:[%s8147_s28 + $0x58] sm:$0xff] }
 0x420   : > { %v4837_v16 = vadd.f32 %v4805_v17, %v4773_v58  ;;  %v4838_v38 = vadd.f32 %v4806_v43, %v4774_v23  ;;  %v4839_v30 = vadd.f32 %v4807_v26, %v4775_v1  ;;  %v4840_v55 = vadd.f32 %v4808_v9, %v4776_v45  ;;  %v4817_v17 = vld [vmem:[%s8147_s28 + $0x60] sm:$0xff] }
 0x421   : > { %v4841_v42 = vadd.f32 %v4809_v3, %v4777_v46  ;;  %v4842_v44 = vadd.f32 %v4810_v50, %v4778_v15  ;;  %v4843_v60 = vadd.f32 %v4811_v27, %v4779_v36  ;;  %v4844_v31 = vadd.f32 %v4812_v48, %v4780_v63  ;;  %v4826_v46 = vld [vmem:[%s8147_s28 + $0xa8] sm:$0xff]  ;;  %v4828_v15 = vld [vmem:[%s8147_s28 + $0xb8] sm:$0xff]  ;;  %v4829_v45 = vld [vmem:[%s8147_s28 + $0xc0] sm:$0xff] }
 0x422   : > { %4869 = vst [vmem:[%s8297_s18] sm:$0xff] %v4837_v16  ;;  %4870 = vst [vmem:[%s8297_s18 + $0x8] sm:$0xff] %v4838_v38  ;;  %v4781_v43 = vmul.f32 %v10085_v14, %v4749_v57  ;;  %v4782_v26 = vmul.f32 %v10085_v14, %v4750_v52  ;;  %v4783_v9 = vmul.f32 %v10085_v14, %v4751_v41  ;;  %v4820_v57 = vld [vmem:[%s8147_s28 + $0x78] sm:$0xff]  ;;  %v4739_v50 = vld [vmem:[#allocation3 + $0xf0] sm:$0xff] }
 0x423   : > { %4871 = vst [vmem:[%s8297_s18 + $0x10] sm:$0xff] %v4839_v30  ;;  %4872 = vst [vmem:[%s8297_s18 + $0x18] sm:$0xff] %v4840_v55  ;;  %v4784_v55 = vmul.f32 %v10085_v14, %v4752_v4  ;;  %v4818_v30 = vld [vmem:[%s8147_s28 + $0x68] sm:$0xff]  ;;  %v4785_v56 = vmul.f32 %v10085_v14, %v4753_v34  ;;  %v4786_v59 = vmul.f32 %v10085_v14, %v4754_v28  ;;  %v4821_v34 = vld [vmem:[%s8147_s28 + $0x80] sm:$0xff] }
 0x424   : > { %4873 = vst [vmem:[%s8297_s18 + $0x20] sm:$0xff] %v4841_v42  ;;  %4874 = vst [vmem:[%s8297_s18 + $0x28] sm:$0xff] %v4842_v44  ;;  %v4787_v62 = vmul.f32 %v10085_v14, %v4755_v25  ;;  %v4788_v0 = vmul.f32 %v10085_v14, %v4756_v12  ;;  %v4845_v52 = vadd.f32 %v4813_v24, %v4781_v43  ;;  %v4822_v28 = vld [vmem:[%s8147_s28 + $0x88] sm:$0xff]  ;;  %v4824_v12 = vld [vmem:[%s8147_s28 + $0x98] sm:$0xff] }
 0x425   : > { %4875 = vst [vmem:[%s8297_s18 + $0x30] sm:$0xff] %v4843_v60  ;;  %4876 = vst [vmem:[%s8297_s18 + $0x38] sm:$0xff] %v4844_v31  ;;  %v4846_v41 = vadd.f32 %v4814_v8, %v4782_v26  ;;  %v4847_v11 = vadd.f32 %v4815_v10, %v4783_v9  ;;  %v4848_v4 = vadd.f32 %v4816_v54, %v4784_v55  ;;  %v4825_v24 = vld [vmem:[%s8147_s28 + $0xa0] sm:$0xff]  ;;  %v4740_v36 = vld [vmem:[#allocation3 + $0xf8] sm:$0xff] }
 0x426   : > { %v4849_v31 = vadd.f32 %v4817_v17, %v4785_v56  ;;  %v4850_v53 = vadd.f32 %v4818_v30, %v4786_v59  ;;  %v4851_v25 = vadd.f32 %v4819_v51, %v4787_v62  ;;  %v4852_v42 = vadd.f32 %v4820_v57, %v4788_v0  ;;  %4877 = vst [vmem:[%s8297_s18 + $0x40] sm:$0xff] %v4845_v52  ;;  %v4830_v38 = vld [vmem:[%s8147_s28 + $0xc8] sm:$0xff]  ;;  %v4831_v44 = vld [vmem:[%s8147_s28 + $0xd0] sm:$0xff]  ;;  %v4832_v60 = vld [vmem:[%s8147_s28 + $0xd8] sm:$0xff] }
 0x427   : > { %4878 = vst [vmem:[%s8297_s18 + $0x48] sm:$0xff] %v4846_v41  ;;  %4879 = vst [vmem:[%s8297_s18 + $0x50] sm:$0xff] %v4847_v11  ;;  %v4789_v8 = vmul.f32 %v10085_v14, %v4757_v21  ;;  %v4790_v3 = vmul.f32 %v10085_v14, %v4758_v29  ;;  %v4791_v27 = vmul.f32 %v10085_v14, %v4759_v33  ;;  %v4833_v51 = vld [vmem:[%s8147_s28 + $0xe0] sm:$0xff]  ;;  %v4835_v41 = vld [vmem:[%s8147_s28 + $0xf0] sm:$0xff] }
 0x428   : > { %4880 = vst [vmem:[%s8297_s18 + $0x58] sm:$0xff] %v4848_v4  ;;  %v4792_v48 = vmul.f32 %v10085_v14, %v4760_v39  ;;  %4881 = vst [vmem:[%s8297_s18 + $0x60] sm:$0xff] %v4849_v31  ;;  %v4793_v6 = vmul.f32 %v10085_v14, %v10746_v7  ;;  %v10747_v21 = vsub.f32 %v10033_v2, %v9967_v47 }
 0x429   : > { %4882 = vst [vmem:[%s8297_s18 + $0x68] sm:$0xff] %v4850_v53  ;;  %4883 = vst [vmem:[%s8297_s18 + $0x70] sm:$0xff] %v4851_v25  ;;  %v10748_v29 = vsub.f32 %v10035_v18, %v9967_v47  ;;  %v10749_v39 = vsub.f32 %v10045_v13, %v9967_v47  ;;  %v4853_v58 = vadd.f32 %v4821_v34, %v4789_v8 }
 0x42a   : > { %4884 = vst [vmem:[%s8297_s18 + $0x78] sm:$0xff] %v4852_v42  ;;  %v4794_v19 = vmul.f32 %v10085_v14, %v10747_v21  ;;  %v4854_v23 = vadd.f32 %v4822_v28, %v4790_v3  ;;  %v4855_v2 = vadd.f32 %v4823_v40, %v4791_v27  ;;  %v4856_v1 = vadd.f32 %v4824_v12, %v4792_v48 }
 0x42b   : > { %v4795_v33 = vmul.f32 %v10085_v14, %v10748_v29  ;;  %v4796_v20 = vmul.f32 %v10085_v14, %v10749_v39  ;;  %v4857_v18 = vadd.f32 %v4825_v24, %v4793_v6  ;;  %4885 = vst [vmem:[%s8297_s18 + $0x80] sm:$0xff] %v4853_v58  ;;  %v10750_v10 = vsub.f32 %v10047_v5, %v9967_v47  ;;  %v4834_v5 = vld [vmem:[%s8147_s28 + $0xe8] sm:$0xff] }
 0x42c   : > { %v4858_v63 = vadd.f32 %v4826_v46, %v4794_v19  ;;  %4886 = vst [vmem:[%s8297_s18 + $0x88] sm:$0xff] %v4854_v23  ;;  %4887 = vst [vmem:[%s8297_s18 + $0x90] sm:$0xff] %v4855_v2  ;;  %v10751_v17 = vsub.f32 %v10049_v35, %v9967_v47  ;;  %v10752_v26 = vsub.f32 %v10059_v32, %v9967_v47 }
 0x42d   : > { %v4859_v16 = vadd.f32 %v4827_v49, %v4795_v33  ;;  %v4860_v13 = vadd.f32 %v4828_v15, %v4796_v20  ;;  %4888 = vst [vmem:[%s8297_s18 + $0x98] sm:$0xff] %v4856_v1  ;;  %v4797_v54 = vmul.f32 %v10085_v14, %v10750_v10  ;;  %v10753_v55 = vsub.f32 %v10069_v37, %v9967_v47 }
 0x42e   : > { %v4798_v43 = vmul.f32 %v10085_v14, %v10751_v17  ;;  %v4799_v9 = vmul.f32 %v10085_v14, %v10752_v26  ;;  %4889 = vst [vmem:[%s8297_s18 + $0xa0] sm:$0xff] %v4857_v18  ;;  %4890 = vst [vmem:[%s8297_s18 + $0xa8] sm:$0xff] %v4858_v63  ;;  %v10754_v35 = vsub.f32 %v10071_v61, %v9967_v47 }
 0x42f   : > { %v4800_v30 = vmul.f32 %v10085_v14, %v10753_v55  ;;  %4891 = vst [vmem:[%s8297_s18 + $0xb0] sm:$0xff] %v4859_v16  ;;  %4892 = vst [vmem:[%s8297_s18 + $0xb8] sm:$0xff] %v4860_v13  ;;  %v10755_v57 = vsub.f32 %v10083_v22, %v9967_v47  ;;  %v4771_v56 = vsub.f32 %v4739_v50, %v9967_v47  ;;  %v4836_v22 = vld [vmem:[%s8147_s28 + $0xf8] sm:$0xff]  ;;  %s7816_s28 = sshll.u32 %s7937_s4, 4  ;;  %s7817_s28 = int_to_ptr.vmem [resolvable:$false] %s7816_s28 }
 0x430   : > { %v4801_v32 = vmul.f32 %v10085_v14, %v10754_v35  ;;  %v4772_v59 = vsub.f32 %v4740_v36, %v9967_v47  ;;  %v4861_v62 = vadd.f32 %v4829_v45, %v4797_v54  ;;  %v4862_v61 = vadd.f32 %v4830_v38, %v4798_v43  ;;  %s7818_s20 = scalar_lea.vmem %s7817_s28, 8192  ;;  %p7819_p12 = scmp.lt.s32.totalorder %s10260_s10, %s7817_s28 }
 0x431   : > { %v4802_v37 = vmul.f32 %v10085_v14, %v10755_v57  ;;  %v4863_v0 = vadd.f32 %v4831_v44, %v4799_v9  ;;  %v4864_v52 = vadd.f32 %v4832_v60, %v4800_v30  ;;  %v4803_v34 = vmul.f32 %v10085_v14, %v4771_v56  ;;  %p7820_p1 = scmp.lt.s32.totalorder %s7818_s20, %s7812_s30 }
 0x432   : > { %v4865_v11 = vadd.f32 %v4833_v51, %v4801_v32  ;;  %v4804_v47 = vmul.f32 %v10085_v14, %v4772_v59  ;;  %4893 = vst [vmem:[%s8297_s18 + $0xc0] sm:$0xff] %v4861_v62  ;;  %4894 = vst [vmem:[%s8297_s18 + $0xc8] sm:$0xff] %v4862_v61 }
 0x433   : > { %v4866_v4 = vadd.f32 %v4834_v5, %v4802_v37  ;;  %4895 = vst [vmem:[%s8297_s18 + $0xd0] sm:$0xff] %v4863_v0  ;;  %4896 = vst [vmem:[%s8297_s18 + $0xd8] sm:$0xff] %v4864_v52  ;;  %v4867_v28 = vadd.f32 %v4835_v41, %v4803_v34  ;;  %p7821_p13 = por %p7820_p1, %p7819_p12 }
 0x434   : > { %4897 = vst [vmem:[%s8297_s18 + $0xe0] sm:$0xff] %v4865_v11  ;;  %v4868_v31 = vadd.f32 %v4836_v22, %v4804_v47 }
 0x435   : > { %4898 = vst [vmem:[%s8297_s18 + $0xe8] sm:$0xff] %v4866_v4  ;;  %4899 = vst [vmem:[%s8297_s18 + $0xf0] sm:$0xff] %v4867_v28  ;;  %p7822_p6 = pnand %p7821_p13, %p7815_p9 }
 0x436   : > { %4900 = vst [vmem:[%s8297_s18 + $0xf8] sm:$0xff] %v4868_v31 }
 0x437   : > { %7825 = shalt.err (!%p7822_p6)
}
 0x438   : > { %s7826_s18 = scalar_lea.hbm %s10258_s21, 4096  ;;  %s7830_s24 = scalar_lea.hbm %s10311_s3, 8192 }
 0x439   : > { %p7827_p10 = scmp.ne.s32.totalorder %s10258_s21, %s7826_s18  ;;  %p7831_p8 = scmp.lt.u32.totalorder %s10258_s21, %s10311_s3 }
 0x43a   : > { %p7832_p11 = scmp.lt.u32.totalorder %s7830_s24, %s7826_s18  ;;  %p7834_p2 = scmp.lt.u32.totalorder %s7826_s18, %s10258_s21 }
 0x43b   : > { %p7828_p4 = pnand %p7827_p10, %p10756_p3 }
 0x43c   : > { %p7833_p0 = por %p7832_p11, %p7831_p8 }
 0x43d   : > { %p7829_p5 = pneg %p7828_p4 }
 0x43e   : > { %p7835_p7 = por %p7834_p2, %p7833_p0 }
 0x440   : > { %p7836_p9 = pnand %p7835_p7, %p7829_p5 }
 0x442   : > { %7839 = shalt.err (!%p7836_p9)
}
 0x443   : > { %s7938_s5 = smov 128   ;;  %s7939_s11 = smov 8  }
 0x444   : > { %7613 = dma.vmem_to_hbm [thread:$0]  (%p10756_p3), %s10260_s10, 4096, %s10258_s21, %s4902_s26, %s7938_s5, %s7938_s5, %s7939_s11  }
 0x445 PF: > { %s4930_s25 = sand.u32 1, %s7894_s12   ;;  %p10757_p12 = scmp.ne.s32.totalorder %s10424_s19, 0 }
 0x446   : > { %p10758_p1 = scmp.ge.s32.totalorder %s7906_s15, 2  ;;  %s4931_s16 = scalar_lea.sflag [#allocation6], %s4930_s25 }
 0x448   : > { %p7627_p13 = pnand %p10758_p1, %p10757_p12 }
 0x44a   : > { %7889 = dma.done.wait (!%p7627_p13), %s4931_s16, 4096  }
 0x44b   : > { %7891 = vsyncadd (!%p7627_p13), %s4931_s16, 4294963200  ;;  %p17_p6 = scmp.ge.s32.totalorder %s8076_s23, 4   ;;  %s10759_s12 = smov %s7898_s13 }
 0x44c   : > { %s10760_s13 = smov %s7902_s14  ;;  %s10761_s14 = smov %s8092_s9 }
 0x44d   : > { %s10762_s15 = smov %s8076_s23  ;;  %19 = sbr.rel (!%p17_p6) target bundleno = 6 (0x6), region = 147 }
 0x454   :  { %4936 = vsyncpa [#allocation5], 1 }
 0x455   :  { %4938 = vsyncpa [#allocation5 + $0x1], 1 }
 0x456   :  { %4939 = vsyncpa [#allocation8], 1 }
 0x457   :  { %4940 = vsyncpa [#allocation6], 1 }
 0x458   :  { %4942 = vsyncpa [#allocation6 + $0x1], 1 }

</bundles_post_ra>
